<compile_context>
chip_gen: v6e
topology: v6e:2x2x1
jax: 0.10.0
libtpu: 0.0.40
codegen_flags: <defaults>
</compile_context>

<pallas_src>
import functools
import math

import numpy as np
import jax
import jax.numpy as jnp
from jax.experimental import pallas as pl
from jax.experimental.pallas import tpu as pltpu  # noqa: F401  (TPU backend)

# ----------------- synthetic small-BERT / MTL config -----------------
VOCAB = 100
TYPE_VOCAB = 2
MAX_POS = 16
HIDDEN = 32
NUM_LAYERS = 2
NUM_HEADS = 2
HEAD_DIM = HIDDEN // NUM_HEADS
INTERMEDIATE = 64
HIDDEN_S = 32          # tp.hidden_s
HIDDEN_E = 32          # tp.hidden_e
LABEL_SIZE = 3         # tp.label_size
LN_EPS = 1e-12

LANES = 128
EMB_ROWS = 128         # fslab rows 0:118 = word | type | pos embedding rows

# ---- bf16 weight-slab block ids (each block is one 128x128 zero-padded tile) ----
W_PER_LAYER = 10       # per layer: wq(h0,h1) wk(h0,h1) wv(h0,h1) wo(h0,h1) w1 w2
W_POOLER = NUM_LAYERS * W_PER_LAYER
W_HS = W_POOLER + 1
W_CS = W_POOLER + 2
W_HE_P = W_POOLER + 3
W_HE_H = W_POOLER + 4
W_HE_L = W_POOLER + 5
W_CE = W_POOLER + 6
N_WBLOCKS = W_POOLER + 7

# ---- f32 vector-slab row ids (one zero-padded (1,128) row per bias/LN vector) ----
V_EMB_LN_G = 0
V_EMB_LN_B = 1
V_LAYER_BASE = 2
V_PER_LAYER = 13       # bq(h0,h1) bk(h0,h1) bv(h0,h1) bo ln1_g ln1_b b1 b2 ln2_g ln2_b
V_POOLER_B = V_LAYER_BASE + NUM_LAYERS * V_PER_LAYER
V_B_HS = V_POOLER_B + 1
V_B_CS = V_POOLER_B + 2
V_B_HE = V_POOLER_B + 3
V_B_CE = V_POOLER_B + 4
N_VROWS = V_POOLER_B + 5
FSLAB_ROWS = EMB_ROWS + ((N_VROWS + 7) // 8) * 8

assert VOCAB + TYPE_VOCAB + MAX_POS <= LANES


# ----------------- fused whole-model Pallas kernel -----------------

def _bert_mtl_kernel(wid_ref, tid_ref, pid_ref, addm_ref, wslab_ref, fslab_ref,
                     logits_e_ref, logits_s_ref, *, batch, seq, out_rows):
    f32 = jnp.float32
    bf16 = jnp.bfloat16
    bs = batch * seq

    def wblk(i):                      # (128,128) bf16 weight tile (static row slice)
        return wslab_ref[i * 128:(i + 1) * 128, :]

    def vrow(i):                      # (1,128) f32 bias / LN vector, zero lane-padded
        return fslab_ref[EMB_ROWS + i:EMB_ROWS + i + 1, :]

    def mm(a_bf16, wi):               # bf16 MXU matmul, f32 accumulation
        return jnp.dot(a_bf16, wblk(wi), preferred_element_type=f32)

    def ln(x, gi, bi):
        # Stats over the true HIDDEN lanes only (padded lanes are exactly 0 and
        # stay 0 because gamma/beta are zero-padded past HIDDEN).
        mu = jnp.sum(x, axis=-1, keepdims=True) * (1.0 / HIDDEN)
        var = jnp.sum(x * x, axis=-1, keepdims=True) * (1.0 / HIDDEN) - mu * mu
        inv = jax.lax.rsqrt(jnp.maximum(var, 0.0) + LN_EPS)
        return (x - mu) * inv * vrow(gi) + vrow(bi)

    def gelu(y):
        # TODO(synk): HF BERT uses exact erf-GELU; tanh approximation used here.
        return 0.5 * y * (1.0 + jnp.tanh(0.7978845608028654 *
                                         (y + 0.044715 * y * y * y)))

    # ---- embedding lookup: 3-hot row-select matmul against the f32 table ----
    lane = jax.lax.broadcasted_iota(jnp.int32, (bs, LANES), 1)
    hot = ((lane == wid_ref[...]) | (lane == tid_ref[...]) | (lane == pid_ref[...]))
    emb = jnp.dot(jnp.where(hot, 1.0, 0.0), fslab_ref[0:EMB_ROWS, :],
                  preferred_element_type=f32)                    # (bs, 128)
    x = ln(emb, V_EMB_LN_G, V_EMB_LN_B)                          # lanes >= HIDDEN stay 0

    addm = addm_ref[...]                                         # (bs, bs) additive mask

    # ---- encoder layers (unrolled; weights addressed by static block ids) ----
    for l in range(NUM_LAYERS):
        wb = l * W_PER_LAYER
        vb = V_LAYER_BASE + l * V_PER_LAYER
        xb = x.astype(bf16)
        attn = None
        for h in range(NUM_HEADS):
            # Per-head Q/K/V via leading-axis weight blocks (no lane slicing);
            # 1/sqrt(head_dim) is folded into wq/bq at pack time.
            q = (mm(xb, wb + h) + vrow(vb + h)).astype(bf16)
            k = (mm(xb, wb + 2 + h) + vrow(vb + 2 + h)).astype(bf16)
            v = (mm(xb, wb + 4 + h) + vrow(vb + 4 + h)).astype(bf16)
            s = jax.lax.dot_general(q, k, (((1,), (1,)), ((), ())),
                                    preferred_element_type=f32) + addm   # (bs, bs)
            s = s - jnp.max(s, axis=-1, keepdims=True)
            p = jnp.exp(s)
            p = (p * pl.reciprocal(jnp.sum(p, axis=-1, keepdims=True),
                                   approx=True)).astype(bf16)
            ctx = jnp.dot(p, v, preferred_element_type=f32).astype(bf16)
            part = mm(ctx, wb + 6 + h)            # head "concat" folded into W_o
            attn = part if attn is None else attn + part
        x = ln(attn + vrow(vb + 6) + x, vb + 7, vb + 8)          # fused residual + LN
        h1 = gelu(mm(x.astype(bf16), wb + 8) + vrow(vb + 9))
        ffn = mm(h1.astype(bf16), wb + 9) + vrow(vb + 10)
        x = ln(ffn + x, vb + 11, vb + 12)

    # ---- pooler: select [CLS] rows with a tiny 0/1 matmul (no gather/concat) ----
    r_i = jax.lax.broadcasted_iota(jnp.int32, (out_rows, bs), 0)
    c_i = jax.lax.broadcasted_iota(jnp.int32, (out_rows, bs), 1)
    sel = jnp.where(c_i == r_i * seq, 1.0, 0.0)                  # rows >= batch are zero
    cls = jnp.dot(sel, x, preferred_element_type=f32)            # (out_rows, 128)
    pooled = jnp.tanh(mm(cls.astype(bf16), W_POOLER) + vrow(V_POOLER_B))
    # nn.Dropout at inference (eval mode) is the identity.

    # ---- asymmetric multi-task head ----
    hidden_s = jnp.maximum(mm(pooled.astype(bf16), W_HS) + vrow(V_B_HS), 0.0)
    logits_s = mm(hidden_s.astype(bf16), W_CS) + vrow(V_B_CS)    # lanes >= 3 are 0
    # concat([pooled, hidden_s, logits_s]) @ W_he expressed as lane-aligned partials.
    hidden_e = jnp.maximum(
        mm(pooled.astype(bf16), W_HE_P)
        + mm(hidden_s.astype(bf16), W_HE_H)
        + mm(logits_s.astype(bf16), W_HE_L)
        + vrow(V_B_HE), 0.0)
    logits_e = mm(hidden_e.astype(bf16), W_CE) + vrow(V_B_CE)

    # Lane- and sublane-dense (8,128) stores; wrapper slices [:B, :LABEL_SIZE].
    logits_e_ref[...] = logits_e
    logits_s_ref[...] = logits_s


# ----------------- wrapper (single pallas_call, packed slabs) -----------------

def bert_mtl_forward(packed, input_ids, token_type_ids, attention_mask):
    b, s = input_ids.shape
    assert s <= MAX_POS
    bs = b * s
    out_rows = max(8, ((b + 7) // 8) * 8)

    wid = input_ids.reshape(bs, 1).astype(jnp.int32)
    tid = token_type_ids.reshape(bs, 1).astype(jnp.int32) + VOCAB
    pid = (jnp.tile(jnp.arange(s, dtype=jnp.int32), b).reshape(bs, 1)
           + (VOCAB + TYPE_VOCAB))

    # Block-diagonal additive attention mask (0 = attend, -10000 = masked / other
    # sequence), built once here so the kernel never re-broadcasts it.
    seq_id = jnp.repeat(jnp.arange(b, dtype=jnp.int32), s)                 # (bs,)
    same = (seq_id[:, None] == seq_id[None, :]).astype(jnp.float32)        # (bs, bs)
    keep = same * attention_mask.astype(jnp.float32).reshape(1, bs)
    addm = (keep - 1.0) * 10000.0

    kernel = functools.partial(_bert_mtl_kernel, batch=b, seq=s, out_rows=out_rows)
    logits_e_pad, logits_s_pad = pl.pallas_call(
        kernel,
        out_shape=(jax.ShapeDtypeStruct((out_rows, LANES), jnp.float32),
                   jax.ShapeDtypeStruct((out_rows, LANES), jnp.float32)),
    )(wid, tid, pid, addm, packed["wslab"], packed["fslab"])
    return logits_e_pad[:b, :LABEL_SIZE], logits_s_pad[:b, :LABEL_SIZE]


# ----------------- synthetic parameters (natural shapes) -----------------

def init_params(key):
    keys = iter(jax.random.split(key, 24))

    def nrm(shape):
        return 0.02 * jax.random.normal(next(keys), shape, jnp.float32)

    def xavier(shape):
        fan_in, fan_out = shape
        limit = math.sqrt(6.0 / (fan_in + fan_out))
        return jax.random.uniform(next(keys), shape, jnp.float32, -limit, limit)

    L, H, I = NUM_LAYERS, HIDDEN, INTERMEDIATE
    return {
        "word_emb": nrm((VOCAB, H)),
        "pos_emb": nrm((MAX_POS, H)),
        "type_emb": nrm((TYPE_VOCAB, H)),
        "emb_ln_g": jnp.ones((H,), jnp.float32),
        "emb_ln_b": jnp.zeros((H,), jnp.float32),
        "wq": nrm((L, H, H)), "bq": jnp.zeros((L, H), jnp.float32),
        "wk": nrm((L, H, H)), "bk": jnp.zeros((L, H), jnp.float32),
        "wv": nrm((L, H, H)), "bv": jnp.zeros((L, H), jnp.float32),
        "wo": nrm((L, H, H)), "bo": jnp.zeros((L, H), jnp.float32),
        "ln1_g": jnp.ones((L, H), jnp.float32), "ln1_b": jnp.zeros((L, H), jnp.float32),
        "w1": nrm((L, H, I)), "b1": jnp.zeros((L, I), jnp.float32),
        "w2": nrm((L, I, H)), "b2": jnp.zeros((L, H), jnp.float32),
        "ln2_g": jnp.ones((L, H), jnp.float32), "ln2_b": jnp.zeros((L, H), jnp.float32),
        "pooler_w": nrm((H, H)), "pooler_b": jnp.zeros((H,), jnp.float32),
        "w_hs": xavier((H, HIDDEN_S)), "b_hs": jnp.zeros((HIDDEN_S,), jnp.float32),
        "w_cs": nrm((HIDDEN_S, LABEL_SIZE)), "b_cs": jnp.zeros((LABEL_SIZE,), jnp.float32),
        "w_he": xavier((H + HIDDEN_S + LABEL_SIZE, HIDDEN_E)),
        "b_he": jnp.zeros((HIDDEN_E,), jnp.float32),
        "w_ce": nrm((HIDDEN_E, LABEL_SIZE)), "b_ce": jnp.zeros((LABEL_SIZE,), jnp.float32),
    }


def pack_params(p):
    """Pack all parameters into one bf16 weight slab + one f32 table/bias slab."""
    sc = 1.0 / math.sqrt(HEAD_DIM)   # folded into wq / bq

    wblocks = np.zeros((N_WBLOCKS, 128, LANES), np.float32)

    def setw(i, mat):
        m = np.asarray(mat, np.float32)
        wblocks[i, :m.shape[0], :m.shape[1]] = m

    for l in range(NUM_LAYERS):
        base = l * W_PER_LAYER
        for h in range(NUM_HEADS):
            c0 = h * HEAD_DIM
            setw(base + h,     np.asarray(p["wq"][l])[:, c0:c0 + HEAD_DIM] * sc)
            setw(base + 2 + h, np.asarray(p["wk"][l])[:, c0:c0 + HEAD_DIM])
            setw(base + 4 + h, np.asarray(p["wv"][l])[:, c0:c0 + HEAD_DIM])
            setw(base + 6 + h, np.asarray(p["wo"][l])[c0:c0 + HEAD_DIM, :])
        setw(base + 8, p["w1"][l])
        setw(base + 9, p["w2"][l])
    setw(W_POOLER, p["pooler_w"])
    setw(W_HS, p["w_hs"])
    setw(W_CS, p["w_cs"])
    setw(W_HE_P, np.asarray(p["w_he"])[0:HIDDEN, :])
    setw(W_HE_H, np.asarray(p["w_he"])[HIDDEN:HIDDEN + HIDDEN_S, :])
    setw(W_HE_L, np.asarray(p["w_he"])[HIDDEN + HIDDEN_S:, :])
    setw(W_CE, p["w_ce"])
    wslab = jnp.asarray(wblocks.reshape(N_WBLOCKS * 128, LANES), dtype=jnp.bfloat16)

    fslab = np.zeros((FSLAB_ROWS, LANES), np.float32)
    fslab[0:VOCAB, 0:HIDDEN] = np.asarray(p["word_emb"])
    fslab[VOCAB:VOCAB + TYPE_VOCAB, 0:HIDDEN] = np.asarray(p["type_emb"])
    fslab[VOCAB + TYPE_VOCAB:VOCAB + TYPE_VOCAB + MAX_POS, 0:HIDDEN] = np.asarray(p["pos_emb"])

    def setv(i, vec):
        v = np.asarray(vec, np.float32).reshape(-1)
        fslab[EMB_ROWS + i, :v.shape[0]] = v

    setv(V_EMB_LN_G, p["emb_ln_g"])
    setv(V_EMB_LN_B, p["emb_ln_b"])
    for l in range(NUM_LAYERS):
        vb = V_LAYER_BASE + l * V_PER_LAYER
        for h in range(NUM_HEADS):
            c0 = h * HEAD_DIM
            setv(vb + h,     np.asarray(p["bq"][l])[c0:c0 + HEAD_DIM] * sc)
            setv(vb + 2 + h, np.asarray(p["bk"][l])[c0:c0 + HEAD_DIM])
            setv(vb + 4 + h, np.asarray(p["bv"][l])[c0:c0 + HEAD_DIM])
        setv(vb + 6, p["bo"][l])
        setv(vb + 7, p["ln1_g"][l])
        setv(vb + 8, p["ln1_b"][l])
        setv(vb + 9, p["b1"][l])
        setv(vb + 10, p["b2"][l])
        setv(vb + 11, p["ln2_g"][l])
        setv(vb + 12, p["ln2_b"][l])
    setv(V_POOLER_B, p["pooler_b"])
    setv(V_B_HS, p["b_hs"])
    setv(V_B_CS, p["b_cs"])
    setv(V_B_HE, p["b_he"])
    setv(V_B_CE, p["b_ce"])

    return {"wslab": wslab, "fslab": jnp.asarray(fslab)}


if __name__ == "__main__":
    key = jax.random.PRNGKey(0)
    pkey, ikey = jax.random.split(key)
    params = init_params(pkey)
    packed = pack_params(params)

    B, S = 2, 8
    input_ids = jax.random.randint(ikey, (B, S), 0, VOCAB, dtype=jnp.int32)
    token_type_ids = jnp.zeros((B, S), jnp.int32)
    attention_mask = jnp.array([[1, 1, 1, 1, 1, 1, 1, 1],
                                [1, 1, 1, 1, 1, 1, 0, 0]], jnp.int32)

    fwd = jax.jit(bert_mtl_forward)
    logits_e, logits_s = fwd(packed, input_ids, token_type_ids, attention_mask)
    jax.block_until_ready((logits_e, logits_s))

    assert logits_e.shape == (B, LABEL_SIZE)
    assert logits_s.shape == (B, LABEL_SIZE)
    assert bool(jnp.all(jnp.isfinite(logits_e))) and bool(jnp.all(jnp.isfinite(logits_s)))
    print("KERNEL_OK")
</pallas_src>

<mosaic_0001>
module attributes {stable_mosaic.version = 11 : i64} {
  func.func @_bert_mtl_kernel(%arg0: memref<16x1xi32, #tpu.memory_space<vmem>>, %arg1: memref<16x1xi32, #tpu.memory_space<vmem>>, %arg2: memref<16x1xi32, #tpu.memory_space<vmem>>, %arg3: memref<16x16xf32, #tpu.memory_space<vmem>>, %arg4: memref<3456x128xbf16, #tpu.memory_space<vmem>>, %arg5: memref<168x128xf32, #tpu.memory_space<vmem>>, %arg6: memref<8x128xf32, #tpu.memory_space<vmem>>, %arg7: memref<8x128xf32, #tpu.memory_space<vmem>>) attributes {dimension_semantics = [], scalar_prefetch = 0 : i64, scratch_operands = 0 : i64, tpu.core_type = #tpu.core_type<tc>} {
    %0 = tpu.iota {dimensions = array<i32: 1>} : vector<16x128xi32>
    %c0 = arith.constant 0 : index
    %c0_0 = arith.constant 0 : index
    %1 = vector.load %arg0[%c0, %c0_0] : memref<16x1xi32, #tpu.memory_space<vmem>>, vector<16x1xi32>
    %2 = vector.broadcast %1 : vector<16x1xi32> to vector<16x128xi32>
    %3 = arith.cmpi eq, %0, %2 : vector<16x128xi32>
    %c0_1 = arith.constant 0 : index
    %c0_2 = arith.constant 0 : index
    %4 = vector.load %arg1[%c0_1, %c0_2] : memref<16x1xi32, #tpu.memory_space<vmem>>, vector<16x1xi32>
    %5 = vector.broadcast %4 : vector<16x1xi32> to vector<16x128xi32>
    %6 = arith.cmpi eq, %0, %5 : vector<16x128xi32>
    %7 = arith.ori %3, %6 : vector<16x128xi1>
    %c0_3 = arith.constant 0 : index
    %c0_4 = arith.constant 0 : index
    %8 = vector.load %arg2[%c0_3, %c0_4] : memref<16x1xi32, #tpu.memory_space<vmem>>, vector<16x1xi32>
    %9 = vector.broadcast %8 : vector<16x1xi32> to vector<16x128xi32>
    %10 = arith.cmpi eq, %0, %9 : vector<16x128xi32>
    %11 = arith.ori %7, %10 : vector<16x128xi1>
    %cst = arith.constant 1.000000e+00 : f32
    %cst_5 = arith.constant 0.000000e+00 : f32
    %12 = vector.broadcast %cst : f32 to vector<16x128xf32>
    %13 = vector.broadcast %cst_5 : f32 to vector<16x128xf32>
    %14 = arith.select %11, %12, %13 : vector<16x128xi1>, vector<16x128xf32>
    %c0_6 = arith.constant 0 : index
    %c0_7 = arith.constant 0 : index
    %15 = vector.load %arg5[%c0_6, %c0_7] : memref<168x128xf32, #tpu.memory_space<vmem>>, vector<128x128xf32>
    %cst_8 = arith.constant dense<0.000000e+00> : vector<16x128xf32>
    %16 = tpu.matmul %14, %15, %cst_8 {dimension_numbers = #tpu.dot_dimension_numbers<[1], [0], [0], [1], [0, 0, 1, 1], [], []>} : vector<16x128xf32>, vector<128x128xf32>, vector<16x128xf32> -> vector<16x128xf32>
    %cst_9 = arith.constant dense<0.000000e+00> : vector<16xf32>
    %17 = vector.multi_reduction <add>, %16, %cst_9 [1] : vector<16x128xf32> to vector<16xf32>
    %18 = vector.shape_cast %17 : vector<16xf32> to vector<16x1xf32>
    %cst_10 = arith.constant 3.125000e-02 : f32
    %19 = vector.broadcast %cst_10 : f32 to vector<16x1xf32>
    %20 = arith.mulf %18, %19 : vector<16x1xf32>
    %21 = arith.mulf %16, %16 : vector<16x128xf32>
    %cst_11 = arith.constant dense<0.000000e+00> : vector<16xf32>
    %22 = vector.multi_reduction <add>, %21, %cst_11 [1] : vector<16x128xf32> to vector<16xf32>
    %23 = vector.shape_cast %22 : vector<16xf32> to vector<16x1xf32>
    %cst_12 = arith.constant 3.125000e-02 : f32
    %24 = vector.broadcast %cst_12 : f32 to vector<16x1xf32>
    %25 = arith.mulf %23, %24 : vector<16x1xf32>
    %26 = arith.mulf %20, %20 : vector<16x1xf32>
    %27 = arith.subf %25, %26 : vector<16x1xf32>
    %cst_13 = arith.constant 0.000000e+00 : f32
    %28 = vector.broadcast %cst_13 : f32 to vector<16x1xf32>
    %29 = arith.maximumf %27, %28 : vector<16x1xf32>
    %cst_14 = arith.constant 9.99999996E-13 : f32
    %30 = vector.broadcast %cst_14 : f32 to vector<16x1xf32>
    %31 = arith.addf %29, %30 : vector<16x1xf32>
    %32 = math.rsqrt %31 : vector<16x1xf32>
    %33 = vector.broadcast %20 : vector<16x1xf32> to vector<16x128xf32>
    %34 = arith.subf %16, %33 : vector<16x128xf32>
    %35 = vector.broadcast %32 : vector<16x1xf32> to vector<16x128xf32>
    %36 = arith.mulf %34, %35 : vector<16x128xf32>
    %c128 = arith.constant 128 : index
    %c0_15 = arith.constant 0 : index
    %37 = vector.load %arg5[%c128, %c0_15] : memref<168x128xf32, #tpu.memory_space<vmem>>, vector<1x128xf32>
    %38 = vector.broadcast %37 : vector<1x128xf32> to vector<16x128xf32>
    %39 = arith.mulf %36, %38 : vector<16x128xf32>
    %c129 = arith.constant 129 : index
    %c0_16 = arith.constant 0 : index
    %40 = vector.load %arg5[%c129, %c0_16] : memref<168x128xf32, #tpu.memory_space<vmem>>, vector<1x128xf32>
    %41 = vector.broadcast %40 : vector<1x128xf32> to vector<16x128xf32>
    %42 = arith.addf %39, %41 : vector<16x128xf32>
    %c0_17 = arith.constant 0 : index
    %c0_18 = arith.constant 0 : index
    %43 = vector.load %arg3[%c0_17, %c0_18] : memref<16x16xf32, #tpu.memory_space<vmem>>, vector<16x16xf32>
    %44 = arith.truncf %42 : vector<16x128xf32> to vector<16x128xbf16>
    %c0_19 = arith.constant 0 : index
    %c0_20 = arith.constant 0 : index
    %45 = vector.load %arg4[%c0_19, %c0_20] : memref<3456x128xbf16, #tpu.memory_space<vmem>>, vector<128x128xbf16>
    %cst_21 = arith.constant dense<0.000000e+00> : vector<16x128xf32>
    %46 = tpu.matmul %44, %45, %cst_21 {dimension_numbers = #tpu.dot_dimension_numbers<[1], [0], [0], [1], [0, 0, 1, 1], [], []>} : vector<16x128xbf16>, vector<128x128xbf16>, vector<16x128xf32> -> vector<16x128xf32>
    %c130 = arith.constant 130 : index
    %c0_22 = arith.constant 0 : index
    %47 = vector.load %arg5[%c130, %c0_22] : memref<168x128xf32, #tpu.memory_space<vmem>>, vector<1x128xf32>
    %48 = vector.broadcast %47 : vector<1x128xf32> to vector<16x128xf32>
    %49 = arith.addf %46, %48 : vector<16x128xf32>
    %50 = arith.truncf %49 : vector<16x128xf32> to vector<16x128xbf16>
    %c256 = arith.constant 256 : index
    %c0_23 = arith.constant 0 : index
    %51 = vector.load %arg4[%c256, %c0_23] : memref<3456x128xbf16, #tpu.memory_space<vmem>>, vector<128x128xbf16>
    %cst_24 = arith.constant dense<0.000000e+00> : vector<16x128xf32>
    %52 = tpu.matmul %44, %51, %cst_24 {dimension_numbers = #tpu.dot_dimension_numbers<[1], [0], [0], [1], [0, 0, 1, 1], [], []>} : vector<16x128xbf16>, vector<128x128xbf16>, vector<16x128xf32> -> vector<16x128xf32>
    %c132 = arith.constant 132 : index
    %c0_25 = arith.constant 0 : index
    %53 = vector.load %arg5[%c132, %c0_25] : memref<168x128xf32, #tpu.memory_space<vmem>>, vector<1x128xf32>
    %54 = vector.broadcast %53 : vector<1x128xf32> to vector<16x128xf32>
    %55 = arith.addf %52, %54 : vector<16x128xf32>
    %56 = arith.truncf %55 : vector<16x128xf32> to vector<16x128xbf16>
    %c512 = arith.constant 512 : index
    %c0_26 = arith.constant 0 : index
    %57 = vector.load %arg4[%c512, %c0_26] : memref<3456x128xbf16, #tpu.memory_space<vmem>>, vector<128x128xbf16>
    %cst_27 = arith.constant dense<0.000000e+00> : vector<16x128xf32>
    %58 = tpu.matmul %44, %57, %cst_27 {dimension_numbers = #tpu.dot_dimension_numbers<[1], [0], [0], [1], [0, 0, 1, 1], [], []>} : vector<16x128xbf16>, vector<128x128xbf16>, vector<16x128xf32> -> vector<16x128xf32>
    %c134 = arith.constant 134 : index
    %c0_28 = arith.constant 0 : index
    %59 = vector.load %arg5[%c134, %c0_28] : memref<168x128xf32, #tpu.memory_space<vmem>>, vector<1x128xf32>
    %60 = vector.broadcast %59 : vector<1x128xf32> to vector<16x128xf32>
    %61 = arith.addf %58, %60 : vector<16x128xf32>
    %62 = arith.truncf %61 : vector<16x128xf32> to vector<16x128xbf16>
    %cst_29 = arith.constant dense<0.000000e+00> : vector<16x16xf32>
    %63 = tpu.matmul %50, %56, %cst_29 {dimension_numbers = #tpu.dot_dimension_numbers<[1], [1], [0], [0], [0, 0, 1, 0], [], []>} : vector<16x128xbf16>, vector<16x128xbf16>, vector<16x16xf32> -> vector<16x16xf32>
    %64 = arith.addf %63, %43 : vector<16x16xf32>
    %cst_30 = arith.constant dense<0xFF800000> : vector<16xf32>
    %65 = vector.multi_reduction <maximumf>, %64, %cst_30 [1] : vector<16x16xf32> to vector<16xf32>
    %66 = vector.shape_cast %65 : vector<16xf32> to vector<16x1xf32>
    %67 = vector.broadcast %66 : vector<16x1xf32> to vector<16x16xf32>
    %68 = arith.subf %64, %67 : vector<16x16xf32>
    %69 = math.exp %68 : vector<16x16xf32>
    %cst_31 = arith.constant dense<0.000000e+00> : vector<16xf32>
    %70 = vector.multi_reduction <add>, %69, %cst_31 [1] : vector<16x16xf32> to vector<16xf32>
    %71 = vector.shape_cast %70 : vector<16xf32> to vector<16x1xf32>
    %72 = tpu.reciprocal %71 {approx = true} : vector<16x1xf32> -> vector<16x1xf32>
    %73 = vector.broadcast %72 : vector<16x1xf32> to vector<16x16xf32>
    %74 = arith.mulf %69, %73 : vector<16x16xf32>
    %75 = arith.truncf %74 : vector<16x16xf32> to vector<16x16xbf16>
    %cst_32 = arith.constant dense<0.000000e+00> : vector<16x128xf32>
    %76 = tpu.matmul %75, %62, %cst_32 {dimension_numbers = #tpu.dot_dimension_numbers<[1], [0], [0], [1], [0, 0, 1, 1], [], []>} : vector<16x16xbf16>, vector<16x128xbf16>, vector<16x128xf32> -> vector<16x128xf32>
    %77 = arith.truncf %76 : vector<16x128xf32> to vector<16x128xbf16>
    %c768 = arith.constant 768 : index
    %c0_33 = arith.constant 0 : index
    %78 = vector.load %arg4[%c768, %c0_33] : memref<3456x128xbf16, #tpu.memory_space<vmem>>, vector<128x128xbf16>
    %cst_34 = arith.constant dense<0.000000e+00> : vector<16x128xf32>
    %79 = tpu.matmul %77, %78, %cst_34 {dimension_numbers = #tpu.dot_dimension_numbers<[1], [0], [0], [1], [0, 0, 1, 1], [], []>} : vector<16x128xbf16>, vector<128x128xbf16>, vector<16x128xf32> -> vector<16x128xf32>
    %c128_35 = arith.constant 128 : index
    %c0_36 = arith.constant 0 : index
    %80 = vector.load %arg4[%c128_35, %c0_36] : memref<3456x128xbf16, #tpu.memory_space<vmem>>, vector<128x128xbf16>
    %cst_37 = arith.constant dense<0.000000e+00> : vector<16x128xf32>
    %81 = tpu.matmul %44, %80, %cst_37 {dimension_numbers = #tpu.dot_dimension_numbers<[1], [0], [0], [1], [0, 0, 1, 1], [], []>} : vector<16x128xbf16>, vector<128x128xbf16>, vector<16x128xf32> -> vector<16x128xf32>
    %c131 = arith.constant 131 : index
    %c0_38 = arith.constant 0 : index
    %82 = vector.load %arg5[%c131, %c0_38] : memref<168x128xf32, #tpu.memory_space<vmem>>, vector<1x128xf32>
    %83 = vector.broadcast %82 : vector<1x128xf32> to vector<16x128xf32>
    %84 = arith.addf %81, %83 : vector<16x128xf32>
    %85 = arith.truncf %84 : vector<16x128xf32> to vector<16x128xbf16>
    %c384 = arith.constant 384 : index
    %c0_39 = arith.constant 0 : index
    %86 = vector.load %arg4[%c384, %c0_39] : memref<3456x128xbf16, #tpu.memory_space<vmem>>, vector<128x128xbf16>
    %cst_40 = arith.constant dense<0.000000e+00> : vector<16x128xf32>
    %87 = tpu.matmul %44, %86, %cst_40 {dimension_numbers = #tpu.dot_dimension_numbers<[1], [0], [0], [1], [0, 0, 1, 1], [], []>} : vector<16x128xbf16>, vector<128x128xbf16>, vector<16x128xf32> -> vector<16x128xf32>
    %c133 = arith.constant 133 : index
    %c0_41 = arith.constant 0 : index
    %88 = vector.load %arg5[%c133, %c0_41] : memref<168x128xf32, #tpu.memory_space<vmem>>, vector<1x128xf32>
    %89 = vector.broadcast %88 : vector<1x128xf32> to vector<16x128xf32>
    %90 = arith.addf %87, %89 : vector<16x128xf32>
    %91 = arith.truncf %90 : vector<16x128xf32> to vector<16x128xbf16>
    %c640 = arith.constant 640 : index
    %c0_42 = arith.constant 0 : index
    %92 = vector.load %arg4[%c640, %c0_42] : memref<3456x128xbf16, #tpu.memory_space<vmem>>, vector<128x128xbf16>
    %cst_43 = arith.constant dense<0.000000e+00> : vector<16x128xf32>
    %93 = tpu.matmul %44, %92, %cst_43 {dimension_numbers = #tpu.dot_dimension_numbers<[1], [0], [0], [1], [0, 0, 1, 1], [], []>} : vector<16x128xbf16>, vector<128x128xbf16>, vector<16x128xf32> -> vector<16x128xf32>
    %c135 = arith.constant 135 : index
    %c0_44 = arith.constant 0 : index
    %94 = vector.load %arg5[%c135, %c0_44] : memref<168x128xf32, #tpu.memory_space<vmem>>, vector<1x128xf32>
    %95 = vector.broadcast %94 : vector<1x128xf32> to vector<16x128xf32>
    %96 = arith.addf %93, %95 : vector<16x128xf32>
    %97 = arith.truncf %96 : vector<16x128xf32> to vector<16x128xbf16>
    %cst_45 = arith.constant dense<0.000000e+00> : vector<16x16xf32>
    %98 = tpu.matmul %85, %91, %cst_45 {dimension_numbers = #tpu.dot_dimension_numbers<[1], [1], [0], [0], [0, 0, 1, 0], [], []>} : vector<16x128xbf16>, vector<16x128xbf16>, vector<16x16xf32> -> vector<16x16xf32>
    %99 = arith.addf %98, %43 : vector<16x16xf32>
    %cst_46 = arith.constant dense<0xFF800000> : vector<16xf32>
    %100 = vector.multi_reduction <maximumf>, %99, %cst_46 [1] : vector<16x16xf32> to vector<16xf32>
    %101 = vector.shape_cast %100 : vector<16xf32> to vector<16x1xf32>
    %102 = vector.broadcast %101 : vector<16x1xf32> to vector<16x16xf32>
    %103 = arith.subf %99, %102 : vector<16x16xf32>
    %104 = math.exp %103 : vector<16x16xf32>
    %cst_47 = arith.constant dense<0.000000e+00> : vector<16xf32>
    %105 = vector.multi_reduction <add>, %104, %cst_47 [1] : vector<16x16xf32> to vector<16xf32>
    %106 = vector.shape_cast %105 : vector<16xf32> to vector<16x1xf32>
    %107 = tpu.reciprocal %106 {approx = true} : vector<16x1xf32> -> vector<16x1xf32>
    %108 = vector.broadcast %107 : vector<16x1xf32> to vector<16x16xf32>
    %109 = arith.mulf %104, %108 : vector<16x16xf32>
    %110 = arith.truncf %109 : vector<16x16xf32> to vector<16x16xbf16>
    %cst_48 = arith.constant dense<0.000000e+00> : vector<16x128xf32>
    %111 = tpu.matmul %110, %97, %cst_48 {dimension_numbers = #tpu.dot_dimension_numbers<[1], [0], [0], [1], [0, 0, 1, 1], [], []>} : vector<16x16xbf16>, vector<16x128xbf16>, vector<16x128xf32> -> vector<16x128xf32>
    %112 = arith.truncf %111 : vector<16x128xf32> to vector<16x128xbf16>
    %c896 = arith.constant 896 : index
    %c0_49 = arith.constant 0 : index
    %113 = vector.load %arg4[%c896, %c0_49] : memref<3456x128xbf16, #tpu.memory_space<vmem>>, vector<128x128xbf16>
    %cst_50 = arith.constant dense<0.000000e+00> : vector<16x128xf32>
    %114 = tpu.matmul %112, %113, %cst_50 {dimension_numbers = #tpu.dot_dimension_numbers<[1], [0], [0], [1], [0, 0, 1, 1], [], []>} : vector<16x128xbf16>, vector<128x128xbf16>, vector<16x128xf32> -> vector<16x128xf32>
    %115 = arith.addf %79, %114 : vector<16x128xf32>
    %c136 = arith.constant 136 : index
    %c0_51 = arith.constant 0 : index
    %116 = vector.load %arg5[%c136, %c0_51] : memref<168x128xf32, #tpu.memory_space<vmem>>, vector<1x128xf32>
    %117 = vector.broadcast %116 : vector<1x128xf32> to vector<16x128xf32>
    %118 = arith.addf %115, %117 : vector<16x128xf32>
    %119 = arith.addf %118, %42 : vector<16x128xf32>
    %cst_52 = arith.constant dense<0.000000e+00> : vector<16xf32>
    %120 = vector.multi_reduction <add>, %119, %cst_52 [1] : vector<16x128xf32> to vector<16xf32>
    %121 = vector.shape_cast %120 : vector<16xf32> to vector<16x1xf32>
    %cst_53 = arith.constant 3.125000e-02 : f32
    %122 = vector.broadcast %cst_53 : f32 to vector<16x1xf32>
    %123 = arith.mulf %121, %122 : vector<16x1xf32>
    %124 = arith.mulf %119, %119 : vector<16x128xf32>
    %cst_54 = arith.constant dense<0.000000e+00> : vector<16xf32>
    %125 = vector.multi_reduction <add>, %124, %cst_54 [1] : vector<16x128xf32> to vector<16xf32>
    %126 = vector.shape_cast %125 : vector<16xf32> to vector<16x1xf32>
    %cst_55 = arith.constant 3.125000e-02 : f32
    %127 = vector.broadcast %cst_55 : f32 to vector<16x1xf32>
    %128 = arith.mulf %126, %127 : vector<16x1xf32>
    %129 = arith.mulf %123, %123 : vector<16x1xf32>
    %130 = arith.subf %128, %129 : vector<16x1xf32>
    %cst_56 = arith.constant 0.000000e+00 : f32
    %131 = vector.broadcast %cst_56 : f32 to vector<16x1xf32>
    %132 = arith.maximumf %130, %131 : vector<16x1xf32>
    %cst_57 = arith.constant 9.99999996E-13 : f32
    %133 = vector.broadcast %cst_57 : f32 to vector<16x1xf32>
    %134 = arith.addf %132, %133 : vector<16x1xf32>
    %135 = math.rsqrt %134 : vector<16x1xf32>
    %136 = vector.broadcast %123 : vector<16x1xf32> to vector<16x128xf32>
    %137 = arith.subf %119, %136 : vector<16x128xf32>
    %138 = vector.broadcast %135 : vector<16x1xf32> to vector<16x128xf32>
    %139 = arith.mulf %137, %138 : vector<16x128xf32>
    %c137 = arith.constant 137 : index
    %c0_58 = arith.constant 0 : index
    %140 = vector.load %arg5[%c137, %c0_58] : memref<168x128xf32, #tpu.memory_space<vmem>>, vector<1x128xf32>
    %141 = vector.broadcast %140 : vector<1x128xf32> to vector<16x128xf32>
    %142 = arith.mulf %139, %141 : vector<16x128xf32>
    %c138 = arith.constant 138 : index
    %c0_59 = arith.constant 0 : index
    %143 = vector.load %arg5[%c138, %c0_59] : memref<168x128xf32, #tpu.memory_space<vmem>>, vector<1x128xf32>
    %144 = vector.broadcast %143 : vector<1x128xf32> to vector<16x128xf32>
    %145 = arith.addf %142, %144 : vector<16x128xf32>
    %146 = arith.truncf %145 : vector<16x128xf32> to vector<16x128xbf16>
    %c1024 = arith.constant 1024 : index
    %c0_60 = arith.constant 0 : index
    %147 = vector.load %arg4[%c1024, %c0_60] : memref<3456x128xbf16, #tpu.memory_space<vmem>>, vector<128x128xbf16>
    %cst_61 = arith.constant dense<0.000000e+00> : vector<16x128xf32>
    %148 = tpu.matmul %146, %147, %cst_61 {dimension_numbers = #tpu.dot_dimension_numbers<[1], [0], [0], [1], [0, 0, 1, 1], [], []>} : vector<16x128xbf16>, vector<128x128xbf16>, vector<16x128xf32> -> vector<16x128xf32>
    %c139 = arith.constant 139 : index
    %c0_62 = arith.constant 0 : index
    %149 = vector.load %arg5[%c139, %c0_62] : memref<168x128xf32, #tpu.memory_space<vmem>>, vector<1x128xf32>
    %150 = vector.broadcast %149 : vector<1x128xf32> to vector<16x128xf32>
    %151 = arith.addf %148, %150 : vector<16x128xf32>
    %cst_63 = arith.constant 5.000000e-01 : f32
    %152 = vector.broadcast %cst_63 : f32 to vector<16x128xf32>
    %153 = arith.mulf %152, %151 : vector<16x128xf32>
    %cst_64 = arith.constant 4.471500e-02 : f32
    %154 = vector.broadcast %cst_64 : f32 to vector<16x128xf32>
    %155 = arith.mulf %154, %151 : vector<16x128xf32>
    %156 = arith.mulf %155, %151 : vector<16x128xf32>
    %157 = arith.mulf %156, %151 : vector<16x128xf32>
    %158 = arith.addf %151, %157 : vector<16x128xf32>
    %cst_65 = arith.constant 0.797884583 : f32
    %159 = vector.broadcast %cst_65 : f32 to vector<16x128xf32>
    %160 = arith.mulf %159, %158 : vector<16x128xf32>
    %161 = math.tanh %160 : vector<16x128xf32>
    %cst_66 = arith.constant 1.000000e+00 : f32
    %162 = vector.broadcast %cst_66 : f32 to vector<16x128xf32>
    %163 = arith.addf %162, %161 : vector<16x128xf32>
    %164 = arith.mulf %153, %163 : vector<16x128xf32>
    %165 = arith.truncf %164 : vector<16x128xf32> to vector<16x128xbf16>
    %c1152 = arith.constant 1152 : index
    %c0_67 = arith.constant 0 : index
    %166 = vector.load %arg4[%c1152, %c0_67] : memref<3456x128xbf16, #tpu.memory_space<vmem>>, vector<128x128xbf16>
    %cst_68 = arith.constant dense<0.000000e+00> : vector<16x128xf32>
    %167 = tpu.matmul %165, %166, %cst_68 {dimension_numbers = #tpu.dot_dimension_numbers<[1], [0], [0], [1], [0, 0, 1, 1], [], []>} : vector<16x128xbf16>, vector<128x128xbf16>, vector<16x128xf32> -> vector<16x128xf32>
    %c140 = arith.constant 140 : index
    %c0_69 = arith.constant 0 : index
    %168 = vector.load %arg5[%c140, %c0_69] : memref<168x128xf32, #tpu.memory_space<vmem>>, vector<1x128xf32>
    %169 = vector.broadcast %168 : vector<1x128xf32> to vector<16x128xf32>
    %170 = arith.addf %167, %169 : vector<16x128xf32>
    %171 = arith.addf %170, %145 : vector<16x128xf32>
    %cst_70 = arith.constant dense<0.000000e+00> : vector<16xf32>
    %172 = vector.multi_reduction <add>, %171, %cst_70 [1] : vector<16x128xf32> to vector<16xf32>
    %173 = vector.shape_cast %172 : vector<16xf32> to vector<16x1xf32>
    %cst_71 = arith.constant 3.125000e-02 : f32
    %174 = vector.broadcast %cst_71 : f32 to vector<16x1xf32>
    %175 = arith.mulf %173, %174 : vector<16x1xf32>
    %176 = arith.mulf %171, %171 : vector<16x128xf32>
    %cst_72 = arith.constant dense<0.000000e+00> : vector<16xf32>
    %177 = vector.multi_reduction <add>, %176, %cst_72 [1] : vector<16x128xf32> to vector<16xf32>
    %178 = vector.shape_cast %177 : vector<16xf32> to vector<16x1xf32>
    %cst_73 = arith.constant 3.125000e-02 : f32
    %179 = vector.broadcast %cst_73 : f32 to vector<16x1xf32>
    %180 = arith.mulf %178, %179 : vector<16x1xf32>
    %181 = arith.mulf %175, %175 : vector<16x1xf32>
    %182 = arith.subf %180, %181 : vector<16x1xf32>
    %cst_74 = arith.constant 0.000000e+00 : f32
    %183 = vector.broadcast %cst_74 : f32 to vector<16x1xf32>
    %184 = arith.maximumf %182, %183 : vector<16x1xf32>
    %cst_75 = arith.constant 9.99999996E-13 : f32
    %185 = vector.broadcast %cst_75 : f32 to vector<16x1xf32>
    %186 = arith.addf %184, %185 : vector<16x1xf32>
    %187 = math.rsqrt %186 : vector<16x1xf32>
    %188 = vector.broadcast %175 : vector<16x1xf32> to vector<16x128xf32>
    %189 = arith.subf %171, %188 : vector<16x128xf32>
    %190 = vector.broadcast %187 : vector<16x1xf32> to vector<16x128xf32>
    %191 = arith.mulf %189, %190 : vector<16x128xf32>
    %c141 = arith.constant 141 : index
    %c0_76 = arith.constant 0 : index
    %192 = vector.load %arg5[%c141, %c0_76] : memref<168x128xf32, #tpu.memory_space<vmem>>, vector<1x128xf32>
    %193 = vector.broadcast %192 : vector<1x128xf32> to vector<16x128xf32>
    %194 = arith.mulf %191, %193 : vector<16x128xf32>
    %c142 = arith.constant 142 : index
    %c0_77 = arith.constant 0 : index
    %195 = vector.load %arg5[%c142, %c0_77] : memref<168x128xf32, #tpu.memory_space<vmem>>, vector<1x128xf32>
    %196 = vector.broadcast %195 : vector<1x128xf32> to vector<16x128xf32>
    %197 = arith.addf %194, %196 : vector<16x128xf32>
    %198 = arith.truncf %197 : vector<16x128xf32> to vector<16x128xbf16>
    %c1280 = arith.constant 1280 : index
    %c0_78 = arith.constant 0 : index
    %199 = vector.load %arg4[%c1280, %c0_78] : memref<3456x128xbf16, #tpu.memory_space<vmem>>, vector<128x128xbf16>
    %cst_79 = arith.constant dense<0.000000e+00> : vector<16x128xf32>
    %200 = tpu.matmul %198, %199, %cst_79 {dimension_numbers = #tpu.dot_dimension_numbers<[1], [0], [0], [1], [0, 0, 1, 1], [], []>} : vector<16x128xbf16>, vector<128x128xbf16>, vector<16x128xf32> -> vector<16x128xf32>
    %c143 = arith.constant 143 : index
    %c0_80 = arith.constant 0 : index
    %201 = vector.load %arg5[%c143, %c0_80] : memref<168x128xf32, #tpu.memory_space<vmem>>, vector<1x128xf32>
    %202 = vector.broadcast %201 : vector<1x128xf32> to vector<16x128xf32>
    %203 = arith.addf %200, %202 : vector<16x128xf32>
    %204 = arith.truncf %203 : vector<16x128xf32> to vector<16x128xbf16>
    %c1536 = arith.constant 1536 : index
    %c0_81 = arith.constant 0 : index
    %205 = vector.load %arg4[%c1536, %c0_81] : memref<3456x128xbf16, #tpu.memory_space<vmem>>, vector<128x128xbf16>
    %cst_82 = arith.constant dense<0.000000e+00> : vector<16x128xf32>
    %206 = tpu.matmul %198, %205, %cst_82 {dimension_numbers = #tpu.dot_dimension_numbers<[1], [0], [0], [1], [0, 0, 1, 1], [], []>} : vector<16x128xbf16>, vector<128x128xbf16>, vector<16x128xf32> -> vector<16x128xf32>
    %c145 = arith.constant 145 : index
    %c0_83 = arith.constant 0 : index
    %207 = vector.load %arg5[%c145, %c0_83] : memref<168x128xf32, #tpu.memory_space<vmem>>, vector<1x128xf32>
    %208 = vector.broadcast %207 : vector<1x128xf32> to vector<16x128xf32>
    %209 = arith.addf %206, %208 : vector<16x128xf32>
    %210 = arith.truncf %209 : vector<16x128xf32> to vector<16x128xbf16>
    %c1792 = arith.constant 1792 : index
    %c0_84 = arith.constant 0 : index
    %211 = vector.load %arg4[%c1792, %c0_84] : memref<3456x128xbf16, #tpu.memory_space<vmem>>, vector<128x128xbf16>
    %cst_85 = arith.constant dense<0.000000e+00> : vector<16x128xf32>
    %212 = tpu.matmul %198, %211, %cst_85 {dimension_numbers = #tpu.dot_dimension_numbers<[1], [0], [0], [1], [0, 0, 1, 1], [], []>} : vector<16x128xbf16>, vector<128x128xbf16>, vector<16x128xf32> -> vector<16x128xf32>
    %c147 = arith.constant 147 : index
    %c0_86 = arith.constant 0 : index
    %213 = vector.load %arg5[%c147, %c0_86] : memref<168x128xf32, #tpu.memory_space<vmem>>, vector<1x128xf32>
    %214 = vector.broadcast %213 : vector<1x128xf32> to vector<16x128xf32>
    %215 = arith.addf %212, %214 : vector<16x128xf32>
    %216 = arith.truncf %215 : vector<16x128xf32> to vector<16x128xbf16>
    %cst_87 = arith.constant dense<0.000000e+00> : vector<16x16xf32>
    %217 = tpu.matmul %204, %210, %cst_87 {dimension_numbers = #tpu.dot_dimension_numbers<[1], [1], [0], [0], [0, 0, 1, 0], [], []>} : vector<16x128xbf16>, vector<16x128xbf16>, vector<16x16xf32> -> vector<16x16xf32>
    %218 = arith.addf %217, %43 : vector<16x16xf32>
    %cst_88 = arith.constant dense<0xFF800000> : vector<16xf32>
    %219 = vector.multi_reduction <maximumf>, %218, %cst_88 [1] : vector<16x16xf32> to vector<16xf32>
    %220 = vector.shape_cast %219 : vector<16xf32> to vector<16x1xf32>
    %221 = vector.broadcast %220 : vector<16x1xf32> to vector<16x16xf32>
    %222 = arith.subf %218, %221 : vector<16x16xf32>
    %223 = math.exp %222 : vector<16x16xf32>
    %cst_89 = arith.constant dense<0.000000e+00> : vector<16xf32>
    %224 = vector.multi_reduction <add>, %223, %cst_89 [1] : vector<16x16xf32> to vector<16xf32>
    %225 = vector.shape_cast %224 : vector<16xf32> to vector<16x1xf32>
    %226 = tpu.reciprocal %225 {approx = true} : vector<16x1xf32> -> vector<16x1xf32>
    %227 = vector.broadcast %226 : vector<16x1xf32> to vector<16x16xf32>
    %228 = arith.mulf %223, %227 : vector<16x16xf32>
    %229 = arith.truncf %228 : vector<16x16xf32> to vector<16x16xbf16>
    %cst_90 = arith.constant dense<0.000000e+00> : vector<16x128xf32>
    %230 = tpu.matmul %229, %216, %cst_90 {dimension_numbers = #tpu.dot_dimension_numbers<[1], [0], [0], [1], [0, 0, 1, 1], [], []>} : vector<16x16xbf16>, vector<16x128xbf16>, vector<16x128xf32> -> vector<16x128xf32>
    %231 = arith.truncf %230 : vector<16x128xf32> to vector<16x128xbf16>
    %c2048 = arith.constant 2048 : index
    %c0_91 = arith.constant 0 : index
    %232 = vector.load %arg4[%c2048, %c0_91] : memref<3456x128xbf16, #tpu.memory_space<vmem>>, vector<128x128xbf16>
    %cst_92 = arith.constant dense<0.000000e+00> : vector<16x128xf32>
    %233 = tpu.matmul %231, %232, %cst_92 {dimension_numbers = #tpu.dot_dimension_numbers<[1], [0], [0], [1], [0, 0, 1, 1], [], []>} : vector<16x128xbf16>, vector<128x128xbf16>, vector<16x128xf32> -> vector<16x128xf32>
    %c1408 = arith.constant 1408 : index
    %c0_93 = arith.constant 0 : index
    %234 = vector.load %arg4[%c1408, %c0_93] : memref<3456x128xbf16, #tpu.memory_space<vmem>>, vector<128x128xbf16>
    %cst_94 = arith.constant dense<0.000000e+00> : vector<16x128xf32>
    %235 = tpu.matmul %198, %234, %cst_94 {dimension_numbers = #tpu.dot_dimension_numbers<[1], [0], [0], [1], [0, 0, 1, 1], [], []>} : vector<16x128xbf16>, vector<128x128xbf16>, vector<16x128xf32> -> vector<16x128xf32>
    %c144 = arith.constant 144 : index
    %c0_95 = arith.constant 0 : index
    %236 = vector.load %arg5[%c144, %c0_95] : memref<168x128xf32, #tpu.memory_space<vmem>>, vector<1x128xf32>
    %237 = vector.broadcast %236 : vector<1x128xf32> to vector<16x128xf32>
    %238 = arith.addf %235, %237 : vector<16x128xf32>
    %239 = arith.truncf %238 : vector<16x128xf32> to vector<16x128xbf16>
    %c1664 = arith.constant 1664 : index
    %c0_96 = arith.constant 0 : index
    %240 = vector.load %arg4[%c1664, %c0_96] : memref<3456x128xbf16, #tpu.memory_space<vmem>>, vector<128x128xbf16>
    %cst_97 = arith.constant dense<0.000000e+00> : vector<16x128xf32>
    %241 = tpu.matmul %198, %240, %cst_97 {dimension_numbers = #tpu.dot_dimension_numbers<[1], [0], [0], [1], [0, 0, 1, 1], [], []>} : vector<16x128xbf16>, vector<128x128xbf16>, vector<16x128xf32> -> vector<16x128xf32>
    %c146 = arith.constant 146 : index
    %c0_98 = arith.constant 0 : index
    %242 = vector.load %arg5[%c146, %c0_98] : memref<168x128xf32, #tpu.memory_space<vmem>>, vector<1x128xf32>
    %243 = vector.broadcast %242 : vector<1x128xf32> to vector<16x128xf32>
    %244 = arith.addf %241, %243 : vector<16x128xf32>
    %245 = arith.truncf %244 : vector<16x128xf32> to vector<16x128xbf16>
    %c1920 = arith.constant 1920 : index
    %c0_99 = arith.constant 0 : index
    %246 = vector.load %arg4[%c1920, %c0_99] : memref<3456x128xbf16, #tpu.memory_space<vmem>>, vector<128x128xbf16>
    %cst_100 = arith.constant dense<0.000000e+00> : vector<16x128xf32>
    %247 = tpu.matmul %198, %246, %cst_100 {dimension_numbers = #tpu.dot_dimension_numbers<[1], [0], [0], [1], [0, 0, 1, 1], [], []>} : vector<16x128xbf16>, vector<128x128xbf16>, vector<16x128xf32> -> vector<16x128xf32>
    %c148 = arith.constant 148 : index
    %c0_101 = arith.constant 0 : index
    %248 = vector.load %arg5[%c148, %c0_101] : memref<168x128xf32, #tpu.memory_space<vmem>>, vector<1x128xf32>
    %249 = vector.broadcast %248 : vector<1x128xf32> to vector<16x128xf32>
    %250 = arith.addf %247, %249 : vector<16x128xf32>
    %251 = arith.truncf %250 : vector<16x128xf32> to vector<16x128xbf16>
    %cst_102 = arith.constant dense<0.000000e+00> : vector<16x16xf32>
    %252 = tpu.matmul %239, %245, %cst_102 {dimension_numbers = #tpu.dot_dimension_numbers<[1], [1], [0], [0], [0, 0, 1, 0], [], []>} : vector<16x128xbf16>, vector<16x128xbf16>, vector<16x16xf32> -> vector<16x16xf32>
    %253 = arith.addf %252, %43 : vector<16x16xf32>
    %cst_103 = arith.constant dense<0xFF800000> : vector<16xf32>
    %254 = vector.multi_reduction <maximumf>, %253, %cst_103 [1] : vector<16x16xf32> to vector<16xf32>
    %255 = vector.shape_cast %254 : vector<16xf32> to vector<16x1xf32>
    %256 = vector.broadcast %255 : vector<16x1xf32> to vector<16x16xf32>
    %257 = arith.subf %253, %256 : vector<16x16xf32>
    %258 = math.exp %257 : vector<16x16xf32>
    %cst_104 = arith.constant dense<0.000000e+00> : vector<16xf32>
    %259 = vector.multi_reduction <add>, %258, %cst_104 [1] : vector<16x16xf32> to vector<16xf32>
    %260 = vector.shape_cast %259 : vector<16xf32> to vector<16x1xf32>
    %261 = tpu.reciprocal %260 {approx = true} : vector<16x1xf32> -> vector<16x1xf32>
    %262 = vector.broadcast %261 : vector<16x1xf32> to vector<16x16xf32>
    %263 = arith.mulf %258, %262 : vector<16x16xf32>
    %264 = arith.truncf %263 : vector<16x16xf32> to vector<16x16xbf16>
    %cst_105 = arith.constant dense<0.000000e+00> : vector<16x128xf32>
    %265 = tpu.matmul %264, %251, %cst_105 {dimension_numbers = #tpu.dot_dimension_numbers<[1], [0], [0], [1], [0, 0, 1, 1], [], []>} : vector<16x16xbf16>, vector<16x128xbf16>, vector<16x128xf32> -> vector<16x128xf32>
    %266 = arith.truncf %265 : vector<16x128xf32> to vector<16x128xbf16>
    %c2176 = arith.constant 2176 : index
    %c0_106 = arith.constant 0 : index
    %267 = vector.load %arg4[%c2176, %c0_106] : memref<3456x128xbf16, #tpu.memory_space<vmem>>, vector<128x128xbf16>
    %cst_107 = arith.constant dense<0.000000e+00> : vector<16x128xf32>
    %268 = tpu.matmul %266, %267, %cst_107 {dimension_numbers = #tpu.dot_dimension_numbers<[1], [0], [0], [1], [0, 0, 1, 1], [], []>} : vector<16x128xbf16>, vector<128x128xbf16>, vector<16x128xf32> -> vector<16x128xf32>
    %269 = arith.addf %233, %268 : vector<16x128xf32>
    %c149 = arith.constant 149 : index
    %c0_108 = arith.constant 0 : index
    %270 = vector.load %arg5[%c149, %c0_108] : memref<168x128xf32, #tpu.memory_space<vmem>>, vector<1x128xf32>
    %271 = vector.broadcast %270 : vector<1x128xf32> to vector<16x128xf32>
    %272 = arith.addf %269, %271 : vector<16x128xf32>
    %273 = arith.addf %272, %197 : vector<16x128xf32>
    %cst_109 = arith.constant dense<0.000000e+00> : vector<16xf32>
    %274 = vector.multi_reduction <add>, %273, %cst_109 [1] : vector<16x128xf32> to vector<16xf32>
    %275 = vector.shape_cast %274 : vector<16xf32> to vector<16x1xf32>
    %cst_110 = arith.constant 3.125000e-02 : f32
    %276 = vector.broadcast %cst_110 : f32 to vector<16x1xf32>
    %277 = arith.mulf %275, %276 : vector<16x1xf32>
    %278 = arith.mulf %273, %273 : vector<16x128xf32>
    %cst_111 = arith.constant dense<0.000000e+00> : vector<16xf32>
    %279 = vector.multi_reduction <add>, %278, %cst_111 [1] : vector<16x128xf32> to vector<16xf32>
    %280 = vector.shape_cast %279 : vector<16xf32> to vector<16x1xf32>
    %cst_112 = arith.constant 3.125000e-02 : f32
    %281 = vector.broadcast %cst_112 : f32 to vector<16x1xf32>
    %282 = arith.mulf %280, %281 : vector<16x1xf32>
    %283 = arith.mulf %277, %277 : vector<16x1xf32>
    %284 = arith.subf %282, %283 : vector<16x1xf32>
    %cst_113 = arith.constant 0.000000e+00 : f32
    %285 = vector.broadcast %cst_113 : f32 to vector<16x1xf32>
    %286 = arith.maximumf %284, %285 : vector<16x1xf32>
    %cst_114 = arith.constant 9.99999996E-13 : f32
    %287 = vector.broadcast %cst_114 : f32 to vector<16x1xf32>
    %288 = arith.addf %286, %287 : vector<16x1xf32>
    %289 = math.rsqrt %288 : vector<16x1xf32>
    %290 = vector.broadcast %277 : vector<16x1xf32> to vector<16x128xf32>
    %291 = arith.subf %273, %290 : vector<16x128xf32>
    %292 = vector.broadcast %289 : vector<16x1xf32> to vector<16x128xf32>
    %293 = arith.mulf %291, %292 : vector<16x128xf32>
    %c150 = arith.constant 150 : index
    %c0_115 = arith.constant 0 : index
    %294 = vector.load %arg5[%c150, %c0_115] : memref<168x128xf32, #tpu.memory_space<vmem>>, vector<1x128xf32>
    %295 = vector.broadcast %294 : vector<1x128xf32> to vector<16x128xf32>
    %296 = arith.mulf %293, %295 : vector<16x128xf32>
    %c151 = arith.constant 151 : index
    %c0_116 = arith.constant 0 : index
    %297 = vector.load %arg5[%c151, %c0_116] : memref<168x128xf32, #tpu.memory_space<vmem>>, vector<1x128xf32>
    %298 = vector.broadcast %297 : vector<1x128xf32> to vector<16x128xf32>
    %299 = arith.addf %296, %298 : vector<16x128xf32>
    %300 = arith.truncf %299 : vector<16x128xf32> to vector<16x128xbf16>
    %c2304 = arith.constant 2304 : index
    %c0_117 = arith.constant 0 : index
    %301 = vector.load %arg4[%c2304, %c0_117] : memref<3456x128xbf16, #tpu.memory_space<vmem>>, vector<128x128xbf16>
    %cst_118 = arith.constant dense<0.000000e+00> : vector<16x128xf32>
    %302 = tpu.matmul %300, %301, %cst_118 {dimension_numbers = #tpu.dot_dimension_numbers<[1], [0], [0], [1], [0, 0, 1, 1], [], []>} : vector<16x128xbf16>, vector<128x128xbf16>, vector<16x128xf32> -> vector<16x128xf32>
    %c152 = arith.constant 152 : index
    %c0_119 = arith.constant 0 : index
    %303 = vector.load %arg5[%c152, %c0_119] : memref<168x128xf32, #tpu.memory_space<vmem>>, vector<1x128xf32>
    %304 = vector.broadcast %303 : vector<1x128xf32> to vector<16x128xf32>
    %305 = arith.addf %302, %304 : vector<16x128xf32>
    %cst_120 = arith.constant 5.000000e-01 : f32
    %306 = vector.broadcast %cst_120 : f32 to vector<16x128xf32>
    %307 = arith.mulf %306, %305 : vector<16x128xf32>
    %cst_121 = arith.constant 4.471500e-02 : f32
    %308 = vector.broadcast %cst_121 : f32 to vector<16x128xf32>
    %309 = arith.mulf %308, %305 : vector<16x128xf32>
    %310 = arith.mulf %309, %305 : vector<16x128xf32>
    %311 = arith.mulf %310, %305 : vector<16x128xf32>
    %312 = arith.addf %305, %311 : vector<16x128xf32>
    %cst_122 = arith.constant 0.797884583 : f32
    %313 = vector.broadcast %cst_122 : f32 to vector<16x128xf32>
    %314 = arith.mulf %313, %312 : vector<16x128xf32>
    %315 = math.tanh %314 : vector<16x128xf32>
    %cst_123 = arith.constant 1.000000e+00 : f32
    %316 = vector.broadcast %cst_123 : f32 to vector<16x128xf32>
    %317 = arith.addf %316, %315 : vector<16x128xf32>
    %318 = arith.mulf %307, %317 : vector<16x128xf32>
    %319 = arith.truncf %318 : vector<16x128xf32> to vector<16x128xbf16>
    %c2432 = arith.constant 2432 : index
    %c0_124 = arith.constant 0 : index
    %320 = vector.load %arg4[%c2432, %c0_124] : memref<3456x128xbf16, #tpu.memory_space<vmem>>, vector<128x128xbf16>
    %cst_125 = arith.constant dense<0.000000e+00> : vector<16x128xf32>
    %321 = tpu.matmul %319, %320, %cst_125 {dimension_numbers = #tpu.dot_dimension_numbers<[1], [0], [0], [1], [0, 0, 1, 1], [], []>} : vector<16x128xbf16>, vector<128x128xbf16>, vector<16x128xf32> -> vector<16x128xf32>
    %c153 = arith.constant 153 : index
    %c0_126 = arith.constant 0 : index
    %322 = vector.load %arg5[%c153, %c0_126] : memref<168x128xf32, #tpu.memory_space<vmem>>, vector<1x128xf32>
    %323 = vector.broadcast %322 : vector<1x128xf32> to vector<16x128xf32>
    %324 = arith.addf %321, %323 : vector<16x128xf32>
    %325 = arith.addf %324, %299 : vector<16x128xf32>
    %cst_127 = arith.constant dense<0.000000e+00> : vector<16xf32>
    %326 = vector.multi_reduction <add>, %325, %cst_127 [1] : vector<16x128xf32> to vector<16xf32>
    %327 = vector.shape_cast %326 : vector<16xf32> to vector<16x1xf32>
    %cst_128 = arith.constant 3.125000e-02 : f32
    %328 = vector.broadcast %cst_128 : f32 to vector<16x1xf32>
    %329 = arith.mulf %327, %328 : vector<16x1xf32>
    %330 = arith.mulf %325, %325 : vector<16x128xf32>
    %cst_129 = arith.constant dense<0.000000e+00> : vector<16xf32>
    %331 = vector.multi_reduction <add>, %330, %cst_129 [1] : vector<16x128xf32> to vector<16xf32>
    %332 = vector.shape_cast %331 : vector<16xf32> to vector<16x1xf32>
    %cst_130 = arith.constant 3.125000e-02 : f32
    %333 = vector.broadcast %cst_130 : f32 to vector<16x1xf32>
    %334 = arith.mulf %332, %333 : vector<16x1xf32>
    %335 = arith.mulf %329, %329 : vector<16x1xf32>
    %336 = arith.subf %334, %335 : vector<16x1xf32>
    %cst_131 = arith.constant 0.000000e+00 : f32
    %337 = vector.broadcast %cst_131 : f32 to vector<16x1xf32>
    %338 = arith.maximumf %336, %337 : vector<16x1xf32>
    %cst_132 = arith.constant 9.99999996E-13 : f32
    %339 = vector.broadcast %cst_132 : f32 to vector<16x1xf32>
    %340 = arith.addf %338, %339 : vector<16x1xf32>
    %341 = math.rsqrt %340 : vector<16x1xf32>
    %342 = vector.broadcast %329 : vector<16x1xf32> to vector<16x128xf32>
    %343 = arith.subf %325, %342 : vector<16x128xf32>
    %344 = vector.broadcast %341 : vector<16x1xf32> to vector<16x128xf32>
    %345 = arith.mulf %343, %344 : vector<16x128xf32>
    %c154 = arith.constant 154 : index
    %c0_133 = arith.constant 0 : index
    %346 = vector.load %arg5[%c154, %c0_133] : memref<168x128xf32, #tpu.memory_space<vmem>>, vector<1x128xf32>
    %347 = vector.broadcast %346 : vector<1x128xf32> to vector<16x128xf32>
    %348 = arith.mulf %345, %347 : vector<16x128xf32>
    %c155 = arith.constant 155 : index
    %c0_134 = arith.constant 0 : index
    %349 = vector.load %arg5[%c155, %c0_134] : memref<168x128xf32, #tpu.memory_space<vmem>>, vector<1x128xf32>
    %350 = vector.broadcast %349 : vector<1x128xf32> to vector<16x128xf32>
    %351 = arith.addf %348, %350 : vector<16x128xf32>
    %352 = tpu.iota {dimensions = array<i32: 0>} : vector<8x16xi32>
    %353 = tpu.iota {dimensions = array<i32: 1>} : vector<8x16xi32>
    %c8_i32 = arith.constant 8 : i32
    %354 = vector.broadcast %c8_i32 : i32 to vector<8x16xi32>
    %355 = arith.muli %352, %354 : vector<8x16xi32>
    %356 = arith.cmpi eq, %353, %355 : vector<8x16xi32>
    %cst_135 = arith.constant 1.000000e+00 : f32
    %cst_136 = arith.constant 0.000000e+00 : f32
    %357 = vector.broadcast %cst_135 : f32 to vector<8x16xf32>
    %358 = vector.broadcast %cst_136 : f32 to vector<8x16xf32>
    %359 = arith.select %356, %357, %358 : vector<8x16xi1>, vector<8x16xf32>
    %cst_137 = arith.constant dense<0.000000e+00> : vector<8x128xf32>
    %360 = tpu.matmul %359, %351, %cst_137 {dimension_numbers = #tpu.dot_dimension_numbers<[1], [0], [0], [1], [0, 0, 1, 1], [], []>} : vector<8x16xf32>, vector<16x128xf32>, vector<8x128xf32> -> vector<8x128xf32>
    %361 = arith.truncf %360 : vector<8x128xf32> to vector<8x128xbf16>
    %c2560 = arith.constant 2560 : index
    %c0_138 = arith.constant 0 : index
    %362 = vector.load %arg4[%c2560, %c0_138] : memref<3456x128xbf16, #tpu.memory_space<vmem>>, vector<128x128xbf16>
    %cst_139 = arith.constant dense<0.000000e+00> : vector<8x128xf32>
    %363 = tpu.matmul %361, %362, %cst_139 {dimension_numbers = #tpu.dot_dimension_numbers<[1], [0], [0], [1], [0, 0, 1, 1], [], []>} : vector<8x128xbf16>, vector<128x128xbf16>, vector<8x128xf32> -> vector<8x128xf32>
    %c156 = arith.constant 156 : index
    %c0_140 = arith.constant 0 : index
    %364 = vector.load %arg5[%c156, %c0_140] : memref<168x128xf32, #tpu.memory_space<vmem>>, vector<1x128xf32>
    %365 = vector.broadcast %364 : vector<1x128xf32> to vector<8x128xf32>
    %366 = arith.addf %363, %365 : vector<8x128xf32>
    %367 = math.tanh %366 : vector<8x128xf32>
    %368 = arith.truncf %367 : vector<8x128xf32> to vector<8x128xbf16>
    %c2688 = arith.constant 2688 : index
    %c0_141 = arith.constant 0 : index
    %369 = vector.load %arg4[%c2688, %c0_141] : memref<3456x128xbf16, #tpu.memory_space<vmem>>, vector<128x128xbf16>
    %cst_142 = arith.constant dense<0.000000e+00> : vector<8x128xf32>
    %370 = tpu.matmul %368, %369, %cst_142 {dimension_numbers = #tpu.dot_dimension_numbers<[1], [0], [0], [1], [0, 0, 1, 1], [], []>} : vector<8x128xbf16>, vector<128x128xbf16>, vector<8x128xf32> -> vector<8x128xf32>
    %c157 = arith.constant 157 : index
    %c0_143 = arith.constant 0 : index
    %371 = vector.load %arg5[%c157, %c0_143] : memref<168x128xf32, #tpu.memory_space<vmem>>, vector<1x128xf32>
    %372 = vector.broadcast %371 : vector<1x128xf32> to vector<8x128xf32>
    %373 = arith.addf %370, %372 : vector<8x128xf32>
    %cst_144 = arith.constant 0.000000e+00 : f32
    %374 = vector.broadcast %cst_144 : f32 to vector<8x128xf32>
    %375 = arith.maximumf %373, %374 : vector<8x128xf32>
    %376 = arith.truncf %375 : vector<8x128xf32> to vector<8x128xbf16>
    %c2816 = arith.constant 2816 : index
    %c0_145 = arith.constant 0 : index
    %377 = vector.load %arg4[%c2816, %c0_145] : memref<3456x128xbf16, #tpu.memory_space<vmem>>, vector<128x128xbf16>
    %cst_146 = arith.constant dense<0.000000e+00> : vector<8x128xf32>
    %378 = tpu.matmul %376, %377, %cst_146 {dimension_numbers = #tpu.dot_dimension_numbers<[1], [0], [0], [1], [0, 0, 1, 1], [], []>} : vector<8x128xbf16>, vector<128x128xbf16>, vector<8x128xf32> -> vector<8x128xf32>
    %c158 = arith.constant 158 : index
    %c0_147 = arith.constant 0 : index
    %379 = vector.load %arg5[%c158, %c0_147] : memref<168x128xf32, #tpu.memory_space<vmem>>, vector<1x128xf32>
    %380 = vector.broadcast %379 : vector<1x128xf32> to vector<8x128xf32>
    %381 = arith.addf %378, %380 : vector<8x128xf32>
    %382 = arith.truncf %367 : vector<8x128xf32> to vector<8x128xbf16>
    %c2944 = arith.constant 2944 : index
    %c0_148 = arith.constant 0 : index
    %383 = vector.load %arg4[%c2944, %c0_148] : memref<3456x128xbf16, #tpu.memory_space<vmem>>, vector<128x128xbf16>
    %cst_149 = arith.constant dense<0.000000e+00> : vector<8x128xf32>
    %384 = tpu.matmul %382, %383, %cst_149 {dimension_numbers = #tpu.dot_dimension_numbers<[1], [0], [0], [1], [0, 0, 1, 1], [], []>} : vector<8x128xbf16>, vector<128x128xbf16>, vector<8x128xf32> -> vector<8x128xf32>
    %385 = arith.truncf %375 : vector<8x128xf32> to vector<8x128xbf16>
    %c3072 = arith.constant 3072 : index
    %c0_150 = arith.constant 0 : index
    %386 = vector.load %arg4[%c3072, %c0_150] : memref<3456x128xbf16, #tpu.memory_space<vmem>>, vector<128x128xbf16>
    %cst_151 = arith.constant dense<0.000000e+00> : vector<8x128xf32>
    %387 = tpu.matmul %385, %386, %cst_151 {dimension_numbers = #tpu.dot_dimension_numbers<[1], [0], [0], [1], [0, 0, 1, 1], [], []>} : vector<8x128xbf16>, vector<128x128xbf16>, vector<8x128xf32> -> vector<8x128xf32>
    %388 = arith.addf %384, %387 : vector<8x128xf32>
    %389 = arith.truncf %381 : vector<8x128xf32> to vector<8x128xbf16>
    %c3200 = arith.constant 3200 : index
    %c0_152 = arith.constant 0 : index
    %390 = vector.load %arg4[%c3200, %c0_152] : memref<3456x128xbf16, #tpu.memory_space<vmem>>, vector<128x128xbf16>
    %cst_153 = arith.constant dense<0.000000e+00> : vector<8x128xf32>
    %391 = tpu.matmul %389, %390, %cst_153 {dimension_numbers = #tpu.dot_dimension_numbers<[1], [0], [0], [1], [0, 0, 1, 1], [], []>} : vector<8x128xbf16>, vector<128x128xbf16>, vector<8x128xf32> -> vector<8x128xf32>
    %392 = arith.addf %388, %391 : vector<8x128xf32>
    %c159 = arith.constant 159 : index
    %c0_154 = arith.constant 0 : index
    %393 = vector.load %arg5[%c159, %c0_154] : memref<168x128xf32, #tpu.memory_space<vmem>>, vector<1x128xf32>
    %394 = vector.broadcast %393 : vector<1x128xf32> to vector<8x128xf32>
    %395 = arith.addf %392, %394 : vector<8x128xf32>
    %cst_155 = arith.constant 0.000000e+00 : f32
    %396 = vector.broadcast %cst_155 : f32 to vector<8x128xf32>
    %397 = arith.maximumf %395, %396 : vector<8x128xf32>
    %398 = arith.truncf %397 : vector<8x128xf32> to vector<8x128xbf16>
    %c3328 = arith.constant 3328 : index
    %c0_156 = arith.constant 0 : index
    %399 = vector.load %arg4[%c3328, %c0_156] : memref<3456x128xbf16, #tpu.memory_space<vmem>>, vector<128x128xbf16>
    %cst_157 = arith.constant dense<0.000000e+00> : vector<8x128xf32>
    %400 = tpu.matmul %398, %399, %cst_157 {dimension_numbers = #tpu.dot_dimension_numbers<[1], [0], [0], [1], [0, 0, 1, 1], [], []>} : vector<8x128xbf16>, vector<128x128xbf16>, vector<8x128xf32> -> vector<8x128xf32>
    %c160 = arith.constant 160 : index
    %c0_158 = arith.constant 0 : index
    %401 = vector.load %arg5[%c160, %c0_158] : memref<168x128xf32, #tpu.memory_space<vmem>>, vector<1x128xf32>
    %402 = vector.broadcast %401 : vector<1x128xf32> to vector<8x128xf32>
    %403 = arith.addf %400, %402 : vector<8x128xf32>
    %c0_159 = arith.constant 0 : index
    %c0_160 = arith.constant 0 : index
    %404 = vector.load %arg6[%c0_159, %c0_160] : memref<8x128xf32, #tpu.memory_space<vmem>>, vector<8x128xf32>
    tpu.vector_store %arg6[%c0_159, %c0_160], %403 {strides = array<i32>} : memref<8x128xf32, #tpu.memory_space<vmem>>, vector<8x128xf32>,
    %c0_161 = arith.constant 0 : index
    %c0_162 = arith.constant 0 : index
    %405 = vector.load %arg7[%c0_161, %c0_162] : memref<8x128xf32, #tpu.memory_space<vmem>>, vector<8x128xf32>
    tpu.vector_store %arg7[%c0_161, %c0_162], %381 {strides = array<i32>} : memref<8x128xf32, #tpu.memory_space<vmem>>, vector<8x128xf32>,
    return
  }
}

</mosaic_0001>

<bundles_post_ra>
// kernel: mul.8
= control target key start
LH: loop header
LB: loop body
LE: loop exit
PB: predicated region body
PF: predicated region fallthrough
CT: control target
= control target key end

     0   :  { %vm8_vm0 = vcmask 64512   ;;  %vm14_vm1 = vcmask 130112   ;;  %s42_s0 = inlined_call_operand.vmem [shape: f32[2,8], index: 0, kind: input, shape index: {}]   ;;  %s43_s1 = inlined_call_operand.vmem [shape: f32[16], index: 1, kind: output, shape index: {}]  }
   0x1   :  { %v5_v0 = vld [vmem:[%s42_s0] sm:$0x3]  ;;  %s25_s0 = smov 8  }
   0x2   :  { %6 = vst [vmem:[#allocation1] sm:$0x3] %v5_v0 }
   0x9   :  { %v11_v1 = vld [vmem:[#allocation1 + $0x1] sm:$0x1]   ;;  %v7_v2 = vld [vmem:[#allocation1] sm:$0x1]  }
   0xa   :  { %12 = vrot.lane.b32.xlu0 %v11_v1, %s25_s0  ;;  %9 = vst.msk [vmem:[#allocation0] sm:$0x1] %vm8_vm0, %v7_v2  }
  0x7c   :  { %v13_v3 = vpop.permute.xlu0 %12  }
  0x7d   :  { %15 = vst.msk [vmem:[#allocation0] sm:$0x1] %vm14_vm1, %v13_v3  }
  0x84   :  { %v20_v4 = vld [vmem:[#allocation0] sm:$0x1] }
  0x85   :  { %23 = vst [vmem:[%s43_s1] sm:$0x1] %v20_v4 }

// kernel: eq.8
= control target key start
LH: loop header
LB: loop body
LE: loop exit
PB: predicated region body
PF: predicated region fallthrough
CT: control target
= control target key end

     0   :  { %vm8_vm0 = vcmask 64512   ;;  %vm14_vm1 = vcmask 130112   ;;  %s42_s0 = inlined_call_operand.vmem [shape: s32[2,8], index: 0, kind: input, shape index: {}]   ;;  %s43_s1 = inlined_call_operand.vmem [shape: s32[16], index: 1, kind: output, shape index: {}]  }
   0x1   :  { %v5_v0 = vld [vmem:[%s42_s0] sm:$0x3]  ;;  %s25_s0 = smov 8  }
   0x2   :  { %6 = vst [vmem:[#allocation1] sm:$0x3] %v5_v0 }
   0x9   :  { %v11_v1 = vld [vmem:[#allocation1 + $0x1] sm:$0x1]   ;;  %v7_v2 = vld [vmem:[#allocation1] sm:$0x1]  }
   0xa   :  { %12 = vrot.lane.b32.xlu0 %v11_v1, %s25_s0  ;;  %9 = vst.msk [vmem:[#allocation0] sm:$0x1] %vm8_vm0, %v7_v2  }
  0x7c   :  { %v13_v3 = vpop.permute.xlu0 %12  }
  0x7d   :  { %15 = vst.msk [vmem:[#allocation0] sm:$0x1] %vm14_vm1, %v13_v3  }
  0x84   :  { %v20_v4 = vld [vmem:[#allocation0] sm:$0x1] }
  0x85   :  { %23 = vst [vmem:[%s43_s1] sm:$0x1] %v20_v4 }

// kernel: bert_mtl_forward.1
= control target key start
LH: loop header
LB: loop body
LE: loop exit
PB: predicated region body
PF: predicated region fallthrough
CT: control target
= control target key end

     0   :  { %13 = vsyncpa [#allocation3], 0  ;;  %s5970_s0 = inlined_call_operand.vmem [shape: s32[16,1], index: 0, kind: input, shape index: {}]   ;;  %s5971_s1 = inlined_call_operand.vmem [shape: s32[16,1], index: 1, kind: input, shape index: {}]   ;;  %s5972_s2 = inlined_call_operand.vmem [shape: s32[16,1], index: 2, kind: input, shape index: {}]   ;;  %s5973_s3 = inlined_call_operand.vmem [shape: f32[16,16], index: 3, kind: input, shape index: {}]   ;;  %s5974_s4 = inlined_call_operand.hbm [shape: bf16[3456,128], index: 4, kind: input, shape index: {}]   ;;  %s5975_s5 = inlined_call_operand.hbm [shape: f32[168,128], index: 5, kind: input, shape index: {}]   ;;  %s5976_s6 = inlined_call_operand.vmem [shape: f32[8,128], index: 6, kind: output, shape index: {0}]   ;;  %s5977_s7 = inlined_call_operand.vmem [shape: f32[8,128], index: 7, kind: output, shape index: {1}]  }
   0x1   :  { %14 = vsyncpa [#allocation5], 0  ;;  %s5443_s24 = smov [#allocation2]  }
   0x2   :  { %s28_s25 = sshll.u32 %s5443_s24, 4  ;;  %s29_s25 = int_to_ptr.vmem [resolvable:$true] %s28_s25 }
   0x3   :  { %s5407_s26 = scalar_lea.vmem %s29_s25, 27648  ;;  %p5412_p1 = scmp.lt.s32.totalorder %s29_s25, %s29_s25 }
   0x4   :  { %p5408_p0 = scmp.ne.s32.totalorder %s29_s25, %s5407_s26  ;;  %p5413_p2 = scmp.lt.s32.totalorder %s5407_s26, %s5407_s26 }
   0x6   :  { %p5414_p3 = por %p5413_p2, %p5412_p1 }
   0x8   :  { %p5415_p4 = pnand %p5414_p3, %p5408_p0 }
   0xa   :  { %5418 = shalt.err (!%p5415_p4)
}
   0xb   :  { %s5444_s27 = smov 64   ;;  %s5445_s28 = smov 4  }
   0xc   :  { %34 = dma.hbm_to_vmem [thread:$0]  %s5974_s4, 27648, %s29_s25, [#allocation3], %s5444_s27, %s5444_s27, %s5445_s28  }
   0xd   :  { %s5446_s8 = smov [#allocation4]  }
   0xe   :  { %s40_s9 = sshll.u32 %s5446_s8, 4  ;;  %s41_s9 = int_to_ptr.vmem [resolvable:$true] %s40_s9 }
   0xf   :  { %s5427_s10 = scalar_lea.vmem %s41_s9, 2688  ;;  %p5432_p6 = scmp.lt.s32.totalorder %s41_s9, %s41_s9 }
  0x10   :  { %p5428_p5 = scmp.ne.s32.totalorder %s41_s9, %s5427_s10  ;;  %p5433_p7 = scmp.lt.s32.totalorder %s5427_s10, %s5427_s10 }
  0x12   :  { %p5434_p8 = por %p5433_p7, %p5432_p6 }
  0x14   :  { %p5435_p9 = pnand %p5434_p8, %p5428_p5 }
  0x16   :  { %5438 = shalt.err (!%p5435_p9)
}
  0x17   :  { %s5447_s11 = smov 128   ;;  %s5448_s12 = smov 8  }
  0x18   :  { %46 = dma.hbm_to_vmem [thread:$0]  %s5975_s5, 2688, %s41_s9, [#allocation5], %s5447_s11, %s5447_s11, %s5448_s12  }
  0x19   :  { %5439 = dma.done.wait [#allocation3], 27648  }
  0x1a   :  { %5440 = vsyncadd [#allocation3], 4294939648 }
  0x1b   :  { %5441 = dma.done.wait [#allocation5], 2688  }
  0x1c   :  { %5442 = vsyncadd [#allocation5], 4294964608  ;;  %v5449_v0 = vmov 0   ;;  %v57_v1 = vld [vmem:[%s5970_s0 + $0x8] sm:$0xff]  ;;  %v56_v2 = vld [vmem:[%s5970_s0] sm:$0xff]  ;;  %v54_v7 = vlaneseq  ;;  %v5450_v31 = vmov 1.0  }
  0x1d   :  { %5118 = vset.pattern.permute.xlu1 %v5449_v0  ;;  %5117 = vset.pattern.permute.xlu0 %v5449_v0  ;;  %v67_v3 = vld [vmem:[%s5971_s1 + $0x8] sm:$0xff]  ;;  %v66_v4 = vld [vmem:[%s5971_s1] sm:$0xff]  ;;  %v107_v5 = vld [vmem:[#allocation4 + $0x78] sm:$0xff]  ;;  %v5451_v37 = vmov 0.0   ;;  %vm5452_vm10 = vmmov 0   ;;  %vm602_vm11 = vcmask 130048  }
  0x1e   :  { %62 = vperm.xlu1 %5118, %v57_v1   ;;  %59 = vperm.xlu0 %5117, %v56_v2   ;;  %v106_v6 = vld [vmem:[#allocation4 + $0x70] sm:$0xff]  ;;  %v105_v8 = vld [vmem:[#allocation4 + $0x68] sm:$0xff]  ;;  %v78_v10 = vld [vmem:[%s5972_s2] sm:$0xff]  ;;  %v5518_v12 = vand.u32 127, %v54_v7 }
  0x1f   :  { %4477 = vmatprep.subr.mxu0 %v107_v5  ;;  %v79_v9 = vld [vmem:[%s5972_s2 + $0x8] sm:$0xff]  ;;  %v104_v11 = vld [vmem:[#allocation4 + $0x60] sm:$0xff]  ;;  %v103_v13 = vld [vmem:[#allocation4 + $0x58] sm:$0xff]  ;;  %4512 = vmatprep.subr.bf16.mxu1 %v5451_v37 }
  0x20   :  { %4478 = vmatpush3.msra.mxu0 %v107_v5  ;;  %v102_v14 = vld [vmem:[#allocation4 + $0x50] sm:$0xff]  ;;  %v101_v15 = vld [vmem:[#allocation4 + $0x48] sm:$0xff]  ;;  %v100_v16 = vld [vmem:[#allocation4 + $0x40] sm:$0xff]  ;;  %4528 = vmatprep.mubr.msk.bf16.mxu1 %vm5452_vm10, %v5451_v37 }
  0x21   :  { %4479 = vmatprep.subr.mxu0 %v106_v6  ;;  %v99_v17 = vld [vmem:[#allocation4 + $0x38] sm:$0xff]  ;;  %v98_v18 = vld [vmem:[#allocation4 + $0x30] sm:$0xff]  ;;  %v97_v19 = vld [vmem:[#allocation4 + $0x28] sm:$0xff] }
  0x22   :  { %72 = vperm.xlu1 %5118, %v67_v3   ;;  %69 = vperm.xlu0 %5117, %v66_v4   ;;  %v96_v20 = vld [vmem:[#allocation4 + $0x20] sm:$0xff]  ;;  %v95_v21 = vld [vmem:[#allocation4 + $0x18] sm:$0xff]  ;;  %v94_v22 = vld [vmem:[#allocation4 + $0x10] sm:$0xff] }
  0x23   :  { %4480 = vmatpush3.msra.mxu0 %v106_v6  ;;  %v93_v23 = vld [vmem:[#allocation4 + $0x8] sm:$0xff]  ;;  %v92_v24 = vld [vmem:[#allocation4] sm:$0xff]  ;;  %v5119_v36 = vld [vmem:[#allocation2 + $0x38] sm:$0xff]  }
  0x24   :  { %4481 = vmatprep.subr.mxu0 %v105_v8  ;;  %v5120_v38 = vld [vmem:[#allocation2 + $0xb8] sm:$0xff]   ;;  %4513 = vmatpush3.bf16.msra.mxu1 %v5119_v36  ;;  %v5121_v39 = vld [vmem:[#allocation2 + $0x30] sm:$0xff]   ;;  %v5123_v41 = vld [vmem:[#allocation2 + $0x28] sm:$0xff]  }
  0x25   :  { %4482 = vmatpush3.msra.mxu0 %v105_v8  ;;  %4514 = vmatprep.subr.bf16.mxu1 %v5451_v37  ;;  %v5122_v40 = vld [vmem:[#allocation2 + $0xb0] sm:$0xff]   ;;  %v5124_v42 = vld [vmem:[#allocation2 + $0xa8] sm:$0xff]   ;;  %v5125_v43 = vld [vmem:[#allocation2 + $0x20] sm:$0xff]  }
  0x26   :  { %84 = vperm.xlu1 %5118, %v79_v9   ;;  %81 = vperm.xlu0 %5117, %v78_v10   ;;  %v5126_v44 = vld [vmem:[#allocation2 + $0xa0] sm:$0xff]   ;;  %v5127_v45 = vld [vmem:[#allocation2 + $0x18] sm:$0xff]   ;;  %v5129_v47 = vld [vmem:[#allocation2 + $0x10] sm:$0xff]  }
  0x27   :  { %4483 = vmatprep.subr.mxu0 %v104_v11  ;;  %v5128_v46 = vld [vmem:[#allocation2 + $0x98] sm:$0xff]   ;;  %v5130_v48 = vld [vmem:[#allocation2 + $0x90] sm:$0xff]   ;;  %v5131_v49 = vld [vmem:[#allocation2 + $0x8] sm:$0xff]  }
  0x28   :  { %4484 = vmatpush3.msra.mxu0 %v104_v11  ;;  %4515 = vmatpush3.bf16.msra.mxu1 %v5121_v39  ;;  %v5132_v50 = vld [vmem:[#allocation2 + $0x88] sm:$0xff]   ;;  %v5133_v51 = vld [vmem:[#allocation2] sm:$0xff]  }
  0x29   :  { %4485 = vmatprep.subr.mxu0 %v103_v13  ;;  %4516 = vmatprep.subr.bf16.mxu1 %v5451_v37  ;;  %v5134_v52 = vld [vmem:[#allocation2 + $0x80] sm:$0xff]  }
  0x2a   :  { %4486 = vmatpush3.msra.mxu0 %v103_v13  ;;  %v3943_v9 = vld [vmem:[#allocation4 + $0x80] ss:$0 sm:$0xff]  ;;  %v3954_v39 = vld [vmem:[#allocation4 + $0x84] ss:$0 sm:$0xff] }
  0x2b   :  { %4487 = vmatprep.subr.mxu0 %v102_v14 }
  0x2c   :  { %4488 = vmatpush3.msra.mxu0 %v102_v14  ;;  %4517 = vmatpush3.bf16.msra.mxu1 %v5123_v41 }
  0x2d   :  { %4489 = vmatprep.subr.mxu0 %v101_v15  ;;  %4518 = vmatprep.subr.bf16.mxu1 %v5451_v37 }
  0x2e   :  { %4490 = vmatpush3.msra.mxu0 %v101_v15  ;;  %v3944_v15 = vld [vmem:[#allocation4 + $0x81] ss:$0 sm:$0xff] }
  0x2f   :  { %4491 = vmatprep.subr.mxu0 %v100_v16 }
  0x30   :  { %4492 = vmatpush3.msra.mxu0 %v100_v16  ;;  %4519 = vmatpush3.bf16.msra.mxu1 %v5125_v43 }
  0x31   :  { %4493 = vmatprep.subr.mxu0 %v99_v17  ;;  %4520 = vmatprep.subr.bf16.mxu1 %v5451_v37 }
  0x32   :  { %4494 = vmatpush3.msra.mxu0 %v99_v17 }
  0x33   :  { %4495 = vmatprep.subr.mxu0 %v98_v18 }
  0x34   :  { %4496 = vmatpush3.msra.mxu0 %v98_v18  ;;  %4521 = vmatpush3.bf16.msra.mxu1 %v5127_v45 }
  0x35   :  { %4497 = vmatprep.subr.mxu0 %v97_v19  ;;  %4522 = vmatprep.subr.bf16.mxu1 %v5451_v37 }
  0x36   :  { %4498 = vmatpush3.msra.mxu0 %v97_v19  ;;  %v5135_v19 = vld [vmem:[#allocation2 + $0x138] sm:$0xff]  }
  0x37   :  { %4499 = vmatprep.subr.mxu0 %v96_v20 }
  0x38   :  { %4500 = vmatpush3.msra.mxu0 %v96_v20  ;;  %4523 = vmatpush3.bf16.msra.mxu1 %v5129_v47 }
  0x39   :  { %4501 = vmatprep.subr.mxu0 %v95_v21  ;;  %4524 = vmatprep.subr.bf16.mxu1 %v5451_v37 }
  0x3a   :  { %4502 = vmatpush3.msra.mxu0 %v95_v21  ;;  %v5136_v21 = vld [vmem:[#allocation2 + $0x130] sm:$0xff]  }
  0x3b   :  { %4503 = vmatprep.subr.mxu0 %v94_v22 }
  0x3c   :  { %4504 = vmatpush3.msra.mxu0 %v94_v22  ;;  %4525 = vmatpush3.bf16.msra.mxu1 %v5131_v49  ;;  %v5137_v22 = vld [vmem:[#allocation2 + $0x128] sm:$0xff]   ;;  %v3945_v49 = vld [vmem:[#allocation4 + $0x82] ss:$0 sm:$0xff] }
  0x3d   :  { %4505 = vmatprep.subr.mxu0 %v93_v23  ;;  %4526 = vmatprep.subr.bf16.mxu1 %v5451_v37 }
  0x3e   :  { %4506 = vmatpush3.msra.mxu0 %v93_v23  ;;  %v5138_v23 = vld [vmem:[#allocation2 + $0x120] sm:$0xff]  }
  0x3f   :  { %4507 = vmatprep.subr.mxu0 %v92_v24 }
  0x40   :  { %4508 = vmatpush3.msra.mxu0 %v92_v24  ;;  %4527 = vmatpush3.bf16.msra.mxu1 %v5133_v51  ;;  %v5139_v24 = vld [vmem:[#allocation2 + $0x118] sm:$0xff]  }
  0x41   :  { %4532 = vmatprep.subr.bf16.mxu0 %v5451_v37  ;;  %4552 = vmatprep.subr.bf16.mxu1 %v5451_v37 }
  0x99   :  { %v63_v25 = vpop.permute.xlu1 %62  ;;  %v60_v26 = vpop.permute.xlu0 %59 }
  0x9a   :  { %vm65_vm0 = vcmp.eq.s32.totalorder %v5518_v12, %v63_v25  ;;  %vm64_vm3 = vcmp.eq.s32.totalorder %v5518_v12, %v60_v26  ;;  %v5140_v25 = vld [vmem:[#allocation2 + $0x110] sm:$0xff]   ;;  %v5141_v26 = vld [vmem:[#allocation2 + $0x108] sm:$0xff]  }
  0x9d   :  { %v73_v27 = vpop.permute.xlu1 %72  ;;  %v70_v28 = vpop.permute.xlu0 %69 }
  0x9e   :  { %vm75_vm1 = vcmp.eq.s32.totalorder %v5518_v12, %v73_v27  ;;  %vm74_vm2 = vcmp.eq.s32.totalorder %v5518_v12, %v70_v28  ;;  %v5142_v27 = vld [vmem:[#allocation2 + $0x100] sm:$0xff]   ;;  %v5143_v28 = vld [vmem:[#allocation2 + $0xf8] sm:$0xff]  }
  0x9f   :  { %vm77_vm4 = vmor %vm65_vm0, %vm75_vm1 }
  0xa0   :  { %vm76_vm5 = vmor %vm64_vm3, %vm74_vm2 }
  0xa1   :  { %v85_v29 = vpop.permute.xlu1 %84  ;;  %v82_v30 = vpop.permute.xlu0 %81 }
  0xa2   :  { %vm87_vm6 = vcmp.eq.s32.totalorder %v5518_v12, %v85_v29  ;;  %vm86_vm7 = vcmp.eq.s32.totalorder %v5518_v12, %v82_v30  ;;  %v5144_v29 = vld [vmem:[#allocation2 + $0xf0] sm:$0xff]   ;;  %v5145_v30 = vld [vmem:[#allocation2 + $0xe8] sm:$0xff]  }
  0xa3   :  { %vm89_vm8 = vmor %vm77_vm4, %vm87_vm6 }
  0xa4   :  { %vm88_vm9 = vmor %vm76_vm5, %vm86_vm7 }
  0xa5   :  { %4509 = vmatprep.mubr.msk.f32.mxu0 %vm88_vm9, %v5450_v31 }
  0xa6   :  { %4510 = vmatmul.mubr.msk.f32.vlgmr.msra.gmra.mxu0 %vm89_vm8, %v5450_v31  ;;  %v5146_v31 = vld [vmem:[#allocation2 + $0xe0] sm:$0xff]  }
  0xa7   :  { %4533 = vmatpush3.bf16.msra.mxu0 %v5120_v38  ;;  %4548 = vmatprep.mubr.msk.bf16.mxu0 %vm5452_vm10, %v5451_v37 }
  0xa8   :  { %4534 = vmatprep.subr.bf16.mxu0 %v5451_v37 }
  0xab   :  { %4535 = vmatpush3.bf16.msra.mxu0 %v5122_v40 }
  0xac   :  { %4536 = vmatprep.subr.bf16.mxu0 %v5451_v37 }
  0xaf   :  { %4537 = vmatpush3.bf16.msra.mxu0 %v5124_v42 }
  0xb0   :  { %4538 = vmatprep.subr.bf16.mxu0 %v5451_v37 }
  0xb3   :  { %4539 = vmatpush3.bf16.msra.mxu0 %v5126_v44 }
  0xb4   :  { %4540 = vmatprep.subr.bf16.mxu0 %v5451_v37 }
  0xb7   :  { %4541 = vmatpush3.bf16.msra.mxu0 %v5128_v46 }
  0xb8   :  { %4542 = vmatprep.subr.bf16.mxu0 %v5451_v37 }
  0xbb   :  { %4543 = vmatpush3.bf16.msra.mxu0 %v5130_v48 }
  0xbc   :  { %4544 = vmatprep.subr.bf16.mxu0 %v5451_v37 }
  0xbf   :  { %4545 = vmatpush3.bf16.msra.mxu0 %v5132_v50 }
  0xc0   :  { %4546 = vmatprep.subr.bf16.mxu0 %v5451_v37 }
  0xc3   :  { %4547 = vmatpush3.bf16.msra.mxu0 %v5134_v52 }
  0xc4   :  { %4572 = vmatprep.subr.bf16.mxu0 %v5451_v37 }
 0x166   :  { %v5526_v32 = vpop.f32.mrf.mxu0 }
 0x167   :  { %185 = vadd.xlane.f32.xlu1 %v5526_v32  ;;  %v190_v35 = vmul.f32 %v5526_v32, %v5526_v32 }
 0x168   :  { %v5529_v33 = vpop.f32.mrf.mxu0 }
 0x169   :  { %183 = vadd.xlane.f32.xlu0 %v5529_v33  ;;  %v189_v34 = vmul.f32 %v5529_v33, %v5529_v33 }
 0x16d   :  { %191 = vadd.xlane.f32.xlu0 %v189_v34  ;;  %v5149_v34 = vld [vmem:[#allocation2 + $0xc8] sm:$0xff]  }
 0x171   :  { %193 = vadd.xlane.f32.xlu0 %v190_v35  ;;  %v5150_v35 = vld [vmem:[#allocation2 + $0xc0] sm:$0xff]  }
 0x1f0   :  { %v186_v55 = vpop.xlane.xlu1 %185 }
 0x1f1   :  { %v188_v57 = vmul.f32 0.03125, %v186_v55 }
 0x1f2   :  { %v184_v53 = vpop.xlane.xlu0 %183 }
 0x1f3   :  { %v187_v54 = vmul.f32 0.03125, %v184_v53  ;;  %v198_v62 = vmul.f32 %v188_v57, %v188_v57  ;;  %v208_v10 = vsub.f32 %v5526_v32, %v188_v57  ;;  %v5147_v32 = vld [vmem:[#allocation2 + $0xd8] sm:$0xff]  }
 0x1f5   :  { %v197_v58 = vmul.f32 %v187_v54, %v187_v54  ;;  %v207_v5 = vsub.f32 %v5529_v33, %v187_v54  ;;  %v5148_v33 = vld [vmem:[#allocation2 + $0xd0] sm:$0xff]   ;;  %v3963_v54 = vld [vmem:[#allocation4 + $0x86] ss:$0 sm:$0xff] }
 0x1f6   :  { %v192_v56 = vpop.xlane.xlu0 %191 }
 0x1f7   :  { %v195_v59 = vmul.f32 0.03125, %v192_v56 }
 0x1f9   :  { %v199_v60 = vsub.f32 %v195_v59, %v197_v58 }
 0x1fa   :  { %v194_v61 = vpop.xlane.xlu0 %193 }
 0x1fb   :  { %v201_v63 = vmax.f32 %v199_v60, 0.0  ;;  %v196_v0 = vmul.f32 0.03125, %v194_v61 }
 0x1fd   :  { %v203_v1 = vadd.f32 1e-12, %v201_v63  ;;  %v200_v2 = vsub.f32 %v196_v0, %v198_v62  ;;  %v3982_v62 = vld [vmem:[#allocation4 + $0x85] ss:$0 sm:$0xff] }
 0x1ff   :  { %5335 = vrsqrt.f32 %v203_v1  ;;  %v202_v3 = vmax.f32 %v200_v2, 0.0 }
 0x201   :  { %v204_v4 = vadd.f32 1e-12, %v202_v3 }
 0x203   :  { %5337 = vrsqrt.f32 %v204_v4 }
 0x20c   :  { %v5336_v6 = vpop.eup %5335 }
 0x20d   :  { %v209_v8 = vmul.f32 %v5336_v6, %v207_v5  ;;  %v5604_v5 = vld [vmem:[%s5973_s3] sm:$0xff] }
 0x20f   :  { %v216_v13 = vmul.f32 %v3943_v9, %v209_v8 }
 0x210   :  { %v5338_v11 = vpop.eup %5337 }
 0x211   :  { %v210_v14 = vmul.f32 %v5338_v11, %v208_v10  ;;  %v5560_v17 = vadd.f32 %v3944_v15, %v216_v13  ;;  %v5610_v10 = vld [vmem:[%s5973_s3 + $0x8] sm:$0xff] }
 0x213   :  { %v217_v16 = vmul.f32 %v3943_v9, %v210_v14 }
 0x215   :  { %v5562_v18 = vadd.f32 %v3944_v15, %v217_v16 }
 0x217   :  { %v5566_v20 = vpack.c.bf16 %v5562_v18, %v5560_v17 }
 0x219   :  { %4529 = vmatmul.mubr.bf16.vlgmr.msra.gmra.mxu1 %v5566_v20  ;;  %4549 = vmatmul.mubr.bf16.vlgmr.msra.gmra.mxu0 %v5566_v20 }
 0x21a   :  { %4553 = vmatpush3.bf16.msra.mxu1 %v5135_v19  ;;  %4568 = vmatprep.mubr.msk.bf16.mxu1 %vm5452_vm10, %v5451_v37 }
 0x21b   :  { %4554 = vmatprep.subr.bf16.mxu1 %v5451_v37  ;;  %4574 = vmatprep.mubr.msk.bf16.mxu0 %vm5452_vm10, %v5451_v37 }
 0x21e   :  { %4555 = vmatpush3.bf16.msra.mxu1 %v5136_v21 }
 0x21f   :  { %4556 = vmatprep.subr.bf16.mxu1 %v5451_v37 }
 0x222   :  { %4557 = vmatpush3.bf16.msra.mxu1 %v5137_v22 }
 0x223   :  { %4558 = vmatprep.subr.bf16.mxu1 %v5451_v37 }
 0x226   :  { %4559 = vmatpush3.bf16.msra.mxu1 %v5138_v23 }
 0x227   :  { %4560 = vmatprep.subr.bf16.mxu1 %v5451_v37 }
 0x22a   :  { %4561 = vmatpush3.bf16.msra.mxu1 %v5139_v24 }
 0x22b   :  { %4562 = vmatprep.subr.bf16.mxu1 %v5451_v37 }
 0x22e   :  { %4563 = vmatpush3.bf16.msra.mxu1 %v5140_v25 }
 0x22f   :  { %4564 = vmatprep.subr.bf16.mxu1 %v5451_v37 }
 0x232   :  { %4565 = vmatpush3.bf16.msra.mxu1 %v5141_v26 }
 0x233   :  { %4566 = vmatprep.subr.bf16.mxu1 %v5451_v37 }
 0x236   :  { %4567 = vmatpush3.bf16.msra.mxu1 %v5142_v27 }
 0x237   :  { %4604 = vmatprep.subr.bf16.mxu1 %v5451_v37 }
 0x239   :  { %4569 = vmatmul.mubr.bf16.vlgmr.msra.gmra.mxu1 %v5566_v20 }
 0x23a   :  { %4605 = vmatpush3.bf16.msra.mxu1 %v5143_v28  ;;  %4620 = vmatprep.mubr.msk.bf16.mxu1 %vm5452_vm10, %v5451_v37 }
 0x23b   :  { %4606 = vmatprep.subr.bf16.mxu1 %v5451_v37 }
 0x23e   :  { %4607 = vmatpush3.bf16.msra.mxu1 %v5144_v29 }
 0x23f   :  { %4608 = vmatprep.subr.bf16.mxu1 %v5451_v37 }
 0x242   :  { %4609 = vmatpush3.bf16.msra.mxu1 %v5145_v30 }
 0x243   :  { %4610 = vmatprep.subr.bf16.mxu1 %v5451_v37 }
 0x246   :  { %4611 = vmatpush3.bf16.msra.mxu1 %v5146_v31 }
 0x247   :  { %4612 = vmatprep.subr.bf16.mxu1 %v5451_v37 }
 0x24a   :  { %4613 = vmatpush3.bf16.msra.mxu1 %v5147_v32 }
 0x24b   :  { %4614 = vmatprep.subr.bf16.mxu1 %v5451_v37 }
 0x24e   :  { %4615 = vmatpush3.bf16.msra.mxu1 %v5148_v33 }
 0x24f   :  { %4616 = vmatprep.subr.bf16.mxu1 %v5451_v37 }
 0x252   :  { %4617 = vmatpush3.bf16.msra.mxu1 %v5149_v34 }
 0x253   :  { %4618 = vmatprep.subr.bf16.mxu1 %v5451_v37 }
 0x256   :  { %4619 = vmatpush3.bf16.msra.mxu1 %v5150_v35 }
 0x257   :  { %4644 = vmatprep.subr.bf16.mxu1 %v5451_v37 }
 0x259   :  { %4621 = vmatmul.mubr.bf16.vlgmr.msra.gmra.mxu1 %v5566_v20 }
 0x25a   :  { %4646 = vmatprep.mubr.msk.bf16.mxu1 %vm5452_vm10, %v5451_v37 }
 0x2d9   :  { %v331_v36 = vpop.f32.mrf.mxu1  ;;  %v442_v38 = vpop.f32.mrf.mxu0 }
 0x2da   :  { %v443_v44 = vadd.f32 %v3954_v39, %v442_v38  ;;  %v332_v51 = vadd.f32 %v3945_v49, %v331_v36  ;;  %v5151_v36 = vld [vmem:[#allocation2 + $0x78] sm:$0xff]  }
 0x2db   :  { %v4530_v40 = vpop.f32.mrf.mxu1  ;;  %v4550_v41 = vpop.f32.mrf.mxu0 }
 0x2dc   :  { %v5153_v40 = vld [vmem:[#allocation2 + $0x68] sm:$0xff]   ;;  %v5154_v41 = vld [vmem:[#allocation2 + $0x60] sm:$0xff]  }
 0x2dd   :  { %v334_v42 = vpop.f32.mrf.mxu1  ;;  %v445_v43 = vpop.f32.mrf.mxu0 }
 0x2de   :  { %v446_v45 = vadd.f32 %v3954_v39, %v445_v43  ;;  %v335_v50 = vadd.f32 %v3945_v49, %v334_v42  ;;  %v5152_v39 = vld [vmem:[#allocation2 + $0x70] sm:$0xff]   ;;  %v5155_v42 = vld [vmem:[#allocation2 + $0x58] sm:$0xff]   ;;  %v5162_v49 = vld [vmem:[#allocation2 + $0x160] sm:$0xff]  }
 0x2df   :  { %v4531_v46 = vpop.f32.mrf.mxu1  ;;  %v4551_v47 = vpop.f32.mrf.mxu0  ;;  %v5156_v43 = vld [vmem:[#allocation2 + $0x50] sm:$0xff]  }
 0x2e0   :  { %v449_v48 = vpack.c.bf16 %v446_v45, %v443_v44  ;;  %v338_v52 = vpack.c.bf16 %v335_v50, %v332_v51  ;;  %v5157_v44 = vld [vmem:[#allocation2 + $0x48] sm:$0xff]   ;;  %v5158_v45 = vld [vmem:[#allocation2 + $0x40] sm:$0xff]   ;;  %v5159_v46 = vld [vmem:[#allocation2 + $0x178] sm:$0xff]  }
 0x2e1   :  { %v5160_v47 = vld [vmem:[#allocation2 + $0x170] sm:$0xff]   ;;  %v5163_v50 = vld [vmem:[#allocation2 + $0x158] sm:$0xff]  }
 0x2e2   :  { %4573 = vmatpush3.bf16.xpose.msra.mxu0 %v449_v48  ;;  %v5161_v48 = vld [vmem:[#allocation2 + $0x168] sm:$0xff]   ;;  %v5164_v51 = vld [vmem:[#allocation2 + $0x150] sm:$0xff]  }
 0x2e3   :  { %4578 = vmatprep.subr.bf16.mxu0 %v5451_v37 }
 0x2e9   :  { %4575 = vmatmul.mubr.bf16.vlgmr.msra.gmra.mxu0 %v338_v52  ;;  %v5165_v52 = vld [vmem:[#allocation2 + $0x148] sm:$0xff]  }
 0x2ea   :  { %4580 = vmatprep.mubr.msk.bf16.mxu0 %vm5452_vm10, %v5451_v37 }
 0x2f9   :  { %v553_v53 = vpop.f32.mrf.mxu1 }
 0x2fa   :  { %v554_v57 = vadd.f32 %v3963_v54, %v553_v53  ;;  %v5166_v53 = vld [vmem:[#allocation2 + $0x140] sm:$0xff]  }
 0x2fb   :  { %v4570_v55 = vpop.f32.mrf.mxu1 }
 0x2fc   :  { %v5168_v55 = vld [vmem:[#allocation2 + $0x1b0] sm:$0xff]  }
 0x2fd   :  { %v556_v56 = vpop.f32.mrf.mxu1 }
 0x2fe   :  { %v557_v58 = vadd.f32 %v3963_v54, %v556_v56  ;;  %v5167_v54 = vld [vmem:[#allocation2 + $0x1b8] sm:$0xff]   ;;  %v5169_v56 = vld [vmem:[#allocation2 + $0x1a8] sm:$0xff]  }
 0x2ff   :  { %v4571_v59 = vpop.f32.mrf.mxu1 }
 0x300   :  { %v560_v60 = vpack.c.bf16 %v557_v58, %v554_v57  ;;  %v5170_v57 = vld [vmem:[#allocation2 + $0x1a0] sm:$0xff]   ;;  %v5171_v58 = vld [vmem:[#allocation2 + $0x198] sm:$0xff]   ;;  %v5173_v59 = vld [vmem:[#allocation2 + $0x188] sm:$0xff]  }
 0x302   :  { %4579 = vmatpush3.bf16.msra.mxu0 %v560_v60  ;;  %v5174_v60 = vld [vmem:[#allocation2 + $0x180] sm:$0xff]  }
 0x303   :  { %4584 = vmatprep.subr.bf16.mxu0 %v5451_v37 }
 0x319   :  { %v901_v61 = vpop.f32.mrf.mxu1 }
 0x31a   :  { %v902_v1 = vadd.f32 %v3982_v62, %v901_v61 }
 0x31b   :  { %v4622_v63 = vpop.f32.mrf.mxu1 }
 0x31d   :  { %v904_v0 = vpop.f32.mrf.mxu1 }
 0x31e   :  { %v905_v2 = vadd.f32 %v3982_v62, %v904_v0 }
 0x31f   :  { %v4623_v3 = vpop.f32.mrf.mxu1 }
 0x320   :  { %v908_v4 = vpack.c.bf16 %v905_v2, %v902_v1  ;;  %v3973_v3 = vld [vmem:[#allocation4 + $0x83] ss:$0 sm:$0xff] }
 0x322   :  { %4645 = vmatpush3.bf16.xpose.msra.mxu1 %v908_v4 }
 0x323   :  { %4650 = vmatprep.subr.bf16.mxu1 %v5451_v37 }
 0x3a9   :  { %v595_v6 = vpop.f32.mrf.mxu0 }
 0x3aa   :  { %v596_v8 = vadd.f32 %v595_v6, %v5604_v5 }
 0x3ab   :  { %v4576_v9 = vpop.f32.mrf.mxu0 }
 0x3ac   :  { %v603_v11 = vsel %vm602_vm11, %v596_v8, -inf }
 0x3ad   :  { %604 = vmax.xlane.f32.xlu1 %v603_v11  ;;  %v598_v13 = vpop.f32.mrf.mxu0 }
 0x3ae   :  { %v599_v14 = vadd.f32 %v598_v13, %v5610_v10 }
 0x3af   :  { %v4577_v15 = vpop.f32.mrf.mxu0 }
 0x3b0   :  { %v606_v16 = vsel %vm602_vm11, %v599_v14, -inf  ;;  %v3991_v15 = vld [vmem:[#allocation4 + $0x87] ss:$0 sm:$0xff] }
 0x3b1   :  { %607 = vmax.xlane.f32.xlu0 %v606_v16 }
 0x436   :  { %v605_v19 = vpop.xlane.xlu1 %604 }
 0x437   :  { %v609_v21 = vsub.f32 %v596_v8, %v605_v19 }
 0x439   :  { %v611_v22 = vmul.f32 1.442695, %v609_v21 }
 0x43a   :  { %v608_v23 = vpop.xlane.xlu0 %607 }
 0x43b   :  { %5339 = vpow2.f32 %v611_v22  ;;  %v610_v24 = vsub.f32 %v599_v14, %v608_v23 }
 0x43d   :  { %v613_v25 = vmul.f32 1.442695, %v610_v24 }
 0x43f   :  { %5341 = vpow2.f32 %v613_v25 }
 0x448   :  { %v5340_v26 = vpop.eup %5339 }
 0x449   :  { %v615_v27 = vsel %vm602_vm11, %v5340_v26, 0.0 }
 0x44a   :  { %616 = vadd.xlane.f32.xlu1 %v615_v27 }
 0x44c   :  { %v5342_v28 = vpop.eup %5341 }
 0x44d   :  { %v618_v29 = vsel %vm602_vm11, %v5342_v28, 0.0 }
 0x44e   :  { %619 = vadd.xlane.f32.xlu0 %v618_v29 }
 0x4d3   :  { %v617_v30 = vpop.xlane.xlu1 %616 }
 0x4d4   :  { %5343 = vrcp.f32 %v617_v30 }
 0x4d7   :  { %v620_v31 = vpop.xlane.xlu0 %619 }
 0x4d8   :  { %5345 = vrcp.f32 %v620_v31 }
 0x4e1   :  { %v5344_v32 = vpop.eup %5343 }
 0x4e2   :  { %v623_v34 = vmul.f32 %v5344_v32, %v5340_v26 }
 0x4e5   :  { %v5346_v33 = vpop.eup %5345 }
 0x4e6   :  { %v624_v35 = vmul.f32 %v5346_v33, %v5342_v28 }
 0x4e8   :  { %v625_v38 = vpack.c.bf16 %v624_v35, %v623_v34 }
 0x4ea   :  { %4581 = vmatmul.mubr.msk.bf16.vlgmr.msra.gmra.mxu0 %vm602_vm11, %v625_v38 }
 0x4eb   :  { %4585 = vmatpush3.bf16.msra.mxu0 %v5151_v36  ;;  %4600 = vmatprep.mubr.msk.bf16.mxu0 %vm5452_vm10, %v5451_v37 }
 0x4ec   :  { %4586 = vmatprep.subr.bf16.mxu0 %v5451_v37 }
 0x4ef   :  { %4587 = vmatpush3.bf16.msra.mxu0 %v5152_v39 }
 0x4f0   :  { %4588 = vmatprep.subr.bf16.mxu0 %v5451_v37 }
 0x4f3   :  { %4589 = vmatpush3.bf16.msra.mxu0 %v5153_v40 }
 0x4f4   :  { %4590 = vmatprep.subr.bf16.mxu0 %v5451_v37 }
 0x4f7   :  { %4591 = vmatpush3.bf16.msra.mxu0 %v5154_v41 }
 0x4f8   :  { %4592 = vmatprep.subr.bf16.mxu0 %v5451_v37 }
 0x4fb   :  { %4593 = vmatpush3.bf16.msra.mxu0 %v5155_v42 }
 0x4fc   :  { %4594 = vmatprep.subr.bf16.mxu0 %v5451_v37 }
 0x4ff   :  { %4595 = vmatpush3.bf16.msra.mxu0 %v5156_v43 }
 0x500   :  { %4596 = vmatprep.subr.bf16.mxu0 %v5451_v37 }
 0x503   :  { %4597 = vmatpush3.bf16.msra.mxu0 %v5157_v44 }
 0x504   :  { %4598 = vmatprep.subr.bf16.mxu0 %v5451_v37 }
 0x507   :  { %4599 = vmatpush3.bf16.msra.mxu0 %v5158_v45 }
 0x508   :  { %4624 = vmatprep.subr.bf16.mxu0 %v5451_v37 }
 0x50a   :  { %4601 = vmatmul.mubr.bf16.vlgmr.msra.gmra.mxu0 %v5566_v20 }
 0x50b   :  { %4625 = vmatpush3.bf16.msra.mxu0 %v5159_v46  ;;  %4640 = vmatprep.mubr.msk.bf16.mxu0 %vm5452_vm10, %v5451_v37 }
 0x50c   :  { %4626 = vmatprep.subr.bf16.mxu0 %v5451_v37 }
 0x50f   :  { %4627 = vmatpush3.bf16.msra.mxu0 %v5160_v47 }
 0x510   :  { %4628 = vmatprep.subr.bf16.mxu0 %v5451_v37 }
 0x513   :  { %4629 = vmatpush3.bf16.msra.mxu0 %v5161_v48 }
 0x514   :  { %4630 = vmatprep.subr.bf16.mxu0 %v5451_v37 }
 0x517   :  { %4631 = vmatpush3.bf16.msra.mxu0 %v5162_v49 }
 0x518   :  { %4632 = vmatprep.subr.bf16.mxu0 %v5451_v37 }
 0x51b   :  { %4633 = vmatpush3.bf16.msra.mxu0 %v5163_v50 }
 0x51c   :  { %4634 = vmatprep.subr.bf16.mxu0 %v5451_v37 }
 0x51f   :  { %4635 = vmatpush3.bf16.msra.mxu0 %v5164_v51 }
 0x520   :  { %4636 = vmatprep.subr.bf16.mxu0 %v5451_v37 }
 0x523   :  { %4637 = vmatpush3.bf16.msra.mxu0 %v5165_v52  ;;  %v5175_v52 = vld [vmem:[#allocation2 + $0x1f8] sm:$0xff]  }
 0x524   :  { %4638 = vmatprep.subr.bf16.mxu0 %v5451_v37 }
 0x527   :  { %4639 = vmatpush3.bf16.msra.mxu0 %v5166_v53 }
 0x528   :  { %4676 = vmatprep.subr.bf16.mxu0 %v5451_v37 }
 0x52a   :  { %4641 = vmatmul.mubr.bf16.vlgmr.msra.gmra.mxu0 %v5566_v20  ;;  %v5172_v20 = vld [vmem:[#allocation2 + $0x190] sm:$0xff]  }
 0x52b   :  { %4677 = vmatpush3.bf16.msra.mxu0 %v5167_v54  ;;  %4692 = vmatprep.mubr.msk.bf16.mxu0 %vm5452_vm10, %v5451_v37  ;;  %v5176_v54 = vld [vmem:[#allocation2 + $0x1f0] sm:$0xff]  }
 0x52c   :  { %4678 = vmatprep.subr.bf16.mxu0 %v5451_v37 }
 0x52f   :  { %4679 = vmatpush3.bf16.msra.mxu0 %v5168_v55  ;;  %v5177_v55 = vld [vmem:[#allocation2 + $0x1e8] sm:$0xff]  }
 0x530   :  { %4680 = vmatprep.subr.bf16.mxu0 %v5451_v37 }
 0x533   :  { %4681 = vmatpush3.bf16.msra.mxu0 %v5169_v56  ;;  %v5178_v56 = vld [vmem:[#allocation2 + $0x1e0] sm:$0xff]  }
 0x534   :  { %4682 = vmatprep.subr.bf16.mxu0 %v5451_v37 }
 0x537   :  { %4683 = vmatpush3.bf16.msra.mxu0 %v5170_v57  ;;  %v5179_v57 = vld [vmem:[#allocation2 + $0x1d8] sm:$0xff]  }
 0x538   :  { %4684 = vmatprep.subr.bf16.mxu0 %v5451_v37 }
 0x53b   :  { %4685 = vmatpush3.bf16.msra.mxu0 %v5171_v58  ;;  %v5180_v58 = vld [vmem:[#allocation2 + $0x1d0] sm:$0xff]  }
 0x53c   :  { %4686 = vmatprep.subr.bf16.mxu0 %v5451_v37 }
 0x53f   :  { %4687 = vmatpush3.bf16.msra.mxu0 %v5172_v20  ;;  %v5181_v20 = vld [vmem:[#allocation2 + $0x1c8] sm:$0xff]  }
 0x540   :  { %4688 = vmatprep.subr.bf16.mxu0 %v5451_v37 }
 0x543   :  { %4689 = vmatpush3.bf16.msra.mxu0 %v5173_v59  ;;  %v5182_v59 = vld [vmem:[#allocation2 + $0x1c0] sm:$0xff]  }
 0x544   :  { %4690 = vmatprep.subr.bf16.mxu0 %v5451_v37 }
 0x547   :  { %4691 = vmatpush3.bf16.msra.mxu0 %v5174_v60 }
 0x548   :  { %4716 = vmatprep.subr.bf16.mxu0 %v5451_v37 }
 0x5aa   :  { %v663_v61 = vpop.f32.mrf.mxu0 }
 0x5ac   :  { %v4582_v62 = vpop.f32.mrf.mxu0 }
 0x5ae   :  { %v666_v63 = vpop.f32.mrf.mxu0 }
 0x5af   :  { %v670_v0 = vpack.c.bf16 %v666_v63, %v663_v61 }
 0x5b0   :  { %v4583_v1 = vpop.f32.mrf.mxu0 }
 0x5b1   :  { %4693 = vmatmul.mubr.bf16.vlgmr.msra.gmra.mxu0 %v670_v0 }
 0x5b2   :  { %4732 = vmatprep.mubr.msk.bf16.mxu0 %vm5452_vm10, %v5451_v37 }
 0x5ca   :  { %v790_v2 = vpop.f32.mrf.mxu0 }
 0x5cb   :  { %v791_v8 = vadd.f32 %v3973_v3, %v790_v2  ;;  %v4017_v2 = vld [vmem:[#allocation4 + $0x88] ss:$0 sm:$0xff] }
 0x5cc   :  { %v4602_v4 = vpop.f32.mrf.mxu0 }
 0x5ce   :  { %v793_v6 = vpop.f32.mrf.mxu0 }
 0x5cf   :  { %v794_v9 = vadd.f32 %v3973_v3, %v793_v6 }
 0x5d0   :  { %v4603_v11 = vpop.f32.mrf.mxu0 }
 0x5d1   :  { %v797_v13 = vpack.c.bf16 %v794_v9, %v791_v8 }
 0x5d3   :  { %4647 = vmatmul.mubr.bf16.vlgmr.msra.gmra.mxu1 %v797_v13 }
 0x5d4   :  { %4652 = vmatprep.mubr.msk.bf16.mxu1 %vm5452_vm10, %v5451_v37 }
 0x5ea   :  { %v1012_v14 = vpop.f32.mrf.mxu0 }
 0x5eb   :  { %v1013_v21 = vadd.f32 %v3991_v15, %v1012_v14 }
 0x5ec   :  { %v4642_v16 = vpop.f32.mrf.mxu0 }
 0x5ee   :  { %v1015_v19 = vpop.f32.mrf.mxu0 }
 0x5ef   :  { %v1016_v22 = vadd.f32 %v3991_v15, %v1015_v19 }
 0x5f0   :  { %v4643_v23 = vpop.f32.mrf.mxu0 }
 0x5f1   :  { %v1019_v24 = vpack.c.bf16 %v1016_v22, %v1013_v21  ;;  %v5183_v21 = vld [vmem:[#allocation2 + $0x238] sm:$0xff]   ;;  %v5184_v22 = vld [vmem:[#allocation2 + $0x230] sm:$0xff]   ;;  %v5185_v23 = vld [vmem:[#allocation2 + $0x228] sm:$0xff]  }
 0x5f3   :  { %4651 = vmatpush3.bf16.msra.mxu1 %v1019_v24  ;;  %v5187_v24 = vld [vmem:[#allocation2 + $0x218] sm:$0xff]  }
 0x5f4   :  { %4656 = vmatprep.subr.bf16.mxu1 %v5451_v37 }
 0x671   :  { %v5655_v25 = vpop.f32.mrf.mxu0 }
 0x673   :  { %v4694_v26 = vpop.f32.mrf.mxu0 }
 0x674   :  { %v5190_v26 = vld [vmem:[#allocation2 + $0x200] sm:$0xff]  }
 0x675   :  { %v5657_v27 = vpop.f32.mrf.mxu0 }
 0x677   :  { %v4695_v28 = vpop.f32.mrf.mxu0 }
 0x693   :  { %v1054_v29 = vpop.f32.mrf.mxu1 }
 0x694   :  { %v1055_v30 = vadd.f32 %v1054_v29, %v5604_v5 }
 0x695   :  { %v4648_v31 = vpop.f32.mrf.mxu1 }
 0x696   :  { %v1061_v32 = vsel %vm602_vm11, %v1055_v30, -inf }
 0x697   :  { %1062 = vmax.xlane.f32.xlu1 %v1061_v32  ;;  %v1057_v33 = vpop.f32.mrf.mxu1 }
 0x698   :  { %v1058_v34 = vadd.f32 %v1057_v33, %v5610_v10 }
 0x699   :  { %v4649_v35 = vpop.f32.mrf.mxu1 }
 0x69a   :  { %v1064_v36 = vsel %vm602_vm11, %v1058_v34, -inf }
 0x69b   :  { %1065 = vmax.xlane.f32.xlu0 %v1064_v36 }
 0x720   :  { %v1063_v38 = vpop.xlane.xlu1 %1062 }
 0x721   :  { %v1067_v39 = vsub.f32 %v1055_v30, %v1063_v38 }
 0x723   :  { %v1069_v40 = vmul.f32 1.442695, %v1067_v39 }
 0x724   :  { %v1066_v41 = vpop.xlane.xlu0 %1065 }
 0x725   :  { %5347 = vpow2.f32 %v1069_v40  ;;  %v1068_v42 = vsub.f32 %v1058_v34, %v1066_v41 }
 0x727   :  { %v1071_v43 = vmul.f32 1.442695, %v1068_v42 }
 0x729   :  { %5349 = vpow2.f32 %v1071_v43 }
 0x732   :  { %v5348_v5 = vpop.eup %5347 }
 0x733   :  { %v1073_v44 = vsel %vm602_vm11, %v5348_v5, 0.0 }
 0x734   :  { %1074 = vadd.xlane.f32.xlu1 %v1073_v44 }
 0x736   :  { %v5350_v45 = vpop.eup %5349 }
 0x737   :  { %v1076_v46 = vsel %vm602_vm11, %v5350_v45, 0.0 }
 0x738   :  { %1077 = vadd.xlane.f32.xlu0 %v1076_v46  ;;  %v4018_v46 = vld [vmem:[#allocation4 + $0x89] ss:$0 sm:$0xff] }
 0x7bd   :  { %v1075_v10 = vpop.xlane.xlu1 %1074 }
 0x7be   :  { %5351 = vrcp.f32 %v1075_v10 }
 0x7c1   :  { %v1078_v47 = vpop.xlane.xlu0 %1077 }
 0x7c2   :  { %5353 = vrcp.f32 %v1078_v47 }
 0x7cb   :  { %v5352_v48 = vpop.eup %5351 }
 0x7cc   :  { %v1081_v50 = vmul.f32 %v5352_v48, %v5348_v5 }
 0x7cf   :  { %v5354_v49 = vpop.eup %5353 }
 0x7d0   :  { %v1082_v51 = vmul.f32 %v5354_v49, %v5350_v45 }
 0x7d2   :  { %v1083_v53 = vpack.c.bf16 %v1082_v51, %v1081_v50  ;;  %v4019_v50 = vld [vmem:[#allocation4 + $0x8a] ss:$0 sm:$0xff] }
 0x7d4   :  { %4653 = vmatmul.mubr.msk.bf16.vlgmr.msra.gmra.mxu1 %vm602_vm11, %v1083_v53 }
 0x7d5   :  { %4657 = vmatpush3.bf16.msra.mxu1 %v5175_v52  ;;  %4672 = vmatprep.mubr.msk.bf16.mxu1 %vm5452_vm10, %v5451_v37 }
 0x7d6   :  { %4658 = vmatprep.subr.bf16.mxu1 %v5451_v37 }
 0x7d9   :  { %4659 = vmatpush3.bf16.msra.mxu1 %v5176_v54 }
 0x7da   :  { %4660 = vmatprep.subr.bf16.mxu1 %v5451_v37 }
 0x7dd   :  { %4661 = vmatpush3.bf16.msra.mxu1 %v5177_v55  ;;  %v5191_v55 = vld [vmem:[#allocation2 + $0x278] sm:$0xff]  }
 0x7de   :  { %4662 = vmatprep.subr.bf16.mxu1 %v5451_v37  ;;  %4717 = vmatpush3.bf16.msra.mxu0 %v5191_v55 }
 0x7df   :  { %4718 = vmatprep.subr.bf16.mxu0 %v5451_v37 }
 0x7e1   :  { %4663 = vmatpush3.bf16.msra.mxu1 %v5178_v56  ;;  %v5192_v56 = vld [vmem:[#allocation2 + $0x270] sm:$0xff]  }
 0x7e2   :  { %4664 = vmatprep.subr.bf16.mxu1 %v5451_v37  ;;  %4719 = vmatpush3.bf16.msra.mxu0 %v5192_v56 }
 0x7e3   :  { %4720 = vmatprep.subr.bf16.mxu0 %v5451_v37 }
 0x7e5   :  { %4665 = vmatpush3.bf16.msra.mxu1 %v5179_v57  ;;  %v5193_v57 = vld [vmem:[#allocation2 + $0x268] sm:$0xff]  }
 0x7e6   :  { %4666 = vmatprep.subr.bf16.mxu1 %v5451_v37  ;;  %4721 = vmatpush3.bf16.msra.mxu0 %v5193_v57 }
 0x7e7   :  { %4722 = vmatprep.subr.bf16.mxu0 %v5451_v37 }
 0x7e9   :  { %4667 = vmatpush3.bf16.msra.mxu1 %v5180_v58  ;;  %v5194_v58 = vld [vmem:[#allocation2 + $0x260] sm:$0xff]  }
 0x7ea   :  { %4668 = vmatprep.subr.bf16.mxu1 %v5451_v37  ;;  %4723 = vmatpush3.bf16.msra.mxu0 %v5194_v58 }
 0x7eb   :  { %4724 = vmatprep.subr.bf16.mxu0 %v5451_v37 }
 0x7ed   :  { %4669 = vmatpush3.bf16.msra.mxu1 %v5181_v20  ;;  %v5195_v20 = vld [vmem:[#allocation2 + $0x258] sm:$0xff]  }
 0x7ee   :  { %4670 = vmatprep.subr.bf16.mxu1 %v5451_v37  ;;  %4725 = vmatpush3.bf16.msra.mxu0 %v5195_v20 }
 0x7ef   :  { %4726 = vmatprep.subr.bf16.mxu0 %v5451_v37 }
 0x7f1   :  { %4671 = vmatpush3.bf16.msra.mxu1 %v5182_v59  ;;  %v5196_v59 = vld [vmem:[#allocation2 + $0x250] sm:$0xff]  }
 0x7f2   :  { %4696 = vmatprep.subr.bf16.mxu1 %v5451_v37  ;;  %4727 = vmatpush3.bf16.msra.mxu0 %v5196_v59 }
 0x7f3   :  { %4728 = vmatprep.subr.bf16.mxu0 %v5451_v37 }
 0x894   :  { %v1121_v60 = vpop.f32.mrf.mxu1 }
 0x896   :  { %v4654_v61 = vpop.f32.mrf.mxu1 }
 0x897   :  { %v5198_v61 = vld [vmem:[#allocation2 + $0x240] sm:$0xff]  }
 0x898   :  { %v1124_v62 = vpop.f32.mrf.mxu1 }
 0x899   :  { %v1128_v63 = vpack.c.bf16 %v1124_v62, %v1121_v60  ;;  %v5197_v60 = vld [vmem:[#allocation2 + $0x248] sm:$0xff]  }
 0x89a   :  { %v4655_v0 = vpop.f32.mrf.mxu1  ;;  %4729 = vmatpush3.bf16.msra.mxu0 %v5197_v60  ;;  %v4020_v62 = vld [vmem:[#allocation4 + $0x8b] ss:$0 sm:$0xff] }
 0x89b   :  { %4673 = vmatmul.mubr.bf16.vlgmr.msra.gmra.mxu1 %v1128_v63  ;;  %4730 = vmatprep.subr.bf16.mxu0 %v5451_v37 }
 0x89c   :  { %4712 = vmatprep.mubr.msk.bf16.mxu1 %vm5452_vm10, %v5451_v37  ;;  %4697 = vmatpush3.bf16.msra.mxu1 %v5183_v21 }
 0x89d   :  { %4698 = vmatprep.subr.bf16.mxu1 %v5451_v37 }
 0x89e   :  { %4731 = vmatpush3.bf16.msra.mxu0 %v5198_v61 }
 0x89f   :  { %4756 = vmatprep.subr.bf16.mxu0 %v5451_v37 }
 0x8a0   :  { %4699 = vmatpush3.bf16.msra.mxu1 %v5184_v22 }
 0x8a1   :  { %4700 = vmatprep.subr.bf16.mxu1 %v5451_v37 }
 0x8a4   :  { %4701 = vmatpush3.bf16.msra.mxu1 %v5185_v23 }
 0x8a5   :  { %4702 = vmatprep.subr.bf16.mxu1 %v5451_v37 }
 0x95b   :  { %v1227_v1 = vpop.f32.mrf.mxu1 }
 0x95c   :  { %v1317_v3 = vadd.f32 %v5655_v25, %v1227_v1  ;;  %v5189_v25 = vld [vmem:[#allocation2 + $0x208] sm:$0xff]  }
 0x95d   :  { %v4674_v4 = vpop.f32.mrf.mxu1 }
 0x95e   :  { %v1328_v6 = vadd.f32 %v4017_v2, %v1317_v3 }
 0x95f   :  { %v1230_v8 = vpop.f32.mrf.mxu1 }
 0x960   :  { %v1320_v9 = vadd.f32 %v5657_v27, %v1230_v8  ;;  %v1330_v11 = vadd.f32 %v1328_v6, %v5560_v17  ;;  %v5186_v17 = vld [vmem:[#allocation2 + $0x220] sm:$0xff]  }
 0x961   :  { %v4675_v13 = vpop.f32.mrf.mxu1  ;;  %4703 = vmatpush3.bf16.msra.mxu1 %v5186_v17 }
 0x962   :  { %v1329_v14 = vadd.f32 %v4017_v2, %v1320_v9  ;;  %1332 = vadd.xlane.f32.xlu1 %v1330_v11  ;;  %v1338_v15 = vmul.f32 %v1330_v11, %v1330_v11  ;;  %4704 = vmatprep.subr.bf16.mxu1 %v5451_v37 }
 0x964   :  { %v1331_v16 = vadd.f32 %v1329_v14, %v5562_v18  ;;  %v5188_v18 = vld [vmem:[#allocation2 + $0x210] sm:$0xff]  }
 0x965   :  { %4705 = vmatpush3.bf16.msra.mxu1 %v5187_v24 }
 0x966   :  { %1340 = vadd.xlane.f32.xlu1 %v1338_v15  ;;  %1334 = vadd.xlane.f32.xlu0 %v1331_v16  ;;  %v1339_v19 = vmul.f32 %v1331_v16, %v1331_v16 }
 0x967   :  { %4706 = vmatprep.subr.bf16.mxu1 %v5451_v37 }
 0x969   :  { %4707 = vmatpush3.bf16.msra.mxu1 %v5188_v18 }
 0x96a   :  { %1342 = vadd.xlane.f32.xlu0 %v1339_v19  ;;  %4708 = vmatprep.subr.bf16.mxu1 %v5451_v37 }
 0x96d   :  { %4709 = vmatpush3.bf16.msra.mxu1 %v5189_v25 }
 0x96e   :  { %4710 = vmatprep.subr.bf16.mxu1 %v5451_v37 }
 0x971   :  { %4711 = vmatpush3.bf16.msra.mxu1 %v5190_v26 }
 0x972   :  { %4736 = vmatprep.subr.bf16.mxu1 %v5451_v37 }
 0x9eb   :  { %v1333_v27 = vpop.xlane.xlu1 %1332 }
 0x9ec   :  { %v1336_v28 = vmul.f32 0.03125, %v1333_v27 }
 0x9ee   :  { %v1346_v31 = vmul.f32 %v1336_v28, %v1336_v28  ;;  %v1356_v5 = vsub.f32 %v1330_v11, %v1336_v28 }
 0x9ef   :  { %v1341_v29 = vpop.xlane.xlu1 %1340  ;;  %v1335_v30 = vpop.xlane.xlu0 %1334 }
 0x9f0   :  { %v1344_v32 = vmul.f32 0.03125, %v1341_v29  ;;  %v1337_v33 = vmul.f32 0.03125, %v1335_v30  ;;  %v4029_v29 = vld [vmem:[#allocation4 + $0x8c] ss:$0 sm:$0xff] }
 0x9f2   :  { %v1348_v34 = vsub.f32 %v1344_v32, %v1346_v31  ;;  %v1347_v38 = vmul.f32 %v1337_v33, %v1337_v33  ;;  %v1357_v10 = vsub.f32 %v1331_v16, %v1337_v33 }
 0x9f3   :  { %v1343_v35 = vpop.xlane.xlu0 %1342 }
 0x9f4   :  { %v1350_v36 = vmax.f32 %v1348_v34, 0.0  ;;  %v1345_v39 = vmul.f32 0.03125, %v1343_v35 }
 0x9f6   :  { %v1352_v40 = vadd.f32 1e-12, %v1350_v36  ;;  %v1349_v41 = vsub.f32 %v1345_v39, %v1347_v38 }
 0x9f8   :  { %5355 = vrsqrt.f32 %v1352_v40  ;;  %v1351_v42 = vmax.f32 %v1349_v41, 0.0  ;;  %v5199_v41 = vld [vmem:[#allocation2 + $0x2b8] sm:$0xff]  }
 0x9fa   :  { %v1353_v43 = vadd.f32 1e-12, %v1351_v42  ;;  %v5200_v42 = vld [vmem:[#allocation2 + $0x338] sm:$0xff]  }
 0x9fc   :  { %5357 = vrsqrt.f32 %v1353_v43  ;;  %v5201_v43 = vld [vmem:[#allocation2 + $0x2b0] sm:$0xff]  }
 0xa05   :  { %v5356_v44 = vpop.eup %5355 }
 0xa06   :  { %v1358_v45 = vmul.f32 %v5356_v44, %v1356_v5  ;;  %v5202_v5 = vld [vmem:[#allocation2 + $0x330] sm:$0xff]   ;;  %v5203_v44 = vld [vmem:[#allocation2 + $0x2a8] sm:$0xff]  }
 0xa08   :  { %v1365_v49 = vmul.f32 %v4018_v46, %v1358_v45  ;;  %v5204_v45 = vld [vmem:[#allocation2 + $0x328] sm:$0xff]  }
 0xa09   :  { %v5358_v47 = vpop.eup %5357 }
 0xa0a   :  { %v1359_v48 = vmul.f32 %v5358_v47, %v1357_v10  ;;  %v5690_v52 = vadd.f32 %v4019_v50, %v1365_v49  ;;  %v5206_v10 = vld [vmem:[#allocation2 + $0x320] sm:$0xff]   ;;  %v5207_v47 = vld [vmem:[#allocation2 + $0x298] sm:$0xff]   ;;  %v5209_v49 = vld [vmem:[#allocation2 + $0x290] sm:$0xff]  }
 0xa0c   :  { %v1366_v51 = vmul.f32 %v4018_v46, %v1359_v48  ;;  %v5205_v46 = vld [vmem:[#allocation2 + $0x2a0] sm:$0xff]   ;;  %v5208_v48 = vld [vmem:[#allocation2 + $0x318] sm:$0xff]  }
 0xa0e   :  { %v5692_v53 = vadd.f32 %v4019_v50, %v1366_v51  ;;  %v5210_v50 = vld [vmem:[#allocation2 + $0x310] sm:$0xff]   ;;  %v5211_v51 = vld [vmem:[#allocation2 + $0x288] sm:$0xff]  }
 0xa10   :  { %v1374_v54 = vpack.c.bf16 %v5692_v53, %v5690_v52 }
 0xa12   :  { %4713 = vmatmul.mubr.bf16.vlgmr.msra.gmra.mxu1 %v1374_v54  ;;  %v5214_v54 = vld [vmem:[#allocation2 + $0x300] sm:$0xff]  }
 0xa13   :  { %4752 = vmatprep.mubr.msk.bf16.mxu1 %vm5452_vm10, %v5451_v37  ;;  %4737 = vmatpush3.bf16.msra.mxu1 %v5199_v41 }
 0xa14   :  { %4738 = vmatprep.subr.bf16.mxu1 %v5451_v37 }
 0xa17   :  { %4739 = vmatpush3.bf16.msra.mxu1 %v5201_v43  ;;  %v4049_v43 = vld [vmem:[#allocation4 + $0x91] ss:$0 sm:$0xff] }
 0xa18   :  { %4740 = vmatprep.subr.bf16.mxu1 %v5451_v37 }
 0xa1b   :  { %4741 = vmatpush3.bf16.msra.mxu1 %v5203_v44 }
 0xa1c   :  { %4742 = vmatprep.subr.bf16.mxu1 %v5451_v37 }
 0xa1f   :  { %4743 = vmatpush3.bf16.msra.mxu1 %v5205_v46 }
 0xa20   :  { %4744 = vmatprep.subr.bf16.mxu1 %v5451_v37 }
 0xa23   :  { %4745 = vmatpush3.bf16.msra.mxu1 %v5207_v47 }
 0xa24   :  { %4746 = vmatprep.subr.bf16.mxu1 %v5451_v37 }
 0xa27   :  { %4747 = vmatpush3.bf16.msra.mxu1 %v5209_v49 }
 0xa28   :  { %4748 = vmatprep.subr.bf16.mxu1 %v5451_v37 }
 0xa2b   :  { %4749 = vmatpush3.bf16.msra.mxu1 %v5211_v51  ;;  %v4040_v51 = vld [vmem:[#allocation4 + $0x8f] ss:$0 sm:$0xff] }
 0xa2c   :  { %4750 = vmatprep.subr.bf16.mxu1 %v5451_v37 }
 0xad2   :  { %v1478_v63 = vpop.f32.mrf.mxu1 }
 0xad3   :  { %v1479_v0 = vadd.f32 %v4020_v62, %v1478_v63 }
 0xad4   :  { %v4714_v1 = vpop.f32.mrf.mxu1 }
 0xad5   :  { %v1487_v2 = vmul.f32 0.044715, %v1479_v0  ;;  %v1485_v24 = vmul.f32 0.5, %v1479_v0 }
 0xad6   :  { %v1481_v3 = vpop.f32.mrf.mxu1 }
 0xad7   :  { %v1489_v4 = vmul.f32 %v1487_v2, %v1479_v0  ;;  %v1482_v6 = vadd.f32 %v4020_v62, %v1481_v3 }
 0xad8   :  { %v4715_v8 = vpop.f32.mrf.mxu1 }
 0xad9   :  { %v1491_v9 = vmul.f32 %v1489_v4, %v1479_v0  ;;  %v1488_v11 = vmul.f32 0.044715, %v1482_v6  ;;  %v1486_v18 = vmul.f32 0.5, %v1482_v6 }
 0xadb   :  { %v1493_v13 = vadd.f32 %v1491_v9, %v1479_v0  ;;  %v1490_v14 = vmul.f32 %v1488_v11, %v1482_v6 }
 0xadd   :  { %v1495_v15 = vmul.f32 0.7978846, %v1493_v13  ;;  %v1492_v16 = vmul.f32 %v1490_v14, %v1482_v6  ;;  %v4038_v13 = vld [vmem:[#allocation4 + $0x8d] ss:$0 sm:$0xff] }
 0xadf   :  { %5359 = vtanh.f32 %v1495_v15  ;;  %v1494_v19 = vadd.f32 %v1492_v16, %v1482_v6 }
 0xae1   :  { %v1496_v21 = vmul.f32 0.7978846, %v1494_v19 }
 0xae3   :  { %5361 = vtanh.f32 %v1496_v21  ;;  %v4039_v21 = vld [vmem:[#allocation4 + $0x8e] ss:$0 sm:$0xff] }
 0xaec   :  { %v5360_v22 = vpop.eup %5359 }
 0xaed   :  { %v1499_v23 = vadd.f32 1.0, %v5360_v22 }
 0xaef   :  { %v1501_v26 = vmul.f32 %v1499_v23, %v1485_v24  ;;  %v5215_v24 = vld [vmem:[#allocation2 + $0x3b8] sm:$0xff]  }
 0xaf0   :  { %v5362_v17 = vpop.eup %5361 }
 0xaf1   :  { %v1500_v25 = vadd.f32 1.0, %v5362_v17 }
 0xaf3   :  { %v1502_v27 = vmul.f32 %v1500_v25, %v1486_v18  ;;  %v5216_v25 = vld [vmem:[#allocation2 + $0x3b0] sm:$0xff]  }
 0xaf5   :  { %v1503_v28 = vpack.c.bf16 %v1502_v27, %v1501_v26  ;;  %v5217_v26 = vld [vmem:[#allocation2 + $0x3a8] sm:$0xff]   ;;  %v5218_v27 = vld [vmem:[#allocation2 + $0x3a0] sm:$0xff]  }
 0xaf7   :  { %4733 = vmatmul.mubr.bf16.vlgmr.msra.gmra.mxu0 %v1503_v28  ;;  %v5219_v28 = vld [vmem:[#allocation2 + $0x398] sm:$0xff]  }
 0xaf8   :  { %4772 = vmatprep.mubr.msk.bf16.mxu0 %vm5452_vm10, %v5451_v37  ;;  %4757 = vmatpush3.bf16.msra.mxu0 %v5200_v42 }
 0xaf9   :  { %4758 = vmatprep.subr.bf16.mxu0 %v5451_v37 }
 0xafc   :  { %4759 = vmatpush3.bf16.msra.mxu0 %v5202_v5 }
 0xafd   :  { %4760 = vmatprep.subr.bf16.mxu0 %v5451_v37 }
 0xb00   :  { %4761 = vmatpush3.bf16.msra.mxu0 %v5204_v45 }
 0xb01   :  { %4762 = vmatprep.subr.bf16.mxu0 %v5451_v37 }
 0xb04   :  { %4763 = vmatpush3.bf16.msra.mxu0 %v5206_v10 }
 0xb05   :  { %4764 = vmatprep.subr.bf16.mxu0 %v5451_v37 }
 0xb08   :  { %4765 = vmatpush3.bf16.msra.mxu0 %v5208_v48 }
 0xb09   :  { %4766 = vmatprep.subr.bf16.mxu0 %v5451_v37 }
 0xb0c   :  { %4767 = vmatpush3.bf16.msra.mxu0 %v5210_v50 }
 0xb0d   :  { %4768 = vmatprep.subr.bf16.mxu0 %v5451_v37 }
 0xbb7   :  { %v1607_v30 = vpop.f32.mrf.mxu0 }
 0xbb8   :  { %v1608_v31 = vadd.f32 %v4029_v29, %v1607_v30  ;;  %v5221_v30 = vld [vmem:[#allocation2 + $0x388] sm:$0xff]  }
 0xbb9   :  { %v4734_v32 = vpop.f32.mrf.mxu0 }
 0xbba   :  { %v5709_v33 = vadd.f32 %v1608_v31, %v5690_v52  ;;  %v5212_v52 = vld [vmem:[#allocation2 + $0x308] sm:$0xff]   ;;  %v5222_v31 = vld [vmem:[#allocation2 + $0x380] sm:$0xff]   ;;  %v5223_v32 = vld [vmem:[#allocation2 + $0x378] sm:$0xff]  }
 0xbbb   :  { %v1610_v34 = vpop.f32.mrf.mxu0  ;;  %4769 = vmatpush3.bf16.msra.mxu0 %v5212_v52 }
 0xbbc   :  { %v1611_v35 = vadd.f32 %v4029_v29, %v1610_v34  ;;  %1616 = vadd.xlane.f32.xlu1 %v5709_v33  ;;  %v1622_v39 = vmul.f32 %v5709_v33, %v5709_v33  ;;  %4770 = vmatprep.subr.bf16.mxu0 %v5451_v37  ;;  %v5220_v29 = vld [vmem:[#allocation2 + $0x390] sm:$0xff]   ;;  %v5225_v34 = vld [vmem:[#allocation2 + $0x368] sm:$0xff]  }
 0xbbd   :  { %v4735_v36 = vpop.f32.mrf.mxu0 }
 0xbbe   :  { %v5713_v38 = vadd.f32 %v1611_v35, %v5692_v53  ;;  %v5213_v53 = vld [vmem:[#allocation2 + $0x280] sm:$0xff]   ;;  %v5227_v36 = vld [vmem:[#allocation2 + $0x358] sm:$0xff]  }
 0xbbf   :  { %4751 = vmatpush3.bf16.msra.mxu1 %v5213_v53  ;;  %4771 = vmatpush3.bf16.msra.mxu0 %v5214_v54  ;;  %v5226_v35 = vld [vmem:[#allocation2 + $0x360] sm:$0xff]  }
 0xbc0   :  { %1624 = vadd.xlane.f32.xlu1 %v1622_v39  ;;  %1618 = vadd.xlane.f32.xlu0 %v5713_v38  ;;  %v1623_v40 = vmul.f32 %v5713_v38, %v5713_v38  ;;  %v5229_v39 = vld [vmem:[#allocation2 + $0x348] sm:$0xff]  }
 0xbc1   :  { %4776 = vmatprep.subr.bf16.mxu1 %v5451_v37  ;;  %4796 = vmatprep.subr.bf16.mxu0 %v5451_v37 }
 0xbc4   :  { %1626 = vadd.xlane.f32.xlu0 %v1623_v40  ;;  %v5230_v40 = vld [vmem:[#allocation2 + $0x340] sm:$0xff]  }
 0xc45   :  { %v1617_v55 = vpop.xlane.xlu1 %1616 }
 0xc46   :  { %v1620_v56 = vmul.f32 0.03125, %v1617_v55 }
 0xc48   :  { %v1630_v20 = vmul.f32 %v1620_v56, %v1620_v56  ;;  %v1640_v8 = vsub.f32 %v5709_v33, %v1620_v56  ;;  %v5224_v33 = vld [vmem:[#allocation2 + $0x370] sm:$0xff]  }
 0xc49   :  { %v1625_v57 = vpop.xlane.xlu1 %1624  ;;  %v1619_v58 = vpop.xlane.xlu0 %1618  ;;  %v4058_v56 = vld [vmem:[#allocation4 + $0x93] ss:$0 sm:$0xff] }
 0xc4a   :  { %v1628_v59 = vmul.f32 0.03125, %v1625_v57  ;;  %v1621_v60 = vmul.f32 0.03125, %v1619_v58 }
 0xc4c   :  { %v1632_v61 = vsub.f32 %v1628_v59, %v1630_v20  ;;  %v1631_v0 = vmul.f32 %v1621_v60, %v1621_v60  ;;  %v1641_v14 = vsub.f32 %v5713_v38, %v1621_v60  ;;  %v5228_v38 = vld [vmem:[#allocation2 + $0x350] sm:$0xff]  }
 0xc4d   :  { %v1627_v62 = vpop.xlane.xlu0 %1626 }
 0xc4e   :  { %v1634_v63 = vmax.f32 %v1632_v61, 0.0  ;;  %v1629_v1 = vmul.f32 0.03125, %v1627_v62 }
 0xc50   :  { %v1636_v2 = vadd.f32 1e-12, %v1634_v63  ;;  %v1633_v3 = vsub.f32 %v1629_v1, %v1631_v0  ;;  %v4077_v63 = vld [vmem:[#allocation4 + $0x92] ss:$0 sm:$0xff] }
 0xc52   :  { %5363 = vrsqrt.f32 %v1636_v2  ;;  %v1635_v4 = vmax.f32 %v1633_v3, 0.0 }
 0xc54   :  { %v1637_v6 = vadd.f32 1e-12, %v1635_v4 }
 0xc56   :  { %5365 = vrsqrt.f32 %v1637_v6 }
 0xc5f   :  { %v5364_v9 = vpop.eup %5363 }
 0xc60   :  { %v1642_v11 = vmul.f32 %v5364_v9, %v1640_v8  ;;  %v5782_v9 = vld [vmem:[%s5973_s3] sm:$0xff] }
 0xc62   :  { %v1649_v16 = vmul.f32 %v4038_v13, %v1642_v11 }
 0xc63   :  { %v5366_v15 = vpop.eup %5365 }
 0xc64   :  { %v1643_v19 = vmul.f32 %v5366_v15, %v1641_v14  ;;  %v5738_v23 = vadd.f32 %v4039_v21, %v1649_v16  ;;  %v5789_v16 = vld [vmem:[%s5973_s3 + $0x8] sm:$0xff] }
 0xc66   :  { %v1650_v22 = vmul.f32 %v4038_v13, %v1643_v19 }
 0xc68   :  { %v5740_v17 = vadd.f32 %v4039_v21, %v1650_v22 }
 0xc6a   :  { %v5744_v18 = vpack.c.bf16 %v5740_v17, %v5738_v23 }
 0xc6c   :  { %4753 = vmatmul.mubr.bf16.vlgmr.msra.gmra.mxu1 %v5744_v18  ;;  %4773 = vmatmul.mubr.bf16.vlgmr.msra.gmra.mxu0 %v5744_v18 }
 0xc6d   :  { %4777 = vmatpush3.bf16.msra.mxu1 %v5215_v24  ;;  %4792 = vmatprep.mubr.msk.bf16.mxu1 %vm5452_vm10, %v5451_v37 }
 0xc6e   :  { %4778 = vmatprep.subr.bf16.mxu1 %v5451_v37  ;;  %4798 = vmatprep.mubr.msk.bf16.mxu0 %vm5452_vm10, %v5451_v37 }
 0xc71   :  { %4779 = vmatpush3.bf16.msra.mxu1 %v5216_v25 }
 0xc72   :  { %4780 = vmatprep.subr.bf16.mxu1 %v5451_v37 }
 0xc75   :  { %4781 = vmatpush3.bf16.msra.mxu1 %v5217_v26 }
 0xc76   :  { %4782 = vmatprep.subr.bf16.mxu1 %v5451_v37 }
 0xc79   :  { %4783 = vmatpush3.bf16.msra.mxu1 %v5218_v27 }
 0xc7a   :  { %4784 = vmatprep.subr.bf16.mxu1 %v5451_v37 }
 0xc7d   :  { %4785 = vmatpush3.bf16.msra.mxu1 %v5219_v28 }
 0xc7e   :  { %4786 = vmatprep.subr.bf16.mxu1 %v5451_v37 }
 0xc81   :  { %4787 = vmatpush3.bf16.msra.mxu1 %v5220_v29 }
 0xc82   :  { %4788 = vmatprep.subr.bf16.mxu1 %v5451_v37 }
 0xc85   :  { %4789 = vmatpush3.bf16.msra.mxu1 %v5221_v30 }
 0xc86   :  { %4790 = vmatprep.subr.bf16.mxu1 %v5451_v37 }
 0xc89   :  { %4791 = vmatpush3.bf16.msra.mxu1 %v5222_v31 }
 0xc8a   :  { %4828 = vmatprep.subr.bf16.mxu1 %v5451_v37 }
 0xc8c   :  { %4793 = vmatmul.mubr.bf16.vlgmr.msra.gmra.mxu1 %v5744_v18 }
 0xc8d   :  { %4829 = vmatpush3.bf16.msra.mxu1 %v5223_v32  ;;  %4844 = vmatprep.mubr.msk.bf16.mxu1 %vm5452_vm10, %v5451_v37 }
 0xc8e   :  { %4830 = vmatprep.subr.bf16.mxu1 %v5451_v37 }
 0xc91   :  { %4831 = vmatpush3.bf16.msra.mxu1 %v5224_v33 }
 0xc92   :  { %4832 = vmatprep.subr.bf16.mxu1 %v5451_v37 }
 0xc95   :  { %4833 = vmatpush3.bf16.msra.mxu1 %v5225_v34 }
 0xc96   :  { %4834 = vmatprep.subr.bf16.mxu1 %v5451_v37 }
 0xc99   :  { %4835 = vmatpush3.bf16.msra.mxu1 %v5226_v35 }
 0xc9a   :  { %4836 = vmatprep.subr.bf16.mxu1 %v5451_v37 }
 0xc9d   :  { %4837 = vmatpush3.bf16.msra.mxu1 %v5227_v36 }
 0xc9e   :  { %4838 = vmatprep.subr.bf16.mxu1 %v5451_v37 }
 0xca1   :  { %4839 = vmatpush3.bf16.msra.mxu1 %v5228_v38 }
 0xca2   :  { %4840 = vmatprep.subr.bf16.mxu1 %v5451_v37 }
 0xca5   :  { %4841 = vmatpush3.bf16.msra.mxu1 %v5229_v39 }
 0xca6   :  { %4842 = vmatprep.subr.bf16.mxu1 %v5451_v37 }
 0xca9   :  { %4843 = vmatpush3.bf16.msra.mxu1 %v5230_v40 }
 0xcaa   :  { %4868 = vmatprep.subr.bf16.mxu1 %v5451_v37 }
 0xcac   :  { %4845 = vmatmul.mubr.bf16.vlgmr.msra.gmra.mxu1 %v5744_v18 }
 0xcad   :  { %4870 = vmatprep.mubr.msk.bf16.mxu1 %vm5452_vm10, %v5451_v37 }
 0xd2c   :  { %v1762_v41 = vpop.f32.mrf.mxu1  ;;  %v1873_v42 = vpop.f32.mrf.mxu0 }
 0xd2d   :  { %v1874_v10 = vadd.f32 %v4049_v43, %v1873_v42  ;;  %v1763_v53 = vadd.f32 %v4040_v51, %v1762_v41  ;;  %v5231_v41 = vld [vmem:[#allocation2 + $0x2f8] sm:$0xff]  }
 0xd2e   :  { %v4754_v5 = vpop.f32.mrf.mxu1  ;;  %v4774_v44 = vpop.f32.mrf.mxu0 }
 0xd2f   :  { %v5233_v5 = vld [vmem:[#allocation2 + $0x2e8] sm:$0xff]   ;;  %v5234_v44 = vld [vmem:[#allocation2 + $0x2e0] sm:$0xff]  }
 0xd30   :  { %v1765_v45 = vpop.f32.mrf.mxu1  ;;  %v1876_v46 = vpop.f32.mrf.mxu0 }
 0xd31   :  { %v1877_v47 = vadd.f32 %v4049_v43, %v1876_v46  ;;  %v1766_v52 = vadd.f32 %v4040_v51, %v1765_v45  ;;  %v5232_v43 = vld [vmem:[#allocation2 + $0x2f0] sm:$0xff]   ;;  %v5235_v45 = vld [vmem:[#allocation2 + $0x2d8] sm:$0xff]   ;;  %v5242_v51 = vld [vmem:[#allocation2 + $0x3e0] sm:$0xff]  }
 0xd32   :  { %v4755_v48 = vpop.f32.mrf.mxu1  ;;  %v4775_v49 = vpop.f32.mrf.mxu0  ;;  %v5236_v46 = vld [vmem:[#allocation2 + $0x2d0] sm:$0xff]  }
 0xd33   :  { %v1880_v50 = vpack.c.bf16 %v1877_v47, %v1874_v10  ;;  %v1769_v54 = vpack.c.bf16 %v1766_v52, %v1763_v53  ;;  %v5237_v10 = vld [vmem:[#allocation2 + $0x2c8] sm:$0xff]   ;;  %v5238_v47 = vld [vmem:[#allocation2 + $0x2c0] sm:$0xff]   ;;  %v5239_v48 = vld [vmem:[#allocation2 + $0x3f8] sm:$0xff]  }
 0xd34   :  { %v5240_v49 = vld [vmem:[#allocation2 + $0x3f0] sm:$0xff]   ;;  %v5243_v52 = vld [vmem:[#allocation2 + $0x3d8] sm:$0xff]  }
 0xd35   :  { %4797 = vmatpush3.bf16.xpose.msra.mxu0 %v1880_v50  ;;  %v5241_v50 = vld [vmem:[#allocation2 + $0x3e8] sm:$0xff]   ;;  %v5244_v53 = vld [vmem:[#allocation2 + $0x3d0] sm:$0xff]  }
 0xd36   :  { %4802 = vmatprep.subr.bf16.mxu0 %v5451_v37 }
 0xd3c   :  { %4799 = vmatmul.mubr.bf16.vlgmr.msra.gmra.mxu0 %v1769_v54  ;;  %v5245_v54 = vld [vmem:[#allocation2 + $0x3c8] sm:$0xff]  }
 0xd3d   :  { %4804 = vmatprep.mubr.msk.bf16.mxu0 %vm5452_vm10, %v5451_v37 }
 0xd4c   :  { %v1984_v55 = vpop.f32.mrf.mxu1 }
 0xd4d   :  { %v1985_v20 = vadd.f32 %v4058_v56, %v1984_v55  ;;  %v5246_v55 = vld [vmem:[#allocation2 + $0x3c0] sm:$0xff]  }
 0xd4e   :  { %v4794_v57 = vpop.f32.mrf.mxu1 }
 0xd4f   :  { %v5248_v57 = vld [vmem:[#allocation2 + $0x430] sm:$0xff]  }
 0xd50   :  { %v1987_v58 = vpop.f32.mrf.mxu1 }
 0xd51   :  { %v1988_v59 = vadd.f32 %v4058_v56, %v1987_v58  ;;  %v5247_v56 = vld [vmem:[#allocation2 + $0x438] sm:$0xff]   ;;  %v5249_v58 = vld [vmem:[#allocation2 + $0x428] sm:$0xff]  }
 0xd52   :  { %v4795_v60 = vpop.f32.mrf.mxu1 }
 0xd53   :  { %v1991_v61 = vpack.c.bf16 %v1988_v59, %v1985_v20  ;;  %v5250_v20 = vld [vmem:[#allocation2 + $0x420] sm:$0xff]   ;;  %v5251_v59 = vld [vmem:[#allocation2 + $0x418] sm:$0xff]   ;;  %v5253_v60 = vld [vmem:[#allocation2 + $0x408] sm:$0xff]  }
 0xd55   :  { %4803 = vmatpush3.bf16.msra.mxu0 %v1991_v61  ;;  %v5254_v61 = vld [vmem:[#allocation2 + $0x400] sm:$0xff]  }
 0xd56   :  { %4808 = vmatprep.subr.bf16.mxu0 %v5451_v37 }
 0xd6c   :  { %v2331_v62 = vpop.f32.mrf.mxu1 }
 0xd6d   :  { %v2332_v2 = vadd.f32 %v4077_v63, %v2331_v62 }
 0xd6e   :  { %v4846_v0 = vpop.f32.mrf.mxu1 }
 0xd70   :  { %v2334_v1 = vpop.f32.mrf.mxu1 }
 0xd71   :  { %v2335_v3 = vadd.f32 %v4077_v63, %v2334_v1 }
 0xd72   :  { %v4847_v4 = vpop.f32.mrf.mxu1 }
 0xd73   :  { %v2338_v6 = vpack.c.bf16 %v2335_v3, %v2332_v2  ;;  %v4068_v4 = vld [vmem:[#allocation4 + $0x90] ss:$0 sm:$0xff] }
 0xd75   :  { %4869 = vmatpush3.bf16.xpose.msra.mxu1 %v2338_v6 }
 0xd76   :  { %4874 = vmatprep.subr.bf16.mxu1 %v5451_v37 }
 0xdfc   :  { %v2026_v8 = vpop.f32.mrf.mxu0 }
 0xdfd   :  { %v2027_v11 = vadd.f32 %v5782_v9, %v2026_v8 }
 0xdfe   :  { %v4800_v13 = vpop.f32.mrf.mxu0 }
 0xdff   :  { %v2033_v14 = vsel %vm602_vm11, %v2027_v11, -inf }
 0xe00   :  { %2034 = vmax.xlane.f32.xlu1 %v2033_v14  ;;  %v2029_v15 = vpop.f32.mrf.mxu0 }
 0xe01   :  { %v2030_v19 = vadd.f32 %v5789_v16, %v2029_v15 }
 0xe02   :  { %v4801_v21 = vpop.f32.mrf.mxu0 }
 0xe03   :  { %v2036_v22 = vsel %vm602_vm11, %v2030_v19, -inf  ;;  %v4086_v21 = vld [vmem:[#allocation4 + $0x94] ss:$0 sm:$0xff] }
 0xe04   :  { %2037 = vmax.xlane.f32.xlu0 %v2036_v22 }
 0xe89   :  { %v2035_v24 = vpop.xlane.xlu1 %2034 }
 0xe8a   :  { %v2039_v25 = vsub.f32 %v2027_v11, %v2035_v24 }
 0xe8c   :  { %v2041_v26 = vmul.f32 1.442695, %v2039_v25 }
 0xe8d   :  { %v2038_v27 = vpop.xlane.xlu0 %2037 }
 0xe8e   :  { %5367 = vpow2.f32 %v2041_v26  ;;  %v2040_v28 = vsub.f32 %v2030_v19, %v2038_v27 }
 0xe90   :  { %v2043_v29 = vmul.f32 1.442695, %v2040_v28 }
 0xe92   :  { %5369 = vpow2.f32 %v2043_v29 }
 0xe9b   :  { %v5368_v30 = vpop.eup %5367 }
 0xe9c   :  { %v2045_v31 = vsel %vm602_vm11, %v5368_v30, 0.0 }
 0xe9d   :  { %2046 = vadd.xlane.f32.xlu1 %v2045_v31 }
 0xe9f   :  { %v5370_v32 = vpop.eup %5369 }
 0xea0   :  { %v2048_v33 = vsel %vm602_vm11, %v5370_v32, 0.0 }
 0xea1   :  { %2049 = vadd.xlane.f32.xlu0 %v2048_v33 }
 0xf26   :  { %v2047_v34 = vpop.xlane.xlu1 %2046 }
 0xf27   :  { %5371 = vrcp.f32 %v2047_v34 }
 0xf2a   :  { %v2050_v35 = vpop.xlane.xlu0 %2049 }
 0xf2b   :  { %5373 = vrcp.f32 %v2050_v35 }
 0xf34   :  { %v5372_v36 = vpop.eup %5371 }
 0xf35   :  { %v2053_v39 = vmul.f32 %v5372_v36, %v5368_v30 }
 0xf38   :  { %v5374_v38 = vpop.eup %5373 }
 0xf39   :  { %v2054_v40 = vmul.f32 %v5374_v38, %v5370_v32 }
 0xf3b   :  { %v2055_v42 = vpack.c.bf16 %v2054_v40, %v2053_v39 }
 0xf3d   :  { %4805 = vmatmul.mubr.msk.bf16.vlgmr.msra.gmra.mxu0 %vm602_vm11, %v2055_v42 }
 0xf3e   :  { %4809 = vmatpush3.bf16.msra.mxu0 %v5231_v41  ;;  %4824 = vmatprep.mubr.msk.bf16.mxu0 %vm5452_vm10, %v5451_v37 }
 0xf3f   :  { %4810 = vmatprep.subr.bf16.mxu0 %v5451_v37 }
 0xf42   :  { %4811 = vmatpush3.bf16.msra.mxu0 %v5232_v43 }
 0xf43   :  { %4812 = vmatprep.subr.bf16.mxu0 %v5451_v37 }
 0xf46   :  { %4813 = vmatpush3.bf16.msra.mxu0 %v5233_v5 }
 0xf47   :  { %4814 = vmatprep.subr.bf16.mxu0 %v5451_v37 }
 0xf4a   :  { %4815 = vmatpush3.bf16.msra.mxu0 %v5234_v44 }
 0xf4b   :  { %4816 = vmatprep.subr.bf16.mxu0 %v5451_v37 }
 0xf4e   :  { %4817 = vmatpush3.bf16.msra.mxu0 %v5235_v45 }
 0xf4f   :  { %4818 = vmatprep.subr.bf16.mxu0 %v5451_v37 }
 0xf52   :  { %4819 = vmatpush3.bf16.msra.mxu0 %v5236_v46 }
 0xf53   :  { %4820 = vmatprep.subr.bf16.mxu0 %v5451_v37 }
 0xf56   :  { %4821 = vmatpush3.bf16.msra.mxu0 %v5237_v10 }
 0xf57   :  { %4822 = vmatprep.subr.bf16.mxu0 %v5451_v37 }
 0xf5a   :  { %4823 = vmatpush3.bf16.msra.mxu0 %v5238_v47 }
 0xf5b   :  { %4848 = vmatprep.subr.bf16.mxu0 %v5451_v37 }
 0xf5d   :  { %4825 = vmatmul.mubr.bf16.vlgmr.msra.gmra.mxu0 %v5744_v18 }
 0xf5e   :  { %4849 = vmatpush3.bf16.msra.mxu0 %v5239_v48  ;;  %4864 = vmatprep.mubr.msk.bf16.mxu0 %vm5452_vm10, %v5451_v37 }
 0xf5f   :  { %4850 = vmatprep.subr.bf16.mxu0 %v5451_v37 }
 0xf62   :  { %4851 = vmatpush3.bf16.msra.mxu0 %v5240_v49 }
 0xf63   :  { %4852 = vmatprep.subr.bf16.mxu0 %v5451_v37 }
 0xf66   :  { %4853 = vmatpush3.bf16.msra.mxu0 %v5241_v50 }
 0xf67   :  { %4854 = vmatprep.subr.bf16.mxu0 %v5451_v37 }
 0xf6a   :  { %4855 = vmatpush3.bf16.msra.mxu0 %v5242_v51 }
 0xf6b   :  { %4856 = vmatprep.subr.bf16.mxu0 %v5451_v37 }
 0xf6e   :  { %4857 = vmatpush3.bf16.msra.mxu0 %v5243_v52 }
 0xf6f   :  { %4858 = vmatprep.subr.bf16.mxu0 %v5451_v37 }
 0xf72   :  { %4859 = vmatpush3.bf16.msra.mxu0 %v5244_v53 }
 0xf73   :  { %4860 = vmatprep.subr.bf16.mxu0 %v5451_v37 }
 0xf76   :  { %4861 = vmatpush3.bf16.msra.mxu0 %v5245_v54  ;;  %v5255_v54 = vld [vmem:[#allocation2 + $0x478] sm:$0xff]  }
 0xf77   :  { %4862 = vmatprep.subr.bf16.mxu0 %v5451_v37 }
 0xf7a   :  { %4863 = vmatpush3.bf16.msra.mxu0 %v5246_v55 }
 0xf7b   :  { %4900 = vmatprep.subr.bf16.mxu0 %v5451_v37 }
 0xf7d   :  { %4865 = vmatmul.mubr.bf16.vlgmr.msra.gmra.mxu0 %v5744_v18  ;;  %v5252_v18 = vld [vmem:[#allocation2 + $0x410] sm:$0xff]  }
 0xf7e   :  { %4901 = vmatpush3.bf16.msra.mxu0 %v5247_v56  ;;  %4916 = vmatprep.mubr.msk.bf16.mxu0 %vm5452_vm10, %v5451_v37  ;;  %v5256_v56 = vld [vmem:[#allocation2 + $0x470] sm:$0xff]  }
 0xf7f   :  { %4902 = vmatprep.subr.bf16.mxu0 %v5451_v37 }
 0xf82   :  { %4903 = vmatpush3.bf16.msra.mxu0 %v5248_v57  ;;  %v5257_v57 = vld [vmem:[#allocation2 + $0x468] sm:$0xff]  }
 0xf83   :  { %4904 = vmatprep.subr.bf16.mxu0 %v5451_v37 }
 0xf86   :  { %4905 = vmatpush3.bf16.msra.mxu0 %v5249_v58  ;;  %v5258_v58 = vld [vmem:[#allocation2 + $0x460] sm:$0xff]  }
 0xf87   :  { %4906 = vmatprep.subr.bf16.mxu0 %v5451_v37 }
 0xf8a   :  { %4907 = vmatpush3.bf16.msra.mxu0 %v5250_v20  ;;  %v5259_v20 = vld [vmem:[#allocation2 + $0x458] sm:$0xff]  }
 0xf8b   :  { %4908 = vmatprep.subr.bf16.mxu0 %v5451_v37 }
 0xf8e   :  { %4909 = vmatpush3.bf16.msra.mxu0 %v5251_v59  ;;  %v5260_v59 = vld [vmem:[#allocation2 + $0x450] sm:$0xff]  }
 0xf8f   :  { %4910 = vmatprep.subr.bf16.mxu0 %v5451_v37 }
 0xf92   :  { %4911 = vmatpush3.bf16.msra.mxu0 %v5252_v18  ;;  %v5261_v18 = vld [vmem:[#allocation2 + $0x448] sm:$0xff]  }
 0xf93   :  { %4912 = vmatprep.subr.bf16.mxu0 %v5451_v37 }
 0xf96   :  { %4913 = vmatpush3.bf16.msra.mxu0 %v5253_v60  ;;  %v5262_v60 = vld [vmem:[#allocation2 + $0x440] sm:$0xff]  }
 0xf97   :  { %4914 = vmatprep.subr.bf16.mxu0 %v5451_v37 }
 0xf9a   :  { %4915 = vmatpush3.bf16.msra.mxu0 %v5254_v61 }
 0xf9b   :  { %4940 = vmatprep.subr.bf16.mxu0 %v5451_v37 }
 0xffd   :  { %v2093_v62 = vpop.f32.mrf.mxu0 }
 0xfff   :  { %v4806_v63 = vpop.f32.mrf.mxu0 }
0x1001   :  { %v2096_v0 = vpop.f32.mrf.mxu0 }
0x1002   :  { %v2100_v1 = vpack.c.bf16 %v2096_v0, %v2093_v62 }
0x1003   :  { %v4807_v2 = vpop.f32.mrf.mxu0 }
0x1004   :  { %4917 = vmatmul.mubr.bf16.vlgmr.msra.gmra.mxu0 %v2100_v1 }
0x1005   :  { %4956 = vmatprep.mubr.msk.bf16.mxu0 %vm5452_vm10, %v5451_v37 }
0x101d   :  { %v2220_v3 = vpop.f32.mrf.mxu0 }
0x101e   :  { %v2221_v11 = vadd.f32 %v4068_v4, %v2220_v3  ;;  %v4112_v3 = vld [vmem:[#allocation4 + $0x95] ss:$0 sm:$0xff] }
0x101f   :  { %v4826_v6 = vpop.f32.mrf.mxu0 }
0x1021   :  { %v2223_v8 = vpop.f32.mrf.mxu0 }
0x1022   :  { %v2224_v13 = vadd.f32 %v4068_v4, %v2223_v8 }
0x1023   :  { %v4827_v14 = vpop.f32.mrf.mxu0 }
0x1024   :  { %v2227_v15 = vpack.c.bf16 %v2224_v13, %v2221_v11 }
0x1026   :  { %4871 = vmatmul.mubr.bf16.vlgmr.msra.gmra.mxu1 %v2227_v15 }
0x1027   :  { %4876 = vmatprep.mubr.msk.bf16.mxu1 %vm5452_vm10, %v5451_v37 }
0x103d   :  { %v2442_v19 = vpop.f32.mrf.mxu0 }
0x103e   :  { %v2443_v25 = vadd.f32 %v4086_v21, %v2442_v19 }
0x103f   :  { %v4866_v22 = vpop.f32.mrf.mxu0 }
0x1041   :  { %v2445_v24 = vpop.f32.mrf.mxu0 }
0x1042   :  { %v2446_v26 = vadd.f32 %v4086_v21, %v2445_v24 }
0x1043   :  { %v4867_v27 = vpop.f32.mrf.mxu0 }
0x1044   :  { %v2449_v28 = vpack.c.bf16 %v2446_v26, %v2443_v25  ;;  %v5263_v25 = vld [vmem:[#allocation2 + $0x4b8] sm:$0xff]   ;;  %v5264_v26 = vld [vmem:[#allocation2 + $0x4b0] sm:$0xff]   ;;  %v5265_v27 = vld [vmem:[#allocation2 + $0x4a8] sm:$0xff]  }
0x1046   :  { %4875 = vmatpush3.bf16.msra.mxu1 %v2449_v28  ;;  %v5267_v28 = vld [vmem:[#allocation2 + $0x498] sm:$0xff]  }
0x1047   :  { %4880 = vmatprep.subr.bf16.mxu1 %v5451_v37 }
0x10c4   :  { %v5833_v29 = vpop.f32.mrf.mxu0 }
0x10c6   :  { %v4918_v30 = vpop.f32.mrf.mxu0 }
0x10c7   :  { %v5270_v30 = vld [vmem:[#allocation2 + $0x480] sm:$0xff]  }
0x10c8   :  { %v5835_v31 = vpop.f32.mrf.mxu0 }
0x10ca   :  { %v4919_v32 = vpop.f32.mrf.mxu0 }
0x10e6   :  { %v2484_v33 = vpop.f32.mrf.mxu1 }
0x10e7   :  { %v2485_v34 = vadd.f32 %v5782_v9, %v2484_v33 }
0x10e8   :  { %v4872_v35 = vpop.f32.mrf.mxu1 }
0x10e9   :  { %v2491_v36 = vsel %vm602_vm11, %v2485_v34, -inf }
0x10ea   :  { %2492 = vmax.xlane.f32.xlu1 %v2491_v36  ;;  %v2487_v38 = vpop.f32.mrf.mxu1 }
0x10eb   :  { %v2488_v39 = vadd.f32 %v5789_v16, %v2487_v38 }
0x10ec   :  { %v4873_v40 = vpop.f32.mrf.mxu1 }
0x10ed   :  { %v2494_v41 = vsel %vm602_vm11, %v2488_v39, -inf }
0x10ee   :  { %2495 = vmax.xlane.f32.xlu0 %v2494_v41 }
0x1173   :  { %v2493_v42 = vpop.xlane.xlu1 %2492 }
0x1174   :  { %v2497_v43 = vsub.f32 %v2485_v34, %v2493_v42 }
0x1176   :  { %v2499_v5 = vmul.f32 1.442695, %v2497_v43 }
0x1177   :  { %v2496_v44 = vpop.xlane.xlu0 %2495 }
0x1178   :  { %5375 = vpow2.f32 %v2499_v5  ;;  %v2498_v45 = vsub.f32 %v2488_v39, %v2496_v44 }
0x117a   :  { %v2501_v46 = vmul.f32 1.442695, %v2498_v45 }
0x117c   :  { %5377 = vpow2.f32 %v2501_v46 }
0x1185   :  { %v5376_v9 = vpop.eup %5375 }
0x1186   :  { %v2503_v10 = vsel %vm602_vm11, %v5376_v9, 0.0 }
0x1187   :  { %2504 = vadd.xlane.f32.xlu1 %v2503_v10 }
0x1189   :  { %v5378_v47 = vpop.eup %5377 }
0x118a   :  { %v2506_v48 = vsel %vm602_vm11, %v5378_v47, 0.0 }
0x118b   :  { %2507 = vadd.xlane.f32.xlu0 %v2506_v48  ;;  %v4113_v48 = vld [vmem:[#allocation4 + $0x96] ss:$0 sm:$0xff] }
0x1210   :  { %v2505_v16 = vpop.xlane.xlu1 %2504 }
0x1211   :  { %5379 = vrcp.f32 %v2505_v16 }
0x1214   :  { %v2508_v49 = vpop.xlane.xlu0 %2507 }
0x1215   :  { %5381 = vrcp.f32 %v2508_v49 }
0x121e   :  { %v5380_v50 = vpop.eup %5379 }
0x121f   :  { %v2511_v52 = vmul.f32 %v5380_v50, %v5376_v9 }
0x1222   :  { %v5382_v51 = vpop.eup %5381 }
0x1223   :  { %v2512_v53 = vmul.f32 %v5382_v51, %v5378_v47 }
0x1225   :  { %v2513_v55 = vpack.c.bf16 %v2512_v53, %v2511_v52  ;;  %v4114_v52 = vld [vmem:[#allocation4 + $0x97] ss:$0 sm:$0xff] }
0x1227   :  { %4877 = vmatmul.mubr.msk.bf16.vlgmr.msra.gmra.mxu1 %vm602_vm11, %v2513_v55 }
0x1228   :  { %4881 = vmatpush3.bf16.msra.mxu1 %v5255_v54  ;;  %4896 = vmatprep.mubr.msk.bf16.mxu1 %vm5452_vm10, %v5451_v37 }
0x1229   :  { %4882 = vmatprep.subr.bf16.mxu1 %v5451_v37 }
0x122c   :  { %4883 = vmatpush3.bf16.msra.mxu1 %v5256_v56 }
0x122d   :  { %4884 = vmatprep.subr.bf16.mxu1 %v5451_v37 }
0x1230   :  { %4885 = vmatpush3.bf16.msra.mxu1 %v5257_v57  ;;  %v5271_v57 = vld [vmem:[#allocation2 + $0x4f8] sm:$0xff]  }
0x1231   :  { %4886 = vmatprep.subr.bf16.mxu1 %v5451_v37  ;;  %4941 = vmatpush3.bf16.msra.mxu0 %v5271_v57 }
0x1232   :  { %4942 = vmatprep.subr.bf16.mxu0 %v5451_v37 }
0x1234   :  { %4887 = vmatpush3.bf16.msra.mxu1 %v5258_v58  ;;  %v5272_v58 = vld [vmem:[#allocation2 + $0x4f0] sm:$0xff]  }
0x1235   :  { %4888 = vmatprep.subr.bf16.mxu1 %v5451_v37  ;;  %4943 = vmatpush3.bf16.msra.mxu0 %v5272_v58  ;;  %v3089_v58 = vshrl.u32 %v54_v7, 7  ;;  %v5280_v7 = vld [vmem:[#allocation2 + $0x530] sm:$0xff]  }
0x1236   :  { %4944 = vmatprep.subr.bf16.mxu0 %v5451_v37 }
0x1238   :  { %4889 = vmatpush3.bf16.msra.mxu1 %v5259_v20  ;;  %v5273_v20 = vld [vmem:[#allocation2 + $0x4e8] sm:$0xff]  }
0x1239   :  { %4890 = vmatprep.subr.bf16.mxu1 %v5451_v37  ;;  %4945 = vmatpush3.bf16.msra.mxu0 %v5273_v20 }
0x123a   :  { %4946 = vmatprep.subr.bf16.mxu0 %v5451_v37 }
0x123c   :  { %4891 = vmatpush3.bf16.msra.mxu1 %v5260_v59  ;;  %v5274_v59 = vld [vmem:[#allocation2 + $0x4e0] sm:$0xff]  }
0x123d   :  { %4892 = vmatprep.subr.bf16.mxu1 %v5451_v37  ;;  %4947 = vmatpush3.bf16.msra.mxu0 %v5274_v59 }
0x123e   :  { %4948 = vmatprep.subr.bf16.mxu0 %v5451_v37 }
0x1240   :  { %4893 = vmatpush3.bf16.msra.mxu1 %v5261_v18  ;;  %v5275_v18 = vld [vmem:[#allocation2 + $0x4d8] sm:$0xff]  }
0x1241   :  { %4894 = vmatprep.subr.bf16.mxu1 %v5451_v37  ;;  %4949 = vmatpush3.bf16.msra.mxu0 %v5275_v18 }
0x1242   :  { %4950 = vmatprep.subr.bf16.mxu0 %v5451_v37 }
0x1244   :  { %4895 = vmatpush3.bf16.msra.mxu1 %v5262_v60  ;;  %v5276_v60 = vld [vmem:[#allocation2 + $0x4d0] sm:$0xff]  }
0x1245   :  { %4920 = vmatprep.subr.bf16.mxu1 %v5451_v37  ;;  %4951 = vmatpush3.bf16.msra.mxu0 %v5276_v60 }
0x1246   :  { %4952 = vmatprep.subr.bf16.mxu0 %v5451_v37 }
0x12e7   :  { %v2551_v61 = vpop.f32.mrf.mxu1 }
0x12e9   :  { %v4878_v62 = vpop.f32.mrf.mxu1 }
0x12ea   :  { %v5278_v62 = vld [vmem:[#allocation2 + $0x4c0] sm:$0xff]  }
0x12eb   :  { %v2554_v63 = vpop.f32.mrf.mxu1 }
0x12ec   :  { %v2558_v0 = vpack.c.bf16 %v2554_v63, %v2551_v61  ;;  %v5277_v61 = vld [vmem:[#allocation2 + $0x4c8] sm:$0xff]   ;;  %v4115_v63 = vld [vmem:[#allocation4 + $0x98] ss:$0 sm:$0xff] }
0x12ed   :  { %v4879_v1 = vpop.f32.mrf.mxu1  ;;  %4953 = vmatpush3.bf16.msra.mxu0 %v5277_v61  ;;  %v4133_v61 = vld [vmem:[#allocation4 + $0x9a] ss:$0 sm:$0xff] }
0x12ee   :  { %4897 = vmatmul.mubr.bf16.vlgmr.msra.gmra.mxu1 %v2558_v0  ;;  %4954 = vmatprep.subr.bf16.mxu0 %v5451_v37 }
0x12ef   :  { %4936 = vmatprep.mubr.msk.bf16.mxu1 %vm5452_vm10, %v5451_v37  ;;  %4921 = vmatpush3.bf16.msra.mxu1 %v5263_v25 }
0x12f0   :  { %4922 = vmatprep.subr.bf16.mxu1 %v5451_v37 }
0x12f1   :  { %4955 = vmatpush3.bf16.msra.mxu0 %v5278_v62  ;;  %v3090_v62 = vmul.u32 8, %v3089_v58  ;;  %v5311_v58 = vld [vmem:[#allocation2 + $0x5f8] sm:$0xff]  }
0x12f2   :  { %4987 = vmatprep.subr.bf16.mxu0 %v5451_v37 }
0x12f3   :  { %4923 = vmatpush3.bf16.msra.mxu1 %v5264_v26  ;;  %vm3091_vm12 = vcmp.eq.s32.totalorder %v5518_v12, %v3090_v62  ;;  %v5281_v12 = vld [vmem:[#allocation2 + $0x528] sm:$0xff]  }
0x12f4   :  { %4924 = vmatprep.subr.bf16.mxu1 %v5451_v37  ;;  %v5313_v62 = vld [vmem:[#allocation2 + $0x5e8] sm:$0xff]  }
0x12f7   :  { %4925 = vmatpush3.bf16.msra.mxu1 %v5265_v27 }
0x12f8   :  { %4926 = vmatprep.subr.bf16.mxu1 %v5451_v37 }
0x13ae   :  { %v2657_v2 = vpop.f32.mrf.mxu1 }
0x13af   :  { %v2747_v4 = vadd.f32 %v5833_v29, %v2657_v2  ;;  %v5269_v29 = vld [vmem:[#allocation2 + $0x488] sm:$0xff]  }
0x13b0   :  { %v4898_v6 = vpop.f32.mrf.mxu1 }
0x13b1   :  { %v2758_v8 = vadd.f32 %v4112_v3, %v2747_v4 }
0x13b2   :  { %v2660_v11 = vpop.f32.mrf.mxu1 }
0x13b3   :  { %v2750_v13 = vadd.f32 %v5835_v31, %v2660_v11  ;;  %v2760_v14 = vadd.f32 %v2758_v8, %v5738_v23  ;;  %v5266_v23 = vld [vmem:[#allocation2 + $0x4a0] sm:$0xff]  }
0x13b4   :  { %v4899_v15 = vpop.f32.mrf.mxu1  ;;  %4927 = vmatpush3.bf16.msra.mxu1 %v5266_v23 }
0x13b5   :  { %v2759_v19 = vadd.f32 %v4112_v3, %v2750_v13  ;;  %2762 = vadd.xlane.f32.xlu1 %v2760_v14  ;;  %v2768_v21 = vmul.f32 %v2760_v14, %v2760_v14  ;;  %4928 = vmatprep.subr.bf16.mxu1 %v5451_v37 }
0x13b7   :  { %v2761_v22 = vadd.f32 %v2759_v19, %v5740_v17  ;;  %v5268_v17 = vld [vmem:[#allocation2 + $0x490] sm:$0xff]  }
0x13b8   :  { %4929 = vmatpush3.bf16.msra.mxu1 %v5267_v28 }
0x13b9   :  { %2770 = vadd.xlane.f32.xlu1 %v2768_v21  ;;  %2764 = vadd.xlane.f32.xlu0 %v2761_v22  ;;  %v2769_v24 = vmul.f32 %v2761_v22, %v2761_v22 }
0x13ba   :  { %4930 = vmatprep.subr.bf16.mxu1 %v5451_v37 }
0x13bc   :  { %4931 = vmatpush3.bf16.msra.mxu1 %v5268_v17 }
0x13bd   :  { %2772 = vadd.xlane.f32.xlu0 %v2769_v24  ;;  %4932 = vmatprep.subr.bf16.mxu1 %v5451_v37 }
0x13c0   :  { %4933 = vmatpush3.bf16.msra.mxu1 %v5269_v29 }
0x13c1   :  { %4934 = vmatprep.subr.bf16.mxu1 %v5451_v37 }
0x13c4   :  { %4935 = vmatpush3.bf16.msra.mxu1 %v5270_v30 }
0x13c5   :  { %4960 = vmatprep.subr.mxu1 %v5451_v37 }
0x143e   :  { %v2763_v31 = vpop.xlane.xlu1 %2762 }
0x143f   :  { %v2766_v32 = vmul.f32 0.03125, %v2763_v31 }
0x1441   :  { %v2776_v35 = vmul.f32 %v2766_v32, %v2766_v32  ;;  %v2786_v9 = vsub.f32 %v2760_v14, %v2766_v32 }
0x1442   :  { %v2771_v33 = vpop.xlane.xlu1 %2770  ;;  %v2765_v34 = vpop.xlane.xlu0 %2764 }
0x1443   :  { %v2774_v36 = vmul.f32 0.03125, %v2771_v33  ;;  %v2767_v38 = vmul.f32 0.03125, %v2765_v34  ;;  %v4124_v33 = vld [vmem:[#allocation4 + $0x99] ss:$0 sm:$0xff] }
0x1445   :  { %v2778_v39 = vsub.f32 %v2774_v36, %v2776_v35  ;;  %v2777_v42 = vmul.f32 %v2767_v38, %v2767_v38  ;;  %v2787_v16 = vsub.f32 %v2761_v22, %v2767_v38 }
0x1446   :  { %v2773_v40 = vpop.xlane.xlu0 %2772 }
0x1447   :  { %v2780_v41 = vmax.f32 %v2778_v39, 0.0  ;;  %v2775_v43 = vmul.f32 0.03125, %v2773_v40 }
0x1449   :  { %v2782_v5 = vadd.f32 1e-12, %v2780_v41  ;;  %v2779_v44 = vsub.f32 %v2775_v43, %v2777_v42 }
0x144b   :  { %5383 = vrsqrt.f32 %v2782_v5  ;;  %v2781_v45 = vmax.f32 %v2779_v44, 0.0 }
0x144d   :  { %v2783_v46 = vadd.f32 1e-12, %v2781_v45 }
0x144f   :  { %5385 = vrsqrt.f32 %v2783_v46 }
0x1458   :  { %v5384_v10 = vpop.eup %5383 }
0x1459   :  { %v2788_v47 = vmul.f32 %v5384_v10, %v2786_v9 }
0x145b   :  { %v2795_v51 = vmul.f32 %v4113_v48, %v2788_v47 }
0x145c   :  { %v5386_v49 = vpop.eup %5385 }
0x145d   :  { %v2789_v50 = vmul.f32 %v5386_v49, %v2787_v16  ;;  %v5868_v54 = vadd.f32 %v4114_v52, %v2795_v51 }
0x145f   :  { %v2796_v53 = vmul.f32 %v4113_v48, %v2789_v50 }
0x1461   :  { %v5870_v55 = vadd.f32 %v4114_v52, %v2796_v53 }
0x1463   :  { %v2804_v56 = vpack.c.bf16 %v5870_v55, %v5868_v54 }
0x1465   :  { %4937 = vmatmul.mubr.bf16.vlgmr.msra.gmra.mxu1 %v2804_v56 }
0x1466   :  { %4964 = vmatprep.mubr.msk.f32.mxu1 %vm5452_vm10, %v5451_v37 }
0x1525   :  { %v2908_v0 = vpop.f32.mrf.mxu1 }
0x1526   :  { %v2909_v1 = vadd.f32 %v4115_v63, %v2908_v0 }
0x1527   :  { %v4938_v2 = vpop.f32.mrf.mxu1 }
0x1528   :  { %v2917_v3 = vmul.f32 0.044715, %v2909_v1  ;;  %v2915_v28 = vmul.f32 0.5, %v2909_v1  ;;  %v4134_v2 = vld [vmem:[#allocation4 + $0x9b] ss:$0 sm:$0xff] }
0x1529   :  { %v2911_v4 = vpop.f32.mrf.mxu1 }
0x152a   :  { %v2919_v6 = vmul.f32 %v2917_v3, %v2909_v1  ;;  %v2912_v8 = vadd.f32 %v4115_v63, %v2911_v4 }
0x152b   :  { %v4939_v11 = vpop.f32.mrf.mxu1 }
0x152c   :  { %v2921_v13 = vmul.f32 %v2919_v6, %v2909_v1  ;;  %v2918_v14 = vmul.f32 0.044715, %v2912_v8  ;;  %v2916_v17 = vmul.f32 0.5, %v2912_v8  ;;  %v3092_v6 = vsel %vm3091_vm12, 1.0, %v5451_v37  ;;  %v5282_v11 = vld [vmem:[#allocation2 + $0x520] sm:$0xff]  }
0x152e   :  { %v2923_v15 = vadd.f32 %v2921_v13, %v2909_v1  ;;  %v2920_v19 = vmul.f32 %v2918_v14, %v2912_v8  ;;  %v5283_v13 = vld [vmem:[#allocation2 + $0x518] sm:$0xff]   ;;  %v5284_v14 = vld [vmem:[#allocation2 + $0x510] sm:$0xff]  }
0x1530   :  { %v2925_v21 = vmul.f32 0.7978846, %v2923_v15  ;;  %v2922_v22 = vmul.f32 %v2920_v19, %v2912_v8  ;;  %v5285_v15 = vld [vmem:[#allocation2 + $0x508] sm:$0xff]   ;;  %v5286_v19 = vld [vmem:[#allocation2 + $0x500] sm:$0xff]  }
0x1532   :  { %5387 = vtanh.f32 %v2925_v21  ;;  %v2924_v24 = vadd.f32 %v2922_v22, %v2912_v8  ;;  %v5279_v8 = vld [vmem:[#allocation2 + $0x538] sm:$0xff]   ;;  %v5288_v22 = vld [vmem:[#allocation2 + $0x570] sm:$0xff]  }
0x1533   :  { %v5287_v21 = vld [vmem:[#allocation2 + $0x578] sm:$0xff]  }
0x1534   :  { %v2926_v25 = vmul.f32 0.7978846, %v2924_v24  ;;  %v5289_v24 = vld [vmem:[#allocation2 + $0x568] sm:$0xff]  }
0x1536   :  { %5389 = vtanh.f32 %v2926_v25 }
0x153f   :  { %v5388_v26 = vpop.eup %5387 }
0x1540   :  { %v2929_v27 = vadd.f32 1.0, %v5388_v26 }
0x1542   :  { %v2931_v30 = vmul.f32 %v2929_v27, %v2915_v28  ;;  %v5291_v28 = vld [vmem:[#allocation2 + $0x558] sm:$0xff]  }
0x1543   :  { %v5390_v23 = vpop.eup %5389 }
0x1544   :  { %v2930_v29 = vadd.f32 1.0, %v5390_v23  ;;  %v5290_v23 = vld [vmem:[#allocation2 + $0x560] sm:$0xff]  }
0x1546   :  { %v2932_v31 = vmul.f32 %v2930_v29, %v2916_v17  ;;  %v5292_v17 = vld [vmem:[#allocation2 + $0x550] sm:$0xff]   ;;  %v5293_v29 = vld [vmem:[#allocation2 + $0x548] sm:$0xff]  }
0x1548   :  { %v2933_v32 = vpack.c.bf16 %v2932_v31, %v2931_v30  ;;  %v5294_v30 = vld [vmem:[#allocation2 + $0x540] sm:$0xff]   ;;  %v5295_v31 = vld [vmem:[#allocation2 + $0x5b8] sm:$0xff]  }
0x154a   :  { %4957 = vmatmul.mubr.bf16.vlgmr.msra.gmra.mxu0 %v2933_v32  ;;  %v5297_v32 = vld [vmem:[#allocation2 + $0x5b0] sm:$0xff]  }
0x154b   :  { %5003 = vmatprep.mubr.msk.bf16.mxu0 %vm5452_vm10, %v5451_v37  ;;  %4988 = vmatpush3.bf16.msra.mxu0 %v5287_v21  ;;  %v5331_v21 = vld [vmem:[#allocation2 + $0x698] sm:$0xff]  }
0x154c   :  { %4989 = vmatprep.subr.bf16.mxu0 %v5451_v37 }
0x154f   :  { %4990 = vmatpush3.bf16.msra.mxu0 %v5288_v22  ;;  %v5332_v22 = vld [vmem:[#allocation2 + $0x690] sm:$0xff]  }
0x1550   :  { %4991 = vmatprep.subr.bf16.mxu0 %v5451_v37 }
0x1553   :  { %4992 = vmatpush3.bf16.msra.mxu0 %v5289_v24  ;;  %v4154_v24 = vld [vmem:[#allocation4 + $0x9e] ss:$0 sm:$0xff] }
0x1554   :  { %4993 = vmatprep.subr.bf16.mxu0 %v5451_v37 }
0x1557   :  { %4994 = vmatpush3.bf16.msra.mxu0 %v5290_v23 }
0x1558   :  { %4995 = vmatprep.subr.bf16.mxu0 %v5451_v37 }
0x155b   :  { %4996 = vmatpush3.bf16.msra.mxu0 %v5291_v28 }
0x155c   :  { %4997 = vmatprep.subr.bf16.mxu0 %v5451_v37 }
0x155f   :  { %4998 = vmatpush3.bf16.msra.mxu0 %v5292_v17 }
0x1560   :  { %4999 = vmatprep.subr.bf16.mxu0 %v5451_v37 }
0x1563   :  { %5000 = vmatpush3.bf16.msra.mxu0 %v5293_v29 }
0x1564   :  { %5001 = vmatprep.subr.bf16.mxu0 %v5451_v37 }
0x1567   :  { %5002 = vmatpush3.bf16.msra.mxu0 %v5294_v30 }
0x1568   :  { %5027 = vmatprep.subr.bf16.mxu0 %v5451_v37 }
0x160a   :  { %v3037_v34 = vpop.f32.mrf.mxu0 }
0x160b   :  { %v3038_v35 = vadd.f32 %v4124_v33, %v3037_v34  ;;  %v5301_v34 = vld [vmem:[#allocation2 + $0x5a0] sm:$0xff]  }
0x160c   :  { %v4958_v36 = vpop.f32.mrf.mxu0 }
0x160d   :  { %v3044_v38 = vadd.f32 %v3038_v35, %v5868_v54  ;;  %v5303_v35 = vld [vmem:[#allocation2 + $0x598] sm:$0xff]   ;;  %v5305_v36 = vld [vmem:[#allocation2 + $0x590] sm:$0xff]  }
0x160e   :  { %v3040_v39 = vpop.f32.mrf.mxu0 }
0x160f   :  { %v3041_v40 = vadd.f32 %v4124_v33, %v3040_v39  ;;  %3046 = vadd.xlane.f32.xlu0 %v3044_v38  ;;  %v3052_v43 = vmul.f32 %v3044_v38, %v3044_v38  ;;  %v5299_v33 = vld [vmem:[#allocation2 + $0x5a8] sm:$0xff]   ;;  %v4136_v39 = vld [vmem:[#allocation4 + $0x9c] ss:$0 sm:$0xff] }
0x1610   :  { %v4959_v41 = vpop.f32.mrf.mxu0 }
0x1611   :  { %v3045_v42 = vadd.f32 %v3041_v40, %v5870_v55 }
0x1613   :  { %3054 = vadd.xlane.f32.xlu0 %v3052_v43  ;;  %3048 = vadd.xlane.f32.xlu1 %v3045_v42  ;;  %v3053_v5 = vmul.f32 %v3045_v42, %v3045_v42 }
0x1617   :  { %3056 = vadd.xlane.f32.xlu1 %v3053_v5 }
0x1698   :  { %v3047_v44 = vpop.xlane.xlu0 %3046 }
0x1699   :  { %v3050_v45 = vmul.f32 0.03125, %v3047_v44 }
0x169b   :  { %v3060_v10 = vmul.f32 %v3050_v45, %v3050_v45  ;;  %v3070_v20 = vsub.f32 %v3044_v38, %v3050_v45  ;;  %v5307_v38 = vld [vmem:[#allocation2 + $0x588] sm:$0xff]   ;;  %v5296_v45 = vld [vmem:[#allocation2 + $0x638] sm:$0xff]  }
0x169c   :  { %v3055_v46 = vpop.xlane.xlu0 %3054  ;;  %v3049_v9 = vpop.xlane.xlu1 %3048 }
0x169d   :  { %v3058_v47 = vmul.f32 0.03125, %v3055_v46  ;;  %v3051_v48 = vmul.f32 0.03125, %v3049_v9  ;;  %v5298_v9 = vld [vmem:[#allocation2 + $0x630] sm:$0xff]  }
0x169f   :  { %v3062_v16 = vsub.f32 %v3058_v47, %v3060_v10  ;;  %v3061_v51 = vmul.f32 %v3051_v48, %v3051_v48  ;;  %v3071_v59 = vsub.f32 %v3045_v42, %v3051_v48  ;;  %v5300_v10 = vld [vmem:[#allocation2 + $0x628] sm:$0xff]   ;;  %v5302_v47 = vld [vmem:[#allocation2 + $0x620] sm:$0xff]   ;;  %v5304_v48 = vld [vmem:[#allocation2 + $0x618] sm:$0xff]  }
0x16a0   :  { %v3057_v49 = vpop.xlane.xlu1 %3056 }
0x16a1   :  { %v3064_v50 = vmax.f32 %v3062_v16, 0.0  ;;  %v3059_v52 = vmul.f32 0.03125, %v3057_v49  ;;  %v5306_v16 = vld [vmem:[#allocation2 + $0x610] sm:$0xff]   ;;  %v5308_v49 = vld [vmem:[#allocation2 + $0x608] sm:$0xff]  }
0x16a3   :  { %v3066_v53 = vadd.f32 1e-12, %v3064_v50  ;;  %v3063_v54 = vsub.f32 %v3059_v52, %v3061_v51  ;;  %v5309_v50 = vld [vmem:[#allocation2 + $0x580] sm:$0xff]   ;;  %v4145_v52 = vld [vmem:[#allocation4 + $0x9d] ss:$0 sm:$0xff] }
0x16a4   :  { %v5310_v51 = vld [vmem:[#allocation2 + $0x600] sm:$0xff]  }
0x16a5   :  { %5391 = vrsqrt.f32 %v3066_v53  ;;  %v3065_v55 = vmax.f32 %v3063_v54, 0.0 }
0x16a7   :  { %v3067_v56 = vadd.f32 1e-12, %v3065_v55 }
0x16a9   :  { %5393 = vrsqrt.f32 %v3067_v56 }
0x16b2   :  { %v5392_v57 = vpop.eup %5391 }
0x16b3   :  { %v3072_v18 = vmul.f32 %v5392_v57, %v3070_v20 }
0x16b5   :  { %v3079_v1 = vmul.f32 %v4133_v61, %v3072_v18 }
0x16b6   :  { %v5394_v60 = vpop.eup %5393 }
0x16b7   :  { %v3073_v63 = vmul.f32 %v5394_v60, %v3071_v59  ;;  %v3086_v4 = vadd.f32 %v4134_v2, %v3079_v1  ;;  %v5319_v59 = vld [vmem:[#allocation2 + $0x678] sm:$0xff]   ;;  %v5312_v60 = vld [vmem:[#allocation2 + $0x5f0] sm:$0xff]   ;;  %v5322_v1 = vld [vmem:[#allocation2 + $0x660] sm:$0xff]  }
0x16b9   :  { %v3080_v0 = vmul.f32 %v4133_v61, %v3073_v63  ;;  %v5320_v61 = vld [vmem:[#allocation2 + $0x670] sm:$0xff]   ;;  %v5321_v63 = vld [vmem:[#allocation2 + $0x668] sm:$0xff]  }
0x16bb   :  { %v3087_v3 = vadd.f32 %v4134_v2, %v3080_v0  ;;  %v5314_v0 = vld [vmem:[#allocation2 + $0x5e0] sm:$0xff]   ;;  %v5315_v2 = vld [vmem:[#allocation2 + $0x5d8] sm:$0xff]  }
0x16bd   :  { %4961 = vmatpush3.msra.mxu1 %v3087_v3  ;;  %v5323_v3 = vld [vmem:[#allocation2 + $0x658] sm:$0xff]  }
0x16be   :  { %4962 = vmatprep.subr.mxu1 %v5451_v37 }
0x16bf   :  { %4963 = vmatpush3.msra.mxu1 %v3086_v4  ;;  %v5316_v4 = vld [vmem:[#allocation2 + $0x5d0] sm:$0xff]  }
0x16c0   :  { %4965 = vmatmul.mubr.msk.f32.vlgmr.msra.gmra.mxu1 %vm602_vm11, %v3092_v6  ;;  %4967 = vmatprep.subr.bf16.mxu1 %v5451_v37  ;;  %v5324_v6 = vld [vmem:[#allocation2 + $0x650] sm:$0xff]  }
0x16c1   :  { %4968 = vmatpush3.bf16.msra.mxu1 %v5279_v8  ;;  %4983 = vmatprep.mubr.msk.bf16.mxu1 %vm5452_vm10, %v5451_v37  ;;  %v5317_v8 = vld [vmem:[#allocation2 + $0x5c8] sm:$0xff]  }
0x16c2   :  { %4969 = vmatprep.subr.bf16.mxu1 %v5451_v37 }
0x16c5   :  { %4970 = vmatpush3.bf16.msra.mxu1 %v5280_v7  ;;  %v5325_v7 = vld [vmem:[#allocation2 + $0x648] sm:$0xff]  }
0x16c6   :  { %4971 = vmatprep.subr.bf16.mxu1 %v5451_v37 }
0x16c9   :  { %4972 = vmatpush3.bf16.msra.mxu1 %v5281_v12  ;;  %v5318_v12 = vld [vmem:[#allocation2 + $0x5c0] sm:$0xff]  }
0x16ca   :  { %4973 = vmatprep.subr.bf16.mxu1 %v5451_v37 }
0x16cd   :  { %4974 = vmatpush3.bf16.msra.mxu1 %v5282_v11  ;;  %v5326_v11 = vld [vmem:[#allocation2 + $0x640] sm:$0xff]  }
0x16ce   :  { %4975 = vmatprep.subr.bf16.mxu1 %v5451_v37 }
0x16d1   :  { %4976 = vmatpush3.bf16.msra.mxu1 %v5283_v13  ;;  %v5327_v13 = vld [vmem:[#allocation2 + $0x6b8] sm:$0xff]  }
0x16d2   :  { %4977 = vmatprep.subr.bf16.mxu1 %v5451_v37 }
0x16d5   :  { %4978 = vmatpush3.bf16.msra.mxu1 %v5284_v14  ;;  %v5328_v14 = vld [vmem:[#allocation2 + $0x6b0] sm:$0xff]  }
0x16d6   :  { %4979 = vmatprep.subr.bf16.mxu1 %v5451_v37 }
0x16d9   :  { %4980 = vmatpush3.bf16.msra.mxu1 %v5285_v15  ;;  %v5329_v15 = vld [vmem:[#allocation2 + $0x6a8] sm:$0xff]  }
0x16da   :  { %4981 = vmatprep.subr.bf16.mxu1 %v5451_v37 }
0x16dd   :  { %4982 = vmatpush3.bf16.msra.mxu1 %v5286_v19  ;;  %v5330_v19 = vld [vmem:[#allocation2 + $0x6a0] sm:$0xff]  }
0x16de   :  { %5007 = vmatprep.subr.bf16.mxu1 %v5451_v37 }
0x1780   :  { %v3162_v25 = vpop.f32.mrf.mxu1 }
0x1781   :  { %v3166_v26 = vpack.c.bf16 %v3162_v25, %v3162_v25 }
0x1782   :  { %v4966_v27 = vpop.f32.mrf.mxu1 }
0x1783   :  { %4984 = vmatmul.mubr.bf16.vlgmr.msra.gmra.mxu1 %v3166_v26 }
0x1784   :  { %5023 = vmatprep.mubr.msk.bf16.mxu1 %vm5452_vm10, %v5451_v37  ;;  %5008 = vmatpush3.bf16.msra.mxu1 %v5295_v31 }
0x1785   :  { %5009 = vmatprep.subr.bf16.mxu1 %v5451_v37 }
0x1788   :  { %5010 = vmatpush3.bf16.msra.mxu1 %v5297_v32 }
0x1789   :  { %5011 = vmatprep.subr.bf16.mxu1 %v5451_v37 }
0x178c   :  { %5012 = vmatpush3.bf16.msra.mxu1 %v5299_v33 }
0x178d   :  { %5013 = vmatprep.subr.bf16.mxu1 %v5451_v37 }
0x1790   :  { %5014 = vmatpush3.bf16.msra.mxu1 %v5301_v34 }
0x1791   :  { %5015 = vmatprep.subr.bf16.mxu1 %v5451_v37 }
0x1794   :  { %5016 = vmatpush3.bf16.msra.mxu1 %v5303_v35 }
0x1795   :  { %5017 = vmatprep.subr.bf16.mxu1 %v5451_v37 }
0x1798   :  { %5018 = vmatpush3.bf16.msra.mxu1 %v5305_v36 }
0x1799   :  { %5019 = vmatprep.subr.bf16.mxu1 %v5451_v37 }
0x179c   :  { %5020 = vmatpush3.bf16.msra.mxu1 %v5307_v38 }
0x179d   :  { %5021 = vmatprep.subr.bf16.mxu1 %v5451_v37 }
0x17a0   :  { %5022 = vmatpush3.bf16.msra.mxu1 %v5309_v50 }
0x17a1   :  { %5047 = vmatprep.subr.bf16.mxu1 %v5451_v37 }
0x1843   :  { %v3270_v40 = vpop.f32.mrf.mxu1 }
0x1844   :  { %v3271_v41 = vadd.f32 %v4136_v39, %v3270_v40  ;;  %v5333_v39 = vld [vmem:[#allocation2 + $0x688] sm:$0xff]   ;;  %v5334_v40 = vld [vmem:[#allocation2 + $0x680] sm:$0xff]  }
0x1845   :  { %v4985_v42 = vpop.f32.mrf.mxu1 }
0x1846   :  { %5395 = vtanh.f32 %v3271_v41  ;;  %v4187_v42 = vld [vmem:[#allocation4 + $0x9f] ss:$0 sm:$0xff] }
0x1847   :  { %v3273_v43 = vpop.f32.mrf.mxu1 }
0x1849   :  { %v4986_v5 = vpop.f32.mrf.mxu1 }
0x1853   :  { %v5396_v44 = vpop.eup %5395 }
0x1854   :  { %v5921_v46 = vpack.c.bf16 %v5396_v44, %v5396_v44 }
0x1856   :  { %5004 = vmatmul.mubr.bf16.vlgmr.msra.gmra.mxu0 %v5921_v46 }
0x1857   :  { %5028 = vmatpush3.bf16.msra.mxu0 %v5296_v45  ;;  %5043 = vmatprep.mubr.msk.bf16.mxu0 %vm5452_vm10, %v5451_v37 }
0x1858   :  { %5029 = vmatprep.subr.bf16.mxu0 %v5451_v37 }
0x185b   :  { %5030 = vmatpush3.bf16.msra.mxu0 %v5298_v9 }
0x185c   :  { %5031 = vmatprep.subr.bf16.mxu0 %v5451_v37 }
0x185f   :  { %5032 = vmatpush3.bf16.msra.mxu0 %v5300_v10 }
0x1860   :  { %5033 = vmatprep.subr.bf16.mxu0 %v5451_v37 }
0x1863   :  { %5034 = vmatpush3.bf16.msra.mxu0 %v5302_v47  ;;  %v4188_v47 = vld [vmem:[#allocation4 + $0xa0] ss:$0 sm:$0xff] }
0x1864   :  { %5035 = vmatprep.subr.bf16.mxu0 %v5451_v37 }
0x1867   :  { %5036 = vmatpush3.bf16.msra.mxu0 %v5304_v48 }
0x1868   :  { %5037 = vmatprep.subr.bf16.mxu0 %v5451_v37 }
0x186b   :  { %5038 = vmatpush3.bf16.msra.mxu0 %v5306_v16 }
0x186c   :  { %5039 = vmatprep.subr.bf16.mxu0 %v5451_v37 }
0x186f   :  { %5040 = vmatpush3.bf16.msra.mxu0 %v5308_v49 }
0x1870   :  { %5041 = vmatprep.subr.bf16.mxu0 %v5451_v37 }
0x1873   :  { %5042 = vmatpush3.bf16.msra.mxu0 %v5310_v51 }
0x1874   :  { %5067 = vmatprep.subr.bf16.mxu0 %v5451_v37 }
0x1916   :  { %v3381_v53 = vpop.f32.mrf.mxu0 }
0x1917   :  { %v3382_v54 = vadd.f32 %v4145_v52, %v3381_v53 }
0x1918   :  { %v5005_v55 = vpop.f32.mrf.mxu0 }
0x1919   :  { %v3387_v56 = vmax.f32 %v3382_v54, 0.0 }
0x191a   :  { %v3384_v57 = vpop.f32.mrf.mxu0 }
0x191b   :  { %v3388_v20 = vpack.c.bf16 %v3387_v56, %v3387_v56 }
0x191c   :  { %v5006_v18 = vpop.f32.mrf.mxu0 }
0x191d   :  { %5024 = vmatmul.mubr.bf16.vlgmr.msra.gmra.mxu1 %v3388_v20  ;;  %5044 = vmatmul.mubr.bf16.vlgmr.msra.gmra.mxu0 %v3388_v20 }
0x191e   :  { %5048 = vmatpush3.bf16.msra.mxu1 %v5311_v58  ;;  %5063 = vmatprep.mubr.msk.bf16.mxu1 %vm5452_vm10, %v5451_v37 }
0x191f   :  { %5049 = vmatprep.subr.bf16.mxu1 %v5451_v37  ;;  %5068 = vmatpush3.bf16.msra.mxu0 %v5319_v59 }
0x1920   :  { %5069 = vmatprep.subr.bf16.mxu0 %v5451_v37  ;;  %5083 = vmatprep.mubr.msk.bf16.mxu0 %vm5452_vm10, %v5451_v37 }
0x1922   :  { %5050 = vmatpush3.bf16.msra.mxu1 %v5312_v60 }
0x1923   :  { %5051 = vmatprep.subr.bf16.mxu1 %v5451_v37  ;;  %5070 = vmatpush3.bf16.msra.mxu0 %v5320_v61 }
0x1924   :  { %5071 = vmatprep.subr.bf16.mxu0 %v5451_v37 }
0x1926   :  { %5052 = vmatpush3.bf16.msra.mxu1 %v5313_v62 }
0x1927   :  { %5053 = vmatprep.subr.bf16.mxu1 %v5451_v37  ;;  %5072 = vmatpush3.bf16.msra.mxu0 %v5321_v63 }
0x1928   :  { %5073 = vmatprep.subr.bf16.mxu0 %v5451_v37 }
0x192a   :  { %5054 = vmatpush3.bf16.msra.mxu1 %v5314_v0 }
0x192b   :  { %5055 = vmatprep.subr.bf16.mxu1 %v5451_v37  ;;  %5074 = vmatpush3.bf16.msra.mxu0 %v5322_v1 }
0x192c   :  { %5075 = vmatprep.subr.bf16.mxu0 %v5451_v37 }
0x192e   :  { %5056 = vmatpush3.bf16.msra.mxu1 %v5315_v2 }
0x192f   :  { %5057 = vmatprep.subr.bf16.mxu1 %v5451_v37  ;;  %5076 = vmatpush3.bf16.msra.mxu0 %v5323_v3 }
0x1930   :  { %5077 = vmatprep.subr.bf16.mxu0 %v5451_v37 }
0x1932   :  { %5058 = vmatpush3.bf16.msra.mxu1 %v5316_v4 }
0x1933   :  { %5059 = vmatprep.subr.bf16.mxu1 %v5451_v37  ;;  %5078 = vmatpush3.bf16.msra.mxu0 %v5324_v6 }
0x1934   :  { %5079 = vmatprep.subr.bf16.mxu0 %v5451_v37 }
0x1936   :  { %5060 = vmatpush3.bf16.msra.mxu1 %v5317_v8 }
0x1937   :  { %5061 = vmatprep.subr.bf16.mxu1 %v5451_v37  ;;  %5080 = vmatpush3.bf16.msra.mxu0 %v5325_v7 }
0x1938   :  { %5081 = vmatprep.subr.bf16.mxu0 %v5451_v37 }
0x193a   :  { %5062 = vmatpush3.bf16.msra.mxu1 %v5318_v12 }
0x193b   :  { %5087 = vmatprep.subr.bf16.mxu1 %v5451_v37  ;;  %5082 = vmatpush3.bf16.msra.mxu0 %v5326_v11 }
0x193d   :  { %5064 = vmatmul.mubr.bf16.vlgmr.msra.gmra.mxu1 %v5921_v46 }
0x193e   :  { %5103 = vmatprep.mubr.msk.bf16.mxu1 %vm5452_vm10, %v5451_v37  ;;  %5088 = vmatpush3.bf16.msra.mxu1 %v5327_v13 }
0x193f   :  { %5089 = vmatprep.subr.bf16.mxu1 %v5451_v37 }
0x1942   :  { %5090 = vmatpush3.bf16.msra.mxu1 %v5328_v14 }
0x1943   :  { %5091 = vmatprep.subr.bf16.mxu1 %v5451_v37 }
0x1946   :  { %5092 = vmatpush3.bf16.msra.mxu1 %v5329_v15 }
0x1947   :  { %5093 = vmatprep.subr.bf16.mxu1 %v5451_v37 }
0x194a   :  { %5094 = vmatpush3.bf16.msra.mxu1 %v5330_v19 }
0x194b   :  { %5095 = vmatprep.subr.bf16.mxu1 %v5451_v37 }
0x194e   :  { %5096 = vmatpush3.bf16.msra.mxu1 %v5331_v21 }
0x194f   :  { %5097 = vmatprep.subr.bf16.mxu1 %v5451_v37 }
0x1952   :  { %5098 = vmatpush3.bf16.msra.mxu1 %v5332_v22 }
0x1953   :  { %5099 = vmatprep.subr.bf16.mxu1 %v5451_v37 }
0x1956   :  { %5100 = vmatpush3.bf16.msra.mxu1 %v5333_v39 }
0x1957   :  { %5101 = vmatprep.subr.bf16.mxu1 %v5451_v37 }
0x195a   :  { %5102 = vmatpush3.bf16.msra.mxu1 %v5334_v40 }
0x19dd   :  { %v3492_v25 = vpop.f32.mrf.mxu1  ;;  %v3612_v26 = vpop.f32.mrf.mxu0 }
0x19de   :  { %v3493_v27 = vadd.f32 %v4154_v24, %v3492_v25 }
0x19df   :  { %v5025_v23 = vpop.f32.mrf.mxu1  ;;  %v5045_v28 = vpop.f32.mrf.mxu0 }
0x19e0   :  { %v3706_v17 = vpack.c.bf16 %v3493_v27, %v3493_v27  ;;  %3930 = vst [vmem:[%s5977_s7] sm:$0xff] %v3493_v27 }
0x19e1   :  { %v3495_v29 = vpop.f32.mrf.mxu1  ;;  %v3615_v30 = vpop.f32.mrf.mxu0 }
0x19e2   :  { %5084 = vmatmul.mubr.bf16.vlgmr.msra.gmra.mxu0 %v3706_v17 }
0x19e3   :  { %v5026_v31 = vpop.f32.mrf.mxu1  ;;  %v5046_v32 = vpop.f32.mrf.mxu0 }
0x19fd   :  { %v3700_v33 = vpop.f32.mrf.mxu1 }
0x19fe   :  { %v3701_v34 = vadd.f32 %v3700_v33, %v3612_v26 }
0x19ff   :  { %v5065_v35 = vpop.f32.mrf.mxu1 }
0x1a01   :  { %v3703_v36 = vpop.f32.mrf.mxu1 }
0x1a03   :  { %v5066_v38 = vpop.f32.mrf.mxu1 }
0x1aa2   :  { %v3805_v41 = vpop.f32.mrf.mxu0 }
0x1aa3   :  { %v3811_v43 = vadd.f32 %v3805_v41, %v3701_v34 }
0x1aa4   :  { %v5085_v5 = vpop.f32.mrf.mxu0 }
0x1aa5   :  { %v3817_v44 = vadd.f32 %v4187_v42, %v3811_v43 }
0x1aa6   :  { %v3808_v45 = vpop.f32.mrf.mxu0 }
0x1aa7   :  { %v3818_v46 = vmax.f32 %v3817_v44, 0.0 }
0x1aa8   :  { %v5086_v9 = vpop.f32.mrf.mxu0 }
0x1aa9   :  { %v3819_v10 = vpack.c.bf16 %v3818_v46, %v3818_v46 }
0x1aab   :  { %5104 = vmatmul.mubr.bf16.vlgmr.msra.gmra.mxu1 %v3819_v10 }
0x1b6b   :  { %v3923_v48 = vpop.f32.mrf.mxu1 }
0x1b6c   :  { %v3924_v16 = vadd.f32 %v4188_v47, %v3923_v48 }
0x1b6d   :  { %v5105_v49 = vpop.f32.mrf.mxu1 }
0x1b6e   :  { %3929 = vst [vmem:[%s5976_s6] sm:$0xff] %v3924_v16 }
0x1b6f   :  { %v3926_v37 = vpop.f32.mrf.mxu1 }
0x1b71   :  { %v5106_v50 = vpop.f32.mrf.mxu1 }
0x1b72   :  { %3939 = vsyncpa [#allocation3], 1 }
0x1b73   :  { %3940 = vsyncpa [#allocation5], 1 }

</bundles_post_ra>
